<compile_context>
chip_gen: v6e
topology: v6e:2x2x1
jax: 0.10.0
libtpu: 0.0.40
codegen_flags: <defaults>
</compile_context>

<pallas_src>
import jax
import jax.numpy as jnp
from jax import lax
from jax.experimental import pallas as pl
from jax.experimental.pallas import tpu as pltpu


def recurrent_attention_kernel(
    # inputs
    x_ref,      # (T*Bp, Din) bf16  time-major flattened inputs, row = t*Bp + b
    h0_ref,     # (Bp, H)  f32
    c0_ref,     # (Bp, H)  f32
    wih_ref,    # (Din, 4H) bf16   fused gate weights, column blocks i|f|g|o
    whh_ref,    # (H, 4H)  bf16
    b_ref,      # (1, 4H)  f32     b_ih + b_hh
    ctx_ref,    # (Bp*Tk, C) bf16  attention keys, row = b*Tk + k (single copy)
    clen_ref,   # (Bp,)   int32    SMEM: valid key length per batch row
    wq_ref,     # (H, C)  bf16     linear_q.weight.T
    wk_ref,     # (C, C)  bf16     linear_k.weight.T
    nb_ref,     # (1, C)  f32      normalize_bias
    v_ref,      # (1, C)  f32      pre-normalized attention vector (v / ||v|| * g)
    # outputs
    rnn_ref,    # (T*Bp, H)  f32
    hn_ref,     # (Bp, H)    f32
    cn_ref,     # (Bp, H)    f32
    attn_ref,   # (T*Bp, C)  f32
    sc_ref,     # (T*Bp, Tk) f32
    # scratch
    xp_s,       # (T*Bp, 4H) f32   hoisted input projection
):
    TB = xp_s.shape[0]
    Bp, H = h0_ref.shape
    T = TB // Bp
    BTk, C = ctx_ref.shape
    Tk = BTk // Bp

    # ---- hoisted input projection: one bf16 MXU matmul over all T*Bp rows, bias folded ----
    xp_s[...] = (
        jnp.dot(x_ref[...], wih_ref[...], preferred_element_type=jnp.float32)
        + b_ref[...]
    )

    # ---- LSTM recurrence: one fused (Bp, 4H=128) bf16 matmul per step, fully unrolled ----
    whh = whh_ref[...]
    h = h0_ref[...]
    c = c0_ref[...]
    h_slabs = []
    for t in range(T):                                    # static T -> unrolled, static slices
        gates = xp_s[pl.ds(t * Bp, Bp), :] + jnp.dot(
            h.astype(jnp.bfloat16), whh, preferred_element_type=jnp.float32)
        i_g = jax.nn.sigmoid(gates[:, 0 * H:1 * H])
        f_g = jax.nn.sigmoid(gates[:, 1 * H:2 * H])
        g_g = jnp.tanh(gates[:, 2 * H:3 * H])
        o_g = jax.nn.sigmoid(gates[:, 3 * H:4 * H])
        c = f_g * c + i_g * g_g
        h = o_g * jnp.tanh(c)
        h_slabs.append(h)
    rnn_all = jnp.concatenate(h_slabs, axis=0)            # (T*Bp, H)
    rnn_ref[...] = rnn_all                                # ONE whole-slab store
    hn_ref[...] = h
    cn_ref[...] = c

    # ---- normalized Bahdanau attention, fully batched over (t, b) ----
    # key projection: single bf16 matmul; (Bp, Tk, C) view is a free leading-dim split
    pk_b = jnp.dot(ctx_ref[...], wk_ref[...],
                   preferred_element_type=jnp.float32).reshape(Bp, Tk, C)
    key_b = ctx_ref[...].reshape(Bp, Tk, C)

    # query projection: single bf16 matmul over all timesteps
    pq = jnp.dot(rnn_all.astype(jnp.bfloat16), wq_ref[...],
                 preferred_element_type=jnp.float32)       # (T*Bp, C)

    # replicate per-batch keys over time (leading-dim broadcast + leading-dim merge only)
    pk_t = jnp.broadcast_to(pk_b[None], (T, Bp, Tk, C)).reshape(TB, Tk, C)
    key_t = jnp.broadcast_to(key_b[None], (T, Bp, Tk, C)).reshape(TB, Tk, C)
    key_t = key_t.astype(jnp.float32)

    s = jnp.tanh(pq[:, None, :] + pk_t + nb_ref[...])      # (T*Bp, Tk, C)
    scores = jnp.sum(s * v_ref[...], axis=-1)              # (T*Bp, Tk)

    # mask key positions >= context_len[b], b = row % Bp; lengths come from the scalar path
    kidx = lax.broadcasted_iota(jnp.int32, (TB, Tk), 1)
    bidx = lax.broadcasted_iota(jnp.int32, (T, Bp, Tk), 1).reshape(TB, Tk)
    clen_mat = jnp.zeros((TB, Tk), jnp.int32)
    for bb in range(Bp):                                   # Bp scalar reads from SMEM
        clen_mat = jnp.where(bidx == bb, clen_ref[bb], clen_mat)
    scores = jnp.where(kidx >= clen_mat, jnp.float32(-65504.0), scores)

    # softmax over keys
    m = jnp.max(scores, axis=-1, keepdims=True)
    e = jnp.exp(scores - m)
    p = e / jnp.sum(e, axis=-1, keepdims=True)

    sc_ref[...] = p                                        # whole-slab store
    # TODO(synk): at production sizes compute this combine as a batched MXU matmul
    #             (batch-major einsum) and grid the attention phase over T.
    attn_ref[...] = jnp.sum(p[:, :, None] * key_t, axis=1)  # (T*Bp, C), lane-dense store


def recurrent_attention(inputs, hidden, context, context_len, params):
    T, B, Din = inputs.shape
    Tk, _, C = context.shape
    H = params["w_hh"].shape[0]
    h0, c0 = hidden

    # ---- layout plumbing in XLA (free): pad batch to one sublane group, flatten, cast ----
    Bp = max(8, ((B + 7) // 8) * 8)
    pad = Bp - B
    x_p = jnp.pad(inputs, ((0, 0), (0, pad), (0, 0)))
    h0_p = jnp.pad(h0[0], ((0, pad), (0, 0)))
    c0_p = jnp.pad(c0[0], ((0, pad), (0, 0)))
    ctx_p = jnp.pad(context, ((0, 0), (0, pad), (0, 0)))
    clen_p = jnp.pad(context_len.astype(jnp.int32), (0, pad), constant_values=Tk)

    x_flat = x_p.reshape(T * Bp, Din).astype(jnp.bfloat16)            # time-major rows
    ctx_flat = jnp.transpose(ctx_p, (1, 0, 2)).reshape(Bp * Tk, C).astype(jnp.bfloat16)

    # pre-normalize attention vector once (v / ||v|| * g) — pure XLA, free
    latt = params["latt"]
    v_norm = (latt * params["nscalar"]
              * lax.rsqrt(jnp.sum(latt * latt))).astype(jnp.float32)

    vmem = pl.BlockSpec(memory_space=pltpu.MemorySpace.VMEM)
    smem = pl.BlockSpec(memory_space=pltpu.MemorySpace.SMEM)

    out_shapes = (
        jax.ShapeDtypeStruct((T * Bp, H), jnp.float32),     # rnn_outputs (flat, padded)
        jax.ShapeDtypeStruct((Bp, H), jnp.float32),         # h_n
        jax.ShapeDtypeStruct((Bp, H), jnp.float32),         # c_n
        jax.ShapeDtypeStruct((T * Bp, C), jnp.float32),     # attn_outputs (flat, padded)
        jax.ShapeDtypeStruct((T * Bp, Tk), jnp.float32),    # scores (flat, padded)
    )

    rnn_flat, h_n, c_n, attn_flat, sc_flat = pl.pallas_call(
        recurrent_attention_kernel,
        out_shape=out_shapes,
        in_specs=[vmem, vmem, vmem, vmem, vmem, vmem,       # x, h0, c0, w_ih, w_hh, b
                  vmem, smem,                               # ctx_flat, context_len (SMEM)
                  vmem, vmem, vmem, vmem],                  # wq, wk, nbias, v_norm
        out_specs=(vmem,) * 5,
        scratch_shapes=[pltpu.VMEM((T * Bp, 4 * H), jnp.float32)],
        compiler_params=pltpu.CompilerParams(vmem_limit_bytes=32 * 1024 * 1024),
    )(
        x_flat, h0_p, c0_p,
        params["w_ih"], params["w_hh"], params["b"],
        ctx_flat, clen_p,
        params["wq"], params["wk"],
        params["nbias"], v_norm,
    )

    rnn_out = rnn_flat.reshape(T, Bp, H)[:, :B]
    attn_out = attn_flat.reshape(T, Bp, C)[:, :B]
    scores = sc_flat.reshape(T, Bp, Tk)[:, :B]
    # dropout p=0 -> identity on rnn_out
    return rnn_out, (h_n[:B][None], c_n[:B][None]), attn_out, scores


def init_params(key, input_size, context_size, hidden_size):
    Din, C, H = input_size, context_size, hidden_size
    ks = jax.random.split(key, 7)

    def u(k, shape, scale):
        return jax.random.uniform(k, shape, jnp.float32, -scale, scale)

    stdv_lstm = 1.0 / (H ** 0.5)
    w_ih = u(ks[0], (4 * H, Din), stdv_lstm)      # PyTorch layout, row blocks i|f|g|o
    w_hh = u(ks[1], (4 * H, H), stdv_lstm)
    b_ih = u(ks[2], (4 * H,), stdv_lstm)
    b_hh = u(ks[3], (4 * H,), stdv_lstm)

    # BahdanauAttention(query=H, key=C, num_units=C, normalize=True)
    init_w = 0.1
    wq = u(ks[4], (C, H), init_w)                 # linear_q.weight (C, H)
    wk = u(ks[5], (C, C), init_w)                 # linear_k.weight (C, C)
    latt = u(ks[6], (C,), init_w).reshape(1, C)

    return {
        # fused-gate kernel layout; MXU operands stored as bf16
        "w_ih": w_ih.T.astype(jnp.bfloat16),             # (Din, 4H)
        "w_hh": w_hh.T.astype(jnp.bfloat16),             # (H, 4H)
        "b": (b_ih + b_hh).reshape(1, 4 * H),            # f32
        "wq": wq.T.astype(jnp.bfloat16),                 # (H, C)
        "wk": wk.T.astype(jnp.bfloat16),                 # (C, C)
        "latt": latt,                                    # (1, C) f32
        "nbias": jnp.zeros((1, C), jnp.float32),         # normalize_bias init = 0
        "nscalar": jnp.float32(1.0 / (C ** 0.5)),        # normalize_scalar init = stdv
    }


if __name__ == "__main__":
    # 4H = 128 and C = 128 -> lane-dense gate and attention slabs
    T, B, Din, H, C, Tk = 8, 2, 32, 32, 128, 8

    key = jax.random.PRNGKey(0)
    kp, kx, kh, kc, kctx = jax.random.split(key, 5)

    params = init_params(kp, Din, C, H)

    inputs = jax.random.normal(kx, (T, B, Din), jnp.float32)
    h0 = jax.random.normal(kh, (1, B, H), jnp.float32)
    c0 = jax.random.normal(kc, (1, B, H), jnp.float32)
    context = jax.random.normal(kctx, (Tk, B, C), jnp.float32)
    context_len = jnp.array([Tk, Tk - 3], dtype=jnp.int32)

    rnn_out, (h_n, c_n), attn_out, scores = recurrent_attention(
        inputs, (h0, c0), context, context_len, params
    )
    jax.block_until_ready((rnn_out, h_n, c_n, attn_out, scores))

    # sanity checks on semantics
    assert rnn_out.shape == (T, B, H)
    assert h_n.shape == (1, B, H) and c_n.shape == (1, B, H)
    assert attn_out.shape == (T, B, C)
    assert scores.shape == (T, B, Tk)
    assert bool(jnp.all(jnp.isfinite(rnn_out)))
    assert bool(jnp.all(jnp.isfinite(attn_out)))
    assert bool(jnp.all(jnp.isfinite(scores)))
    # softmax rows sum to 1
    assert bool(jnp.allclose(jnp.sum(scores, axis=-1), 1.0, atol=1e-4))
    # masked key positions (>= context_len) receive ~zero attention weight
    assert bool(jnp.all(scores[:, 1, int(context_len[1]):] < 1e-6))

    print("KERNEL_OK")
</pallas_src>

<mosaic_0001>
module attributes {stable_mosaic.version = 11 : i64} {
  func.func @recurrent_attention_kernel(%arg0: memref<64x32xbf16, #tpu.memory_space<vmem>>, %arg1: memref<8x32xf32, #tpu.memory_space<vmem>>, %arg2: memref<8x32xf32, #tpu.memory_space<vmem>>, %arg3: memref<32x128xbf16, #tpu.memory_space<vmem>>, %arg4: memref<32x128xbf16, #tpu.memory_space<vmem>>, %arg5: memref<1x128xf32, #tpu.memory_space<vmem>>, %arg6: memref<64x128xbf16, #tpu.memory_space<vmem>>, %arg7: memref<8xi32, #tpu.memory_space<smem>>, %arg8: memref<32x128xbf16, #tpu.memory_space<vmem>>, %arg9: memref<128x128xbf16, #tpu.memory_space<vmem>>, %arg10: memref<1x128xf32, #tpu.memory_space<vmem>>, %arg11: memref<1x128xf32, #tpu.memory_space<vmem>>, %arg12: memref<64x32xf32, #tpu.memory_space<vmem>>, %arg13: memref<8x32xf32, #tpu.memory_space<vmem>>, %arg14: memref<8x32xf32, #tpu.memory_space<vmem>>, %arg15: memref<64x128xf32, #tpu.memory_space<vmem>>, %arg16: memref<64x8xf32, #tpu.memory_space<vmem>>, %arg17: memref<64x128xf32, #tpu.memory_space<vmem>>) attributes {dimension_semantics = [], scalar_prefetch = 0 : i64, scratch_operands = 1 : i64, tpu.core_type = #tpu.core_type<tc>} {
    %c0 = arith.constant 0 : index
    %c0_0 = arith.constant 0 : index
    %0 = vector.load %arg0[%c0, %c0_0] : memref<64x32xbf16, #tpu.memory_space<vmem>>, vector<64x32xbf16>
    %c0_1 = arith.constant 0 : index
    %c0_2 = arith.constant 0 : index
    %1 = vector.load %arg3[%c0_1, %c0_2] : memref<32x128xbf16, #tpu.memory_space<vmem>>, vector<32x128xbf16>
    %cst = arith.constant dense<0.000000e+00> : vector<64x128xf32>
    %2 = tpu.matmul %0, %1, %cst {dimension_numbers = #tpu.dot_dimension_numbers<[1], [0], [0], [1], [0, 0, 1, 1], [], []>} : vector<64x32xbf16>, vector<32x128xbf16>, vector<64x128xf32> -> vector<64x128xf32>
    %c0_3 = arith.constant 0 : index
    %c0_4 = arith.constant 0 : index
    %3 = vector.load %arg5[%c0_3, %c0_4] : memref<1x128xf32, #tpu.memory_space<vmem>>, vector<1x128xf32>
    %4 = vector.broadcast %3 : vector<1x128xf32> to vector<64x128xf32>
    %5 = arith.addf %2, %4 : vector<64x128xf32>
    %c0_5 = arith.constant 0 : index
    %c0_6 = arith.constant 0 : index
    %6 = vector.load %arg17[%c0_5, %c0_6] : memref<64x128xf32, #tpu.memory_space<vmem>>, vector<64x128xf32>
    tpu.vector_store %arg17[%c0_5, %c0_6], %5 {strides = array<i32>} : memref<64x128xf32, #tpu.memory_space<vmem>>, vector<64x128xf32>,
    %c0_7 = arith.constant 0 : index
    %c0_8 = arith.constant 0 : index
    %7 = vector.load %arg4[%c0_7, %c0_8] : memref<32x128xbf16, #tpu.memory_space<vmem>>, vector<32x128xbf16>
    %c0_9 = arith.constant 0 : index
    %c0_10 = arith.constant 0 : index
    %8 = vector.load %arg1[%c0_9, %c0_10] : memref<8x32xf32, #tpu.memory_space<vmem>>, vector<8x32xf32>
    %c0_11 = arith.constant 0 : index
    %c0_12 = arith.constant 0 : index
    %9 = vector.load %arg2[%c0_11, %c0_12] : memref<8x32xf32, #tpu.memory_space<vmem>>, vector<8x32xf32>
    %c0_13 = arith.constant 0 : index
    %c0_14 = arith.constant 0 : index
    %10 = vector.load %arg17[%c0_13, %c0_14] : memref<64x128xf32, #tpu.memory_space<vmem>>, vector<8x128xf32>
    %11 = arith.truncf %8 : vector<8x32xf32> to vector<8x32xbf16>
    %cst_15 = arith.constant dense<0.000000e+00> : vector<8x128xf32>
    %12 = tpu.matmul %11, %7, %cst_15 {dimension_numbers = #tpu.dot_dimension_numbers<[1], [0], [0], [1], [0, 0, 1, 1], [], []>} : vector<8x32xbf16>, vector<32x128xbf16>, vector<8x128xf32> -> vector<8x128xf32>
    %13 = arith.addf %10, %12 : vector<8x128xf32>
    %14 = vector.extract_strided_slice %13 {offsets = [0, 0], sizes = [8, 32], strides = [1, 1]} : vector<8x128xf32> to vector<8x32xf32>
    %15 = arith.negf %14 : vector<8x32xf32>
    %16 = math.exp %15 : vector<8x32xf32>
    %cst_16 = arith.constant 1.000000e+00 : f32
    %17 = vector.broadcast %cst_16 : f32 to vector<8x32xf32>
    %18 = arith.addf %17, %16 : vector<8x32xf32>
    %19 = arith.divf %17, %18 : vector<8x32xf32>
    %20 = vector.extract_strided_slice %13 {offsets = [0, 32], sizes = [8, 32], strides = [1, 1]} : vector<8x128xf32> to vector<8x32xf32>
    %21 = arith.negf %20 : vector<8x32xf32>
    %22 = math.exp %21 : vector<8x32xf32>
    %cst_17 = arith.constant 1.000000e+00 : f32
    %23 = vector.broadcast %cst_17 : f32 to vector<8x32xf32>
    %24 = arith.addf %23, %22 : vector<8x32xf32>
    %25 = arith.divf %23, %24 : vector<8x32xf32>
    %26 = vector.extract_strided_slice %13 {offsets = [0, 64], sizes = [8, 32], strides = [1, 1]} : vector<8x128xf32> to vector<8x32xf32>
    %27 = math.tanh %26 : vector<8x32xf32>
    %28 = vector.extract_strided_slice %13 {offsets = [0, 96], sizes = [8, 32], strides = [1, 1]} : vector<8x128xf32> to vector<8x32xf32>
    %29 = arith.negf %28 : vector<8x32xf32>
    %30 = math.exp %29 : vector<8x32xf32>
    %cst_18 = arith.constant 1.000000e+00 : f32
    %31 = vector.broadcast %cst_18 : f32 to vector<8x32xf32>
    %32 = arith.addf %31, %30 : vector<8x32xf32>
    %33 = arith.divf %31, %32 : vector<8x32xf32>
    %34 = arith.mulf %25, %9 : vector<8x32xf32>
    %35 = arith.mulf %19, %27 : vector<8x32xf32>
    %36 = arith.addf %34, %35 : vector<8x32xf32>
    %37 = math.tanh %36 : vector<8x32xf32>
    %38 = arith.mulf %33, %37 : vector<8x32xf32>
    %c8 = arith.constant 8 : index
    %c0_19 = arith.constant 0 : index
    %39 = vector.load %arg17[%c8, %c0_19] : memref<64x128xf32, #tpu.memory_space<vmem>>, vector<8x128xf32>
    %40 = arith.truncf %38 : vector<8x32xf32> to vector<8x32xbf16>
    %cst_20 = arith.constant dense<0.000000e+00> : vector<8x128xf32>
    %41 = tpu.matmul %40, %7, %cst_20 {dimension_numbers = #tpu.dot_dimension_numbers<[1], [0], [0], [1], [0, 0, 1, 1], [], []>} : vector<8x32xbf16>, vector<32x128xbf16>, vector<8x128xf32> -> vector<8x128xf32>
    %42 = arith.addf %39, %41 : vector<8x128xf32>
    %43 = vector.extract_strided_slice %42 {offsets = [0, 0], sizes = [8, 32], strides = [1, 1]} : vector<8x128xf32> to vector<8x32xf32>
    %44 = arith.negf %43 : vector<8x32xf32>
    %45 = math.exp %44 : vector<8x32xf32>
    %cst_21 = arith.constant 1.000000e+00 : f32
    %46 = vector.broadcast %cst_21 : f32 to vector<8x32xf32>
    %47 = arith.addf %46, %45 : vector<8x32xf32>
    %48 = arith.divf %46, %47 : vector<8x32xf32>
    %49 = vector.extract_strided_slice %42 {offsets = [0, 32], sizes = [8, 32], strides = [1, 1]} : vector<8x128xf32> to vector<8x32xf32>
    %50 = arith.negf %49 : vector<8x32xf32>
    %51 = math.exp %50 : vector<8x32xf32>
    %cst_22 = arith.constant 1.000000e+00 : f32
    %52 = vector.broadcast %cst_22 : f32 to vector<8x32xf32>
    %53 = arith.addf %52, %51 : vector<8x32xf32>
    %54 = arith.divf %52, %53 : vector<8x32xf32>
    %55 = vector.extract_strided_slice %42 {offsets = [0, 64], sizes = [8, 32], strides = [1, 1]} : vector<8x128xf32> to vector<8x32xf32>
    %56 = math.tanh %55 : vector<8x32xf32>
    %57 = vector.extract_strided_slice %42 {offsets = [0, 96], sizes = [8, 32], strides = [1, 1]} : vector<8x128xf32> to vector<8x32xf32>
    %58 = arith.negf %57 : vector<8x32xf32>
    %59 = math.exp %58 : vector<8x32xf32>
    %cst_23 = arith.constant 1.000000e+00 : f32
    %60 = vector.broadcast %cst_23 : f32 to vector<8x32xf32>
    %61 = arith.addf %60, %59 : vector<8x32xf32>
    %62 = arith.divf %60, %61 : vector<8x32xf32>
    %63 = arith.mulf %54, %36 : vector<8x32xf32>
    %64 = arith.mulf %48, %56 : vector<8x32xf32>
    %65 = arith.addf %63, %64 : vector<8x32xf32>
    %66 = math.tanh %65 : vector<8x32xf32>
    %67 = arith.mulf %62, %66 : vector<8x32xf32>
    %c16 = arith.constant 16 : index
    %c0_24 = arith.constant 0 : index
    %68 = vector.load %arg17[%c16, %c0_24] : memref<64x128xf32, #tpu.memory_space<vmem>>, vector<8x128xf32>
    %69 = arith.truncf %67 : vector<8x32xf32> to vector<8x32xbf16>
    %cst_25 = arith.constant dense<0.000000e+00> : vector<8x128xf32>
    %70 = tpu.matmul %69, %7, %cst_25 {dimension_numbers = #tpu.dot_dimension_numbers<[1], [0], [0], [1], [0, 0, 1, 1], [], []>} : vector<8x32xbf16>, vector<32x128xbf16>, vector<8x128xf32> -> vector<8x128xf32>
    %71 = arith.addf %68, %70 : vector<8x128xf32>
    %72 = vector.extract_strided_slice %71 {offsets = [0, 0], sizes = [8, 32], strides = [1, 1]} : vector<8x128xf32> to vector<8x32xf32>
    %73 = arith.negf %72 : vector<8x32xf32>
    %74 = math.exp %73 : vector<8x32xf32>
    %cst_26 = arith.constant 1.000000e+00 : f32
    %75 = vector.broadcast %cst_26 : f32 to vector<8x32xf32>
    %76 = arith.addf %75, %74 : vector<8x32xf32>
    %77 = arith.divf %75, %76 : vector<8x32xf32>
    %78 = vector.extract_strided_slice %71 {offsets = [0, 32], sizes = [8, 32], strides = [1, 1]} : vector<8x128xf32> to vector<8x32xf32>
    %79 = arith.negf %78 : vector<8x32xf32>
    %80 = math.exp %79 : vector<8x32xf32>
    %cst_27 = arith.constant 1.000000e+00 : f32
    %81 = vector.broadcast %cst_27 : f32 to vector<8x32xf32>
    %82 = arith.addf %81, %80 : vector<8x32xf32>
    %83 = arith.divf %81, %82 : vector<8x32xf32>
    %84 = vector.extract_strided_slice %71 {offsets = [0, 64], sizes = [8, 32], strides = [1, 1]} : vector<8x128xf32> to vector<8x32xf32>
    %85 = math.tanh %84 : vector<8x32xf32>
    %86 = vector.extract_strided_slice %71 {offsets = [0, 96], sizes = [8, 32], strides = [1, 1]} : vector<8x128xf32> to vector<8x32xf32>
    %87 = arith.negf %86 : vector<8x32xf32>
    %88 = math.exp %87 : vector<8x32xf32>
    %cst_28 = arith.constant 1.000000e+00 : f32
    %89 = vector.broadcast %cst_28 : f32 to vector<8x32xf32>
    %90 = arith.addf %89, %88 : vector<8x32xf32>
    %91 = arith.divf %89, %90 : vector<8x32xf32>
    %92 = arith.mulf %83, %65 : vector<8x32xf32>
    %93 = arith.mulf %77, %85 : vector<8x32xf32>
    %94 = arith.addf %92, %93 : vector<8x32xf32>
    %95 = math.tanh %94 : vector<8x32xf32>
    %96 = arith.mulf %91, %95 : vector<8x32xf32>
    %c24 = arith.constant 24 : index
    %c0_29 = arith.constant 0 : index
    %97 = vector.load %arg17[%c24, %c0_29] : memref<64x128xf32, #tpu.memory_space<vmem>>, vector<8x128xf32>
    %98 = arith.truncf %96 : vector<8x32xf32> to vector<8x32xbf16>
    %cst_30 = arith.constant dense<0.000000e+00> : vector<8x128xf32>
    %99 = tpu.matmul %98, %7, %cst_30 {dimension_numbers = #tpu.dot_dimension_numbers<[1], [0], [0], [1], [0, 0, 1, 1], [], []>} : vector<8x32xbf16>, vector<32x128xbf16>, vector<8x128xf32> -> vector<8x128xf32>
    %100 = arith.addf %97, %99 : vector<8x128xf32>
    %101 = vector.extract_strided_slice %100 {offsets = [0, 0], sizes = [8, 32], strides = [1, 1]} : vector<8x128xf32> to vector<8x32xf32>
    %102 = arith.negf %101 : vector<8x32xf32>
    %103 = math.exp %102 : vector<8x32xf32>
    %cst_31 = arith.constant 1.000000e+00 : f32
    %104 = vector.broadcast %cst_31 : f32 to vector<8x32xf32>
    %105 = arith.addf %104, %103 : vector<8x32xf32>
    %106 = arith.divf %104, %105 : vector<8x32xf32>
    %107 = vector.extract_strided_slice %100 {offsets = [0, 32], sizes = [8, 32], strides = [1, 1]} : vector<8x128xf32> to vector<8x32xf32>
    %108 = arith.negf %107 : vector<8x32xf32>
    %109 = math.exp %108 : vector<8x32xf32>
    %cst_32 = arith.constant 1.000000e+00 : f32
    %110 = vector.broadcast %cst_32 : f32 to vector<8x32xf32>
    %111 = arith.addf %110, %109 : vector<8x32xf32>
    %112 = arith.divf %110, %111 : vector<8x32xf32>
    %113 = vector.extract_strided_slice %100 {offsets = [0, 64], sizes = [8, 32], strides = [1, 1]} : vector<8x128xf32> to vector<8x32xf32>
    %114 = math.tanh %113 : vector<8x32xf32>
    %115 = vector.extract_strided_slice %100 {offsets = [0, 96], sizes = [8, 32], strides = [1, 1]} : vector<8x128xf32> to vector<8x32xf32>
    %116 = arith.negf %115 : vector<8x32xf32>
    %117 = math.exp %116 : vector<8x32xf32>
    %cst_33 = arith.constant 1.000000e+00 : f32
    %118 = vector.broadcast %cst_33 : f32 to vector<8x32xf32>
    %119 = arith.addf %118, %117 : vector<8x32xf32>
    %120 = arith.divf %118, %119 : vector<8x32xf32>
    %121 = arith.mulf %112, %94 : vector<8x32xf32>
    %122 = arith.mulf %106, %114 : vector<8x32xf32>
    %123 = arith.addf %121, %122 : vector<8x32xf32>
    %124 = math.tanh %123 : vector<8x32xf32>
    %125 = arith.mulf %120, %124 : vector<8x32xf32>
    %c32 = arith.constant 32 : index
    %c0_34 = arith.constant 0 : index
    %126 = vector.load %arg17[%c32, %c0_34] : memref<64x128xf32, #tpu.memory_space<vmem>>, vector<8x128xf32>
    %127 = arith.truncf %125 : vector<8x32xf32> to vector<8x32xbf16>
    %cst_35 = arith.constant dense<0.000000e+00> : vector<8x128xf32>
    %128 = tpu.matmul %127, %7, %cst_35 {dimension_numbers = #tpu.dot_dimension_numbers<[1], [0], [0], [1], [0, 0, 1, 1], [], []>} : vector<8x32xbf16>, vector<32x128xbf16>, vector<8x128xf32> -> vector<8x128xf32>
    %129 = arith.addf %126, %128 : vector<8x128xf32>
    %130 = vector.extract_strided_slice %129 {offsets = [0, 0], sizes = [8, 32], strides = [1, 1]} : vector<8x128xf32> to vector<8x32xf32>
    %131 = arith.negf %130 : vector<8x32xf32>
    %132 = math.exp %131 : vector<8x32xf32>
    %cst_36 = arith.constant 1.000000e+00 : f32
    %133 = vector.broadcast %cst_36 : f32 to vector<8x32xf32>
    %134 = arith.addf %133, %132 : vector<8x32xf32>
    %135 = arith.divf %133, %134 : vector<8x32xf32>
    %136 = vector.extract_strided_slice %129 {offsets = [0, 32], sizes = [8, 32], strides = [1, 1]} : vector<8x128xf32> to vector<8x32xf32>
    %137 = arith.negf %136 : vector<8x32xf32>
    %138 = math.exp %137 : vector<8x32xf32>
    %cst_37 = arith.constant 1.000000e+00 : f32
    %139 = vector.broadcast %cst_37 : f32 to vector<8x32xf32>
    %140 = arith.addf %139, %138 : vector<8x32xf32>
    %141 = arith.divf %139, %140 : vector<8x32xf32>
    %142 = vector.extract_strided_slice %129 {offsets = [0, 64], sizes = [8, 32], strides = [1, 1]} : vector<8x128xf32> to vector<8x32xf32>
    %143 = math.tanh %142 : vector<8x32xf32>
    %144 = vector.extract_strided_slice %129 {offsets = [0, 96], sizes = [8, 32], strides = [1, 1]} : vector<8x128xf32> to vector<8x32xf32>
    %145 = arith.negf %144 : vector<8x32xf32>
    %146 = math.exp %145 : vector<8x32xf32>
    %cst_38 = arith.constant 1.000000e+00 : f32
    %147 = vector.broadcast %cst_38 : f32 to vector<8x32xf32>
    %148 = arith.addf %147, %146 : vector<8x32xf32>
    %149 = arith.divf %147, %148 : vector<8x32xf32>
    %150 = arith.mulf %141, %123 : vector<8x32xf32>
    %151 = arith.mulf %135, %143 : vector<8x32xf32>
    %152 = arith.addf %150, %151 : vector<8x32xf32>
    %153 = math.tanh %152 : vector<8x32xf32>
    %154 = arith.mulf %149, %153 : vector<8x32xf32>
    %c40 = arith.constant 40 : index
    %c0_39 = arith.constant 0 : index
    %155 = vector.load %arg17[%c40, %c0_39] : memref<64x128xf32, #tpu.memory_space<vmem>>, vector<8x128xf32>
    %156 = arith.truncf %154 : vector<8x32xf32> to vector<8x32xbf16>
    %cst_40 = arith.constant dense<0.000000e+00> : vector<8x128xf32>
    %157 = tpu.matmul %156, %7, %cst_40 {dimension_numbers = #tpu.dot_dimension_numbers<[1], [0], [0], [1], [0, 0, 1, 1], [], []>} : vector<8x32xbf16>, vector<32x128xbf16>, vector<8x128xf32> -> vector<8x128xf32>
    %158 = arith.addf %155, %157 : vector<8x128xf32>
    %159 = vector.extract_strided_slice %158 {offsets = [0, 0], sizes = [8, 32], strides = [1, 1]} : vector<8x128xf32> to vector<8x32xf32>
    %160 = arith.negf %159 : vector<8x32xf32>
    %161 = math.exp %160 : vector<8x32xf32>
    %cst_41 = arith.constant 1.000000e+00 : f32
    %162 = vector.broadcast %cst_41 : f32 to vector<8x32xf32>
    %163 = arith.addf %162, %161 : vector<8x32xf32>
    %164 = arith.divf %162, %163 : vector<8x32xf32>
    %165 = vector.extract_strided_slice %158 {offsets = [0, 32], sizes = [8, 32], strides = [1, 1]} : vector<8x128xf32> to vector<8x32xf32>
    %166 = arith.negf %165 : vector<8x32xf32>
    %167 = math.exp %166 : vector<8x32xf32>
    %cst_42 = arith.constant 1.000000e+00 : f32
    %168 = vector.broadcast %cst_42 : f32 to vector<8x32xf32>
    %169 = arith.addf %168, %167 : vector<8x32xf32>
    %170 = arith.divf %168, %169 : vector<8x32xf32>
    %171 = vector.extract_strided_slice %158 {offsets = [0, 64], sizes = [8, 32], strides = [1, 1]} : vector<8x128xf32> to vector<8x32xf32>
    %172 = math.tanh %171 : vector<8x32xf32>
    %173 = vector.extract_strided_slice %158 {offsets = [0, 96], sizes = [8, 32], strides = [1, 1]} : vector<8x128xf32> to vector<8x32xf32>
    %174 = arith.negf %173 : vector<8x32xf32>
    %175 = math.exp %174 : vector<8x32xf32>
    %cst_43 = arith.constant 1.000000e+00 : f32
    %176 = vector.broadcast %cst_43 : f32 to vector<8x32xf32>
    %177 = arith.addf %176, %175 : vector<8x32xf32>
    %178 = arith.divf %176, %177 : vector<8x32xf32>
    %179 = arith.mulf %170, %152 : vector<8x32xf32>
    %180 = arith.mulf %164, %172 : vector<8x32xf32>
    %181 = arith.addf %179, %180 : vector<8x32xf32>
    %182 = math.tanh %181 : vector<8x32xf32>
    %183 = arith.mulf %178, %182 : vector<8x32xf32>
    %c48 = arith.constant 48 : index
    %c0_44 = arith.constant 0 : index
    %184 = vector.load %arg17[%c48, %c0_44] : memref<64x128xf32, #tpu.memory_space<vmem>>, vector<8x128xf32>
    %185 = arith.truncf %183 : vector<8x32xf32> to vector<8x32xbf16>
    %cst_45 = arith.constant dense<0.000000e+00> : vector<8x128xf32>
    %186 = tpu.matmul %185, %7, %cst_45 {dimension_numbers = #tpu.dot_dimension_numbers<[1], [0], [0], [1], [0, 0, 1, 1], [], []>} : vector<8x32xbf16>, vector<32x128xbf16>, vector<8x128xf32> -> vector<8x128xf32>
    %187 = arith.addf %184, %186 : vector<8x128xf32>
    %188 = vector.extract_strided_slice %187 {offsets = [0, 0], sizes = [8, 32], strides = [1, 1]} : vector<8x128xf32> to vector<8x32xf32>
    %189 = arith.negf %188 : vector<8x32xf32>
    %190 = math.exp %189 : vector<8x32xf32>
    %cst_46 = arith.constant 1.000000e+00 : f32
    %191 = vector.broadcast %cst_46 : f32 to vector<8x32xf32>
    %192 = arith.addf %191, %190 : vector<8x32xf32>
    %193 = arith.divf %191, %192 : vector<8x32xf32>
    %194 = vector.extract_strided_slice %187 {offsets = [0, 32], sizes = [8, 32], strides = [1, 1]} : vector<8x128xf32> to vector<8x32xf32>
    %195 = arith.negf %194 : vector<8x32xf32>
    %196 = math.exp %195 : vector<8x32xf32>
    %cst_47 = arith.constant 1.000000e+00 : f32
    %197 = vector.broadcast %cst_47 : f32 to vector<8x32xf32>
    %198 = arith.addf %197, %196 : vector<8x32xf32>
    %199 = arith.divf %197, %198 : vector<8x32xf32>
    %200 = vector.extract_strided_slice %187 {offsets = [0, 64], sizes = [8, 32], strides = [1, 1]} : vector<8x128xf32> to vector<8x32xf32>
    %201 = math.tanh %200 : vector<8x32xf32>
    %202 = vector.extract_strided_slice %187 {offsets = [0, 96], sizes = [8, 32], strides = [1, 1]} : vector<8x128xf32> to vector<8x32xf32>
    %203 = arith.negf %202 : vector<8x32xf32>
    %204 = math.exp %203 : vector<8x32xf32>
    %cst_48 = arith.constant 1.000000e+00 : f32
    %205 = vector.broadcast %cst_48 : f32 to vector<8x32xf32>
    %206 = arith.addf %205, %204 : vector<8x32xf32>
    %207 = arith.divf %205, %206 : vector<8x32xf32>
    %208 = arith.mulf %199, %181 : vector<8x32xf32>
    %209 = arith.mulf %193, %201 : vector<8x32xf32>
    %210 = arith.addf %208, %209 : vector<8x32xf32>
    %211 = math.tanh %210 : vector<8x32xf32>
    %212 = arith.mulf %207, %211 : vector<8x32xf32>
    %c56 = arith.constant 56 : index
    %c0_49 = arith.constant 0 : index
    %213 = vector.load %arg17[%c56, %c0_49] : memref<64x128xf32, #tpu.memory_space<vmem>>, vector<8x128xf32>
    %214 = arith.truncf %212 : vector<8x32xf32> to vector<8x32xbf16>
    %cst_50 = arith.constant dense<0.000000e+00> : vector<8x128xf32>
    %215 = tpu.matmul %214, %7, %cst_50 {dimension_numbers = #tpu.dot_dimension_numbers<[1], [0], [0], [1], [0, 0, 1, 1], [], []>} : vector<8x32xbf16>, vector<32x128xbf16>, vector<8x128xf32> -> vector<8x128xf32>
    %216 = arith.addf %213, %215 : vector<8x128xf32>
    %217 = vector.extract_strided_slice %216 {offsets = [0, 0], sizes = [8, 32], strides = [1, 1]} : vector<8x128xf32> to vector<8x32xf32>
    %218 = arith.negf %217 : vector<8x32xf32>
    %219 = math.exp %218 : vector<8x32xf32>
    %cst_51 = arith.constant 1.000000e+00 : f32
    %220 = vector.broadcast %cst_51 : f32 to vector<8x32xf32>
    %221 = arith.addf %220, %219 : vector<8x32xf32>
    %222 = arith.divf %220, %221 : vector<8x32xf32>
    %223 = vector.extract_strided_slice %216 {offsets = [0, 32], sizes = [8, 32], strides = [1, 1]} : vector<8x128xf32> to vector<8x32xf32>
    %224 = arith.negf %223 : vector<8x32xf32>
    %225 = math.exp %224 : vector<8x32xf32>
    %cst_52 = arith.constant 1.000000e+00 : f32
    %226 = vector.broadcast %cst_52 : f32 to vector<8x32xf32>
    %227 = arith.addf %226, %225 : vector<8x32xf32>
    %228 = arith.divf %226, %227 : vector<8x32xf32>
    %229 = vector.extract_strided_slice %216 {offsets = [0, 64], sizes = [8, 32], strides = [1, 1]} : vector<8x128xf32> to vector<8x32xf32>
    %230 = math.tanh %229 : vector<8x32xf32>
    %231 = vector.extract_strided_slice %216 {offsets = [0, 96], sizes = [8, 32], strides = [1, 1]} : vector<8x128xf32> to vector<8x32xf32>
    %232 = arith.negf %231 : vector<8x32xf32>
    %233 = math.exp %232 : vector<8x32xf32>
    %cst_53 = arith.constant 1.000000e+00 : f32
    %234 = vector.broadcast %cst_53 : f32 to vector<8x32xf32>
    %235 = arith.addf %234, %233 : vector<8x32xf32>
    %236 = arith.divf %234, %235 : vector<8x32xf32>
    %237 = arith.mulf %228, %210 : vector<8x32xf32>
    %238 = arith.mulf %222, %230 : vector<8x32xf32>
    %239 = arith.addf %237, %238 : vector<8x32xf32>
    %240 = math.tanh %239 : vector<8x32xf32>
    %241 = arith.mulf %236, %240 : vector<8x32xf32>
    %242 = tpu.concatenate %38, %67, %96, %125, %154, %183, %212, %241 in 0 : vector<8x32xf32>, vector<8x32xf32>, vector<8x32xf32>, vector<8x32xf32>, vector<8x32xf32>, vector<8x32xf32>, vector<8x32xf32>, vector<8x32xf32> -> vector<64x32xf32>
    %c0_54 = arith.constant 0 : index
    %c0_55 = arith.constant 0 : index
    %243 = vector.load %arg12[%c0_54, %c0_55] : memref<64x32xf32, #tpu.memory_space<vmem>>, vector<64x32xf32>
    tpu.vector_store %arg12[%c0_54, %c0_55], %242 {strides = array<i32>} : memref<64x32xf32, #tpu.memory_space<vmem>>, vector<64x32xf32>,
    %c0_56 = arith.constant 0 : index
    %c0_57 = arith.constant 0 : index
    %244 = vector.load %arg13[%c0_56, %c0_57] : memref<8x32xf32, #tpu.memory_space<vmem>>, vector<8x32xf32>
    tpu.vector_store %arg13[%c0_56, %c0_57], %241 {strides = array<i32>} : memref<8x32xf32, #tpu.memory_space<vmem>>, vector<8x32xf32>,
    %c0_58 = arith.constant 0 : index
    %c0_59 = arith.constant 0 : index
    %245 = vector.load %arg14[%c0_58, %c0_59] : memref<8x32xf32, #tpu.memory_space<vmem>>, vector<8x32xf32>
    tpu.vector_store %arg14[%c0_58, %c0_59], %239 {strides = array<i32>} : memref<8x32xf32, #tpu.memory_space<vmem>>, vector<8x32xf32>,
    %c0_60 = arith.constant 0 : index
    %c0_61 = arith.constant 0 : index
    %246 = vector.load %arg6[%c0_60, %c0_61] : memref<64x128xbf16, #tpu.memory_space<vmem>>, vector<64x128xbf16>
    %c0_62 = arith.constant 0 : index
    %c0_63 = arith.constant 0 : index
    %247 = vector.load %arg9[%c0_62, %c0_63] : memref<128x128xbf16, #tpu.memory_space<vmem>>, vector<128x128xbf16>
    %cst_64 = arith.constant dense<0.000000e+00> : vector<64x128xf32>
    %248 = tpu.matmul %246, %247, %cst_64 {dimension_numbers = #tpu.dot_dimension_numbers<[1], [0], [0], [1], [0, 0, 1, 1], [], []>} : vector<64x128xbf16>, vector<128x128xbf16>, vector<64x128xf32> -> vector<64x128xf32>
    %249 = vector.shape_cast %248 : vector<64x128xf32> to vector<8x8x128xf32>
    %c0_65 = arith.constant 0 : index
    %c0_66 = arith.constant 0 : index
    %250 = vector.load %arg6[%c0_65, %c0_66] : memref<64x128xbf16, #tpu.memory_space<vmem>>, vector<64x128xbf16>
    %251 = vector.shape_cast %250 : vector<64x128xbf16> to vector<8x8x128xbf16>
    %252 = arith.truncf %242 : vector<64x32xf32> to vector<64x32xbf16>
    %c0_67 = arith.constant 0 : index
    %c0_68 = arith.constant 0 : index
    %253 = vector.load %arg8[%c0_67, %c0_68] : memref<32x128xbf16, #tpu.memory_space<vmem>>, vector<32x128xbf16>
    %cst_69 = arith.constant dense<0.000000e+00> : vector<64x128xf32>
    %254 = tpu.matmul %252, %253, %cst_69 {dimension_numbers = #tpu.dot_dimension_numbers<[1], [0], [0], [1], [0, 0, 1, 1], [], []>} : vector<64x32xbf16>, vector<32x128xbf16>, vector<64x128xf32> -> vector<64x128xf32>
    %255 = vector.shape_cast %249 : vector<8x8x128xf32> to vector<1x8x8x128xf32>
    %256 = vector.shape_cast %255 : vector<1x8x8x128xf32> to vector<1x8x8x128xf32>
    %257 = vector.broadcast %256 : vector<1x8x8x128xf32> to vector<8x8x8x128xf32>
    %258 = vector.shape_cast %257 : vector<8x8x8x128xf32> to vector<64x8x128xf32>
    %259 = vector.shape_cast %251 : vector<8x8x128xbf16> to vector<1x8x8x128xbf16>
    %260 = vector.shape_cast %259 : vector<1x8x8x128xbf16> to vector<1x8x8x128xbf16>
    %261 = vector.broadcast %260 : vector<1x8x8x128xbf16> to vector<8x8x8x128xbf16>
    %262 = vector.shape_cast %261 : vector<8x8x8x128xbf16> to vector<64x8x128xbf16>
    %263 = arith.extf %262 : vector<64x8x128xbf16> to vector<64x8x128xf32>
    %264 = vector.shape_cast %254 : vector<64x128xf32> to vector<64x1x128xf32>
    %265 = vector.broadcast %264 : vector<64x1x128xf32> to vector<64x8x128xf32>
    %266 = arith.addf %265, %258 : vector<64x8x128xf32>
    %c0_70 = arith.constant 0 : index
    %c0_71 = arith.constant 0 : index
    %267 = vector.load %arg10[%c0_70, %c0_71] : memref<1x128xf32, #tpu.memory_space<vmem>>, vector<1x128xf32>
    %268 = vector.shape_cast %267 : vector<1x128xf32> to vector<1x1x128xf32>
    %269 = vector.broadcast %268 : vector<1x1x128xf32> to vector<64x8x128xf32>
    %270 = arith.addf %266, %269 : vector<64x8x128xf32>
    %271 = math.tanh %270 : vector<64x8x128xf32>
    %c0_72 = arith.constant 0 : index
    %c0_73 = arith.constant 0 : index
    %272 = vector.load %arg11[%c0_72, %c0_73] : memref<1x128xf32, #tpu.memory_space<vmem>>, vector<1x128xf32>
    %273 = vector.shape_cast %272 : vector<1x128xf32> to vector<1x1x128xf32>
    %274 = vector.broadcast %273 : vector<1x1x128xf32> to vector<64x8x128xf32>
    %275 = arith.mulf %271, %274 : vector<64x8x128xf32>
    %cst_74 = arith.constant dense<0.000000e+00> : vector<64x8xf32>
    %276 = vector.multi_reduction <add>, %275, %cst_74 [2] : vector<64x8x128xf32> to vector<64x8xf32>
    %277 = tpu.iota {dimensions = array<i32: 1>} : vector<64x8xi32>
    %278 = tpu.iota {dimensions = array<i32: 1>} : vector<8x8x8xi32>
    %279 = vector.shape_cast %278 : vector<8x8x8xi32> to vector<64x8xi32>
    %c0_i32 = arith.constant 0 : i32
    %280 = vector.broadcast %c0_i32 : i32 to vector<64x8xi32>
    %c0_i32_75 = arith.constant 0 : i32
    %281 = vector.broadcast %c0_i32_75 : i32 to vector<64x8xi32>
    %282 = arith.cmpi eq, %279, %281 : vector<64x8xi32>
    %c0_76 = arith.constant 0 : index
    %283 = memref.load %arg7[%c0_76] : memref<8xi32, #tpu.memory_space<smem>>
    %284 = vector.broadcast %283 : i32 to vector<64x8xi32>
    %285 = arith.select %282, %284, %280 : vector<64x8xi1>, vector<64x8xi32>
    %c1_i32 = arith.constant 1 : i32
    %286 = vector.broadcast %c1_i32 : i32 to vector<64x8xi32>
    %287 = arith.cmpi eq, %279, %286 : vector<64x8xi32>
    %c1 = arith.constant 1 : index
    %288 = memref.load %arg7[%c1] : memref<8xi32, #tpu.memory_space<smem>>
    %289 = vector.broadcast %288 : i32 to vector<64x8xi32>
    %290 = arith.select %287, %289, %285 : vector<64x8xi1>, vector<64x8xi32>
    %c2_i32 = arith.constant 2 : i32
    %291 = vector.broadcast %c2_i32 : i32 to vector<64x8xi32>
    %292 = arith.cmpi eq, %279, %291 : vector<64x8xi32>
    %c2 = arith.constant 2 : index
    %293 = memref.load %arg7[%c2] : memref<8xi32, #tpu.memory_space<smem>>
    %294 = vector.broadcast %293 : i32 to vector<64x8xi32>
    %295 = arith.select %292, %294, %290 : vector<64x8xi1>, vector<64x8xi32>
    %c3_i32 = arith.constant 3 : i32
    %296 = vector.broadcast %c3_i32 : i32 to vector<64x8xi32>
    %297 = arith.cmpi eq, %279, %296 : vector<64x8xi32>
    %c3 = arith.constant 3 : index
    %298 = memref.load %arg7[%c3] : memref<8xi32, #tpu.memory_space<smem>>
    %299 = vector.broadcast %298 : i32 to vector<64x8xi32>
    %300 = arith.select %297, %299, %295 : vector<64x8xi1>, vector<64x8xi32>
    %c4_i32 = arith.constant 4 : i32
    %301 = vector.broadcast %c4_i32 : i32 to vector<64x8xi32>
    %302 = arith.cmpi eq, %279, %301 : vector<64x8xi32>
    %c4 = arith.constant 4 : index
    %303 = memref.load %arg7[%c4] : memref<8xi32, #tpu.memory_space<smem>>
    %304 = vector.broadcast %303 : i32 to vector<64x8xi32>
    %305 = arith.select %302, %304, %300 : vector<64x8xi1>, vector<64x8xi32>
    %c5_i32 = arith.constant 5 : i32
    %306 = vector.broadcast %c5_i32 : i32 to vector<64x8xi32>
    %307 = arith.cmpi eq, %279, %306 : vector<64x8xi32>
    %c5 = arith.constant 5 : index
    %308 = memref.load %arg7[%c5] : memref<8xi32, #tpu.memory_space<smem>>
    %309 = vector.broadcast %308 : i32 to vector<64x8xi32>
    %310 = arith.select %307, %309, %305 : vector<64x8xi1>, vector<64x8xi32>
    %c6_i32 = arith.constant 6 : i32
    %311 = vector.broadcast %c6_i32 : i32 to vector<64x8xi32>
    %312 = arith.cmpi eq, %279, %311 : vector<64x8xi32>
    %c6 = arith.constant 6 : index
    %313 = memref.load %arg7[%c6] : memref<8xi32, #tpu.memory_space<smem>>
    %314 = vector.broadcast %313 : i32 to vector<64x8xi32>
    %315 = arith.select %312, %314, %310 : vector<64x8xi1>, vector<64x8xi32>
    %c7_i32 = arith.constant 7 : i32
    %316 = vector.broadcast %c7_i32 : i32 to vector<64x8xi32>
    %317 = arith.cmpi eq, %279, %316 : vector<64x8xi32>
    %c7 = arith.constant 7 : index
    %318 = memref.load %arg7[%c7] : memref<8xi32, #tpu.memory_space<smem>>
    %319 = vector.broadcast %318 : i32 to vector<64x8xi32>
    %320 = arith.select %317, %319, %315 : vector<64x8xi1>, vector<64x8xi32>
    %321 = arith.cmpi sge, %277, %320 : vector<64x8xi32>
    %cst_77 = arith.constant -6.550400e+04 : f32
    %322 = vector.broadcast %cst_77 : f32 to vector<64x8xf32>
    %323 = arith.select %321, %322, %276 : vector<64x8xi1>, vector<64x8xf32>
    %cst_78 = arith.constant dense<0xFF800000> : vector<64xf32>
    %324 = vector.multi_reduction <maximumf>, %323, %cst_78 [1] : vector<64x8xf32> to vector<64xf32>
    %325 = vector.shape_cast %324 : vector<64xf32> to vector<64x1xf32>
    %326 = vector.broadcast %325 : vector<64x1xf32> to vector<64x8xf32>
    %327 = arith.subf %323, %326 : vector<64x8xf32>
    %328 = math.exp %327 : vector<64x8xf32>
    %cst_79 = arith.constant dense<0.000000e+00> : vector<64xf32>
    %329 = vector.multi_reduction <add>, %328, %cst_79 [1] : vector<64x8xf32> to vector<64xf32>
    %330 = vector.shape_cast %329 : vector<64xf32> to vector<64x1xf32>
    %331 = vector.broadcast %330 : vector<64x1xf32> to vector<64x8xf32>
    %332 = arith.divf %328, %331 : vector<64x8xf32>
    %c0_80 = arith.constant 0 : index
    %c0_81 = arith.constant 0 : index
    %333 = vector.load %arg16[%c0_80, %c0_81] : memref<64x8xf32, #tpu.memory_space<vmem>>, vector<64x8xf32>
    tpu.vector_store %arg16[%c0_80, %c0_81], %332 {strides = array<i32>} : memref<64x8xf32, #tpu.memory_space<vmem>>, vector<64x8xf32>,
    %334 = vector.shape_cast %332 : vector<64x8xf32> to vector<64x8x1xf32>
    %335 = vector.broadcast %334 : vector<64x8x1xf32> to vector<64x8x128xf32>
    %336 = arith.mulf %335, %263 : vector<64x8x128xf32>
    %cst_82 = arith.constant dense<0.000000e+00> : vector<64x128xf32>
    %337 = vector.multi_reduction <add>, %336, %cst_82 [1] : vector<64x8x128xf32> to vector<64x128xf32>
    %c0_83 = arith.constant 0 : index
    %c0_84 = arith.constant 0 : index
    %338 = vector.load %arg15[%c0_83, %c0_84] : memref<64x128xf32, #tpu.memory_space<vmem>>, vector<64x128xf32>
    tpu.vector_store %arg15[%c0_83, %c0_84], %337 {strides = array<i32>} : memref<64x128xf32, #tpu.memory_space<vmem>>, vector<64x128xf32>,
    return
  }
}

</mosaic_0001>

<bundles_post_ra>
// kernel: tpu_custom_call.1
= control target key start
LH: loop header
LB: loop body
LE: loop exit
PB: predicated region body
PF: predicated region fallthrough
CT: control target
= control target key end

     0   :  { %s6259_s0 = inlined_call_operand.vmem [shape: bf16[64,32], index: 0, kind: input, shape index: {}]   ;;  %s6260_s1 = inlined_call_operand.hbm [shape: f32[8,32], index: 1, kind: input, shape index: {}]   ;;  %s6261_s2 = inlined_call_operand.hbm [shape: f32[8,32], index: 2, kind: input, shape index: {}]   ;;  %s6262_s3 = inlined_call_operand.hbm [shape: bf16[32,128], index: 3, kind: input, shape index: {}]   ;;  %s6263_s4 = inlined_call_operand.hbm [shape: bf16[32,128], index: 4, kind: input, shape index: {}]   ;;  %s6264_s5 = inlined_call_operand.hbm [shape: f32[1,128], index: 5, kind: input, shape index: {}]   ;;  %s6265_s6 = inlined_call_operand.hbm [shape: bf16[64,128], index: 6, kind: input, shape index: {}]   ;;  %s6266_s7 = inlined_call_operand.hbm [shape: s32[8], index: 7, kind: input, shape index: {}]   ;;  %s6267_s8 = inlined_call_operand.hbm [shape: bf16[32,128], index: 8, kind: input, shape index: {}]   ;;  %s6268_s9 = inlined_call_operand.vmem [shape: bf16[128,128], index: 9, kind: input, shape index: {}]   ;;  %s6269_s10 = inlined_call_operand.vmem [shape: f32[1,128], index: 10, kind: input, shape index: {}]   ;;  %s6270_s11 = inlined_call_operand.vmem [shape: f32[1,128], index: 11, kind: input, shape index: {}]   ;;  %s6271_s12 = inlined_call_operand.vmem [shape: f32[64,32], index: 12, kind: output, shape index: {0}]   ;;  %s6272_s13 = inlined_call_operand.hbm [shape: f32[8,32], index: 13, kind: output, shape index: {1}]   ;;  %s6273_s14 = inlined_call_operand.hbm [shape: f32[8,32], index: 14, kind: output, shape index: {2}]   ;;  %s6274_s15 = inlined_call_operand.hbm [shape: f32[64,128], index: 15, kind: output, shape index: {3}]   ;;  %s6275_s16 = inlined_call_operand.vmem [shape: f32[64,8], index: 16, kind: output, shape index: {4}]  }
   0x1   :  { %6277 = sst [smem:[#allocation29_spill]] %s6259_s0 }
   0x2   :  { %22 = vsyncpa [#allocation4], 0 }
   0x3   :  { %23 = vsyncpa [#allocation8], 0 }
   0x4   :  { %24 = vsyncpa [#allocation11], 0 }
   0x5   :  { %25 = vsyncpa [#allocation14], 0 }
   0x6   :  { %26 = vsyncpa [#allocation6], 0 }
   0x7   :  { %27 = vsyncpa [#allocation5], 0 }
   0x8   :  { %28 = vsyncpa [#allocation19], 0  ;;  %s4668_s21 = smov [#allocation7]  }
   0x9   :  { %s47_s22 = sshll.u32 %s4668_s21, 4  ;;  %s48_s22 = int_to_ptr.vmem [resolvable:$true] %s47_s22 }
   0xa   :  { %s4452_s23 = scalar_lea.vmem %s48_s22, 128  ;;  %p4457_p1 = scmp.lt.s32.totalorder %s48_s22, %s48_s22 }
   0xb   :  { %p4453_p0 = scmp.ne.s32.totalorder %s48_s22, %s4452_s23  ;;  %p4458_p2 = scmp.lt.s32.totalorder %s4452_s23, %s4452_s23 }
   0xd   :  { %p4459_p3 = por %p4458_p2, %p4457_p1 }
   0xf   :  { %p4460_p4 = pnand %p4459_p3, %p4453_p0 }
  0x11   :  { %4463 = shalt.err (!%p4460_p4)
}
  0x12   :  { %50 = dma.hbm_to_vmem [thread:$0]  %s6261_s2, 128, %s48_s22, [#allocation8]  }
  0x13   :  { %s4669_s26 = smov [#allocation10]   ;;  %s4670_s28 = smov [#allocation13]  }
  0x14   :  { %s68_s27 = sshll.u32 %s4669_s26, 4  ;;  %s90_s29 = sshll.u32 %s4670_s28, 4  ;;  %s69_s27 = int_to_ptr.vmem [resolvable:$true] %s68_s27  ;;  %s91_s29 = int_to_ptr.vmem [resolvable:$true] %s90_s29 }
  0x15   :  { %s4472_s30 = scalar_lea.vmem %s69_s27, 256  ;;  %p4477_p6 = scmp.lt.s32.totalorder %s69_s27, %s69_s27 }
  0x16   :  { %p4473_p5 = scmp.ne.s32.totalorder %s69_s27, %s4472_s30  ;;  %p4478_p7 = scmp.lt.s32.totalorder %s4472_s30, %s4472_s30 }
  0x18   :  { %p4479_p8 = por %p4478_p7, %p4477_p6 }
  0x1a   :  { %p4480_p9 = pnand %p4479_p8, %p4473_p5 }
  0x1c   :  { %4483 = shalt.err (!%p4480_p9)
}
  0x1d   :  { %s4671_s0 = smov 64   ;;  %s4672_s17 = smov 4  }
  0x1e   :  { %74 = dma.hbm_to_vmem [thread:$0]  %s6263_s4, 256, %s69_s27, [#allocation11], %s4671_s0, %s4671_s0, %s4672_s17  }
  0x1f   :  { %s4492_s2 = scalar_lea.vmem %s91_s29, 512  ;;  %p4497_p11 = scmp.lt.s32.totalorder %s91_s29, %s91_s29 }
  0x20   :  { %p4493_p10 = scmp.ne.s32.totalorder %s91_s29, %s4492_s2  ;;  %p4498_p12 = scmp.lt.s32.totalorder %s4492_s2, %s4492_s2 }
  0x22   :  { %p4499_p13 = por %p4498_p12, %p4497_p11 }
  0x24   :  { %p4500_p0 = pnand %p4499_p13, %p4493_p10 }
  0x26   :  { %4503 = shalt.err (!%p4500_p0)
}
  0x27   :  { %96 = dma.hbm_to_vmem [thread:$0]  %s6265_s6, 512, %s91_s29, [#allocation14], %s4671_s0, %s4671_s0, %s4672_s17  }
  0x28   :  { %s4673_s22 = smov [#allocation3]   ;;  %s4674_s24 = smov [#allocation9]  }
  0x29   :  { %s37_s23 = sshll.u32 %s4673_s22, 4  ;;  %s56_s4 = sshll.u32 %s4674_s24, 4  ;;  %s38_s23 = int_to_ptr.vmem [resolvable:$true] %s37_s23  ;;  %s57_s4 = int_to_ptr.vmem [resolvable:$true] %s56_s4 }
  0x2a   :  { %s4512_s25 = scalar_lea.vmem %s38_s23, 128  ;;  %p4517_p2 = scmp.lt.s32.totalorder %s38_s23, %s38_s23 }
  0x2b   :  { %p4513_p1 = scmp.ne.s32.totalorder %s38_s23, %s4512_s25  ;;  %p4518_p3 = scmp.lt.s32.totalorder %s4512_s25, %s4512_s25 }
  0x2d   :  { %p4519_p4 = por %p4518_p3, %p4517_p2 }
  0x2f   :  { %p4520_p5 = pnand %p4519_p4, %p4513_p1 }
  0x31   :  { %4523 = shalt.err (!%p4520_p5)
}
  0x32   :  { %40 = dma.hbm_to_vmem [thread:$0]  %s6260_s1, 128, %s38_s23, [#allocation4]  }
  0x33   :  { %s4532_s28 = scalar_lea.vmem %s57_s4, 256  ;;  %p4537_p7 = scmp.lt.s32.totalorder %s57_s4, %s57_s4 }
  0x34   :  { %p4533_p6 = scmp.ne.s32.totalorder %s57_s4, %s4532_s28  ;;  %p4538_p8 = scmp.lt.s32.totalorder %s4532_s28, %s4532_s28 }
  0x36   :  { %p4539_p9 = por %p4538_p8, %p4537_p7 }
  0x38   :  { %p4540_p10 = pnand %p4539_p9, %p4533_p6 }
  0x3a   :  { %4543 = shalt.err (!%p4540_p10)
}
  0x3b   :  { %62 = dma.hbm_to_vmem [thread:$0]  %s6262_s3, 256, %s57_s4, [#allocation8], %s4671_s0, %s4671_s0, %s4672_s17  }
  0x3c   :  { %s4675_s30 = smov [#allocation12]  }
  0x3d   :  { %s81_s18 = sshll.u32 %s4675_s30, 4  ;;  %s82_s18 = int_to_ptr.vmem [resolvable:$true] %s81_s18 }
  0x3e   :  { %s4552_s19 = scalar_lea.vmem %s82_s18, 16  ;;  %s4556_s1 = scalar_lea.vmem %s82_s18, 32 }
  0x3f   :  { %p4553_p11 = scmp.ne.s32.totalorder %s82_s18, %s4552_s19  ;;  %p4557_p12 = scmp.lt.s32.totalorder %s82_s18, %s82_s18 }
  0x40   :  { %p4558_p13 = scmp.lt.s32.totalorder %s4556_s1, %s4552_s19 }
  0x42   :  { %p4559_p0 = por %p4558_p13, %p4557_p12 }
  0x44   :  { %p4560_p1 = pnand %p4559_p0, %p4553_p11 }
  0x46   :  { %4563 = shalt.err (!%p4560_p1)
}
  0x47   :  { %84 = dma.hbm_to_vmem [thread:$0]  %s6264_s5, 16, %s82_s18, [#allocation11]  }
  0x48   :  { %s4676_s21 = smov [#allocation15]   ;;  %s4677_s3 = smov [#allocation16]  }
  0x49   :  { %104 = dma.hbm_to_smem %s6266_s7, 16, %s4676_s21, [#allocation6]  }
  0x4a   :  { %s110_s24 = sshll.u32 %s4677_s3, 4  ;;  %s111_s24 = int_to_ptr.vmem [resolvable:$true] %s110_s24 }
  0x4b   :  { %s4580_s4 = scalar_lea.vmem %s111_s24, 256  ;;  %p4585_p3 = scmp.lt.s32.totalorder %s111_s24, %s111_s24 }
  0x4c   :  { %p4581_p2 = scmp.ne.s32.totalorder %s111_s24, %s4580_s4  ;;  %p4586_p4 = scmp.lt.s32.totalorder %s4580_s4, %s4580_s4 }
  0x4e   :  { %p4587_p5 = por %p4586_p4, %p4585_p3 }
  0x50   :  { %p4588_p6 = pnand %p4587_p5, %p4581_p2 }
  0x52   :  { %4591 = shalt.err (!%p4588_p6)
}
  0x53   :  { %116 = dma.hbm_to_vmem [thread:$0]  %s6267_s8, 256, %s111_s24, [#allocation14], %s4671_s0, %s4671_s0, %s4672_s17  }
  0x54   :  { %4652 = dma.done.wait [#allocation4], 128  }
  0x55   :  { %4653 = vsyncadd [#allocation4], 4294967168 }
  0x56   :  { %4654 = dma.done.wait [#allocation8], 384  }
  0x57   :  { %4655 = vsyncadd [#allocation8], 4294966912 }
  0x58   :  { %4656 = dma.done.wait [#allocation11], 272  }
  0x59   :  { %4657 = vsyncadd [#allocation11], 4294967024 }
  0x5a   :  { %4658 = dma.done.wait [#allocation14], 512  }
  0x5b   :  { %4659 = vsyncadd [#allocation14], 4294966784 }
  0x5c   :  { %4660 = dma.done.wait [#allocation6], 16  }
  0x5d   :  { %4661 = vsyncadd [#allocation6], 4294967280 }
  0x5e   :  { %4662 = dma.done.wait [#allocation14], 256  }
  0x5f   :  { %4663 = vsyncadd [#allocation14], 4294967040 }
  0x60   :  { %147 = sfence }
  0x61   :  { %v4188_v0 = vld [vmem:[#allocation9 + $0x8] sm:$0xff]   ;;  %vm200_vm0 = vcmask 261120   ;;  %v4189_v1 = vld [vmem:[#allocation9] sm:$0xff]   ;;  %s6278_s8 = sld [smem:[#allocation29_spill]]  ;;  %v4678_v3 = vmov 0.0   ;;  %vm4679_vm1 = vmmov 0  }
  0x62   :  { %4056 = vmatprep.subr.bf16.mxu1 %v4188_v0  ;;  %4084 = vmatprep.subr.bf16.mxu0 %v4678_v3  ;;  %v4816_v4 = vld [vmem:[#allocation10 + $0x8] sm:$0xff]   ;;  %v4827_v7 = vld [vmem:[#allocation10] sm:$0xff]   ;;  %v3952_v11 = vld [vmem:[#allocation12] ss:$0 sm:$0xff]  ;;  %s4680_s18 = smov 32   ;;  %s2336_s6 = sld [smem:[#allocation15]] }
  0x63   :  { %4057 = vmatpush3.bf16.msra.mxu1 %v4188_v0  ;;  %4088 = vmatprep.mubr.msk.bf16.mxu0 %vm4679_vm1, %v4678_v3  ;;  %v290_v9 = vld [vmem:[#allocation3] sm:$0xff]  ;;  %v291_v34 = vld [vmem:[#allocation7] sm:$0xff]  ;;  %s4001_s29 = sld [smem:[#allocation15 + $0x1]]  ;;  %vm2688_vm9 = vcmask 1041409   ;;  %vm2690_vm11 = vcmask 1042434   ;;  %vm2692_vm12 = vcmask 1043459  }
  0x64   :  { %4058 = vmatprep.subr.bf16.mxu1 %v4189_v1  ;;  %4085 = vmatpush3.bf16.msra.mxu0 %v4816_v4  ;;  %v293_v10 = vpack.c.bf16 %v290_v9, %v290_v9  ;;  %s4002_s30 = sld [smem:[#allocation15 + $0x2]]  ;;  %vm2694_vm13 = vcmask 1044484   ;;  %vm2696_vm14 = vcmask 1045509   ;;  %vm2698_vm15 = vcmask 1046534   ;;  %s4682_s22 = smov 96  }
  0x65   :  { %4086 = vmatprep.subr.bf16.mxu0 %v4678_v3  ;;  %s4003_s19 = sld [smem:[#allocation15 + $0x3]] }
  0x66   :  { %s4004_s1 = sld [smem:[#allocation15 + $0x4]] }
  0x67   :  { %v4190_v2 = vld [vmem:[%s6278_s8] sm:$0xff]   ;;  %v4191_v5 = vld [vmem:[%s6278_s8 + $0x8] sm:$0xff]   ;;  %4059 = vmatpush3.bf16.msra.mxu1 %v4189_v1  ;;  %v4193_v6 = vld [vmem:[%s6278_s8 + $0x10] sm:$0xff]   ;;  %s4005_s2 = sld [smem:[#allocation15 + $0x5]] }
  0x68   :  { %4060 = vmatprep.mubr.msk.bf16.mxu1 %vm200_vm0, %v4190_v2  ;;  %4068 = vmatprep.subr.bf16.mxu1 %v4678_v3  ;;  %v4194_v8 = vld [vmem:[%s6278_s8 + $0x18] sm:$0xff]   ;;  %s4006_s20 = sld [smem:[#allocation15 + $0x6]] }
  0x69   :  { %4087 = vmatpush3.bf16.msra.mxu0 %v4827_v7  ;;  %s4007_s21 = sld [smem:[#allocation15 + $0x7]] }
  0x6a   :  { %4061 = vmatmul.mubr.msk.bf16.vlgmr.msra.gmra.mxu1 %vm200_vm0, %v4191_v5  ;;  %4100 = vmatprep.subr.bf16.mxu0 %v4678_v3 }
  0x6b   :  { %4069 = vmatpush3.bf16.msra.mxu1 %v4816_v4  ;;  %4064 = vmatprep.mubr.msk.bf16.mxu1 %vm200_vm0, %v4193_v6 }
  0x6c   :  { %4070 = vmatprep.subr.bf16.mxu1 %v4678_v3 }
  0x6f   :  { %4071 = vmatpush3.bf16.msra.mxu1 %v4827_v7 }
  0x70   :  { %4076 = vmatprep.subr.bf16.mxu1 %v4678_v3 }
  0x72   :  { %4065 = vmatmul.mubr.msk.bf16.gmra.mxu1 %vm200_vm0, %v4194_v8 }
  0x73   :  { %4072 = vmatprep.mubr.msk.bf16.mxu1 %vm4679_vm1, %v4678_v3 }
  0x7a   :  { %4073 = vmatmul.mubr.msk.bf16.vlgmr.msra.gmra.mxu1 %vm200_vm0, %v293_v10 }
  0x7b   :  { %4077 = vmatpush3.bf16.msra.mxu1 %v4816_v4  ;;  %4080 = vmatprep.mubr.msk.bf16.mxu1 %vm4679_vm1, %v4678_v3 }
  0x7c   :  { %4078 = vmatprep.subr.bf16.mxu1 %v4678_v3 }
  0x7f   :  { %4079 = vmatpush3.bf16.msra.mxu1 %v4827_v7 }
  0x80   :  { %4092 = vmatprep.subr.bf16.mxu1 %v4678_v3 }
 0x12a   :  { %v4062_v12 = vpop.f32.mrf.mxu1 }
 0x12b   :  { %v4850_v13 = vadd.f32 %v4062_v12, %v3952_v11 }
 0x12c   :  { %v247_v14 = vpop.f32.mrf.mxu1 }
 0x12d   :  { %v248_v26 = vadd.f32 %v3952_v11, %v247_v14 }
 0x12e   :  { %v4063_v15 = vpop.f32.mrf.mxu1 }
 0x12f   :  { %v4852_v16 = vadd.f32 %v4063_v15, %v3952_v11 }
 0x130   :  { %v250_v17 = vpop.f32.mrf.mxu1 }
 0x131   :  { %v251_v18 = vadd.f32 %v3952_v11, %v250_v17 }
 0x132   :  { %v4066_v19 = vpop.f32.mrf.mxu1 }
 0x133   :  { %v4854_v20 = vadd.f32 %v4066_v19, %v3952_v11 }
 0x134   :  { %v263_v21 = vpop.f32.mrf.mxu1 }
 0x135   :  { %v4856_v22 = vadd.f32 %v3952_v11, %v263_v21 }
 0x136   :  { %v4067_v23 = vpop.f32.mrf.mxu1 }
 0x137   :  { %v4858_v24 = vadd.f32 %v4067_v23, %v3952_v11 }
 0x138   :  { %v266_v25 = vpop.f32.mrf.mxu1 }
 0x139   :  { %v4860_v27 = vadd.f32 %v3952_v11, %v266_v25 }
 0x13a   :  { %v343_v28 = vpop.f32.mrf.mxu1 }
 0x13b   :  { %v349_v29 = vadd.f32 %v343_v28, %v248_v26 }
 0x13c   :  { %v4074_v30 = vpop.f32.mrf.mxu1 }
 0x13d   :  { %4214 = vtanh.f32 %v349_v29  ;;  %v3966_v35 = vmul.f32 -1.442695, %v349_v29 }
 0x13e   :  { %v346_v31 = vpop.f32.mrf.mxu1 }
 0x13f   :  { %4216 = vpow2.f32 %v3966_v35 }
 0x140   :  { %v4075_v32 = vpop.f32.mrf.mxu1 }
 0x14a   :  { %v4215_v33 = vpop.eup %4214 }
 0x14b   :  { %363 = vrot.lane.b32.xlu0 %v4215_v33, %s4671_s0 }
 0x14c   :  { %v4217_v36 = vpop.eup %4216 }
 0x14d   :  { %v353_v37 = vadd.f32 1.0, %v4217_v36 }
 0x14f   :  { %358 = vrot.lane.b32.xlu0 %v291_v34, %s4680_s18  ;;  %4218 = vrcp.f32 %v353_v37 }
 0x15c   :  { %v4219_v38 = vpop.eup %4218 }
 0x1bd   :  { %v364_v39 = vpop.permute.xlu0 %363 }
 0x1be   :  { %v366_v40 = vmul.f32 %v4219_v38, %v364_v39 }
 0x1c0   :  { %368 = vrot.lane.b32.xlu1 %v366_v40, %s4680_s18 }
 0x1c1   :  { %v359_v41 = vpop.permute.xlu0 %358 }
 0x1c2   :  { %v361_v42 = vmul.f32 %v4219_v38, %v359_v41 }
 0x232   :  { %v369_v43 = vpop.permute.xlu1 %368 }
 0x233   :  { %v371_v44 = vadd.f32 %v369_v43, %v361_v42 }
 0x235   :  { %4220 = vtanh.f32 %v371_v44 }
 0x242   :  { %v4221_v45 = vpop.eup %4220 }
 0x243   :  { %374 = vrot.lane.b32.xlu1 %v4221_v45, %s4671_s0 }
 0x2b5   :  { %v375_v46 = vpop.permute.xlu1 %374 }
 0x2b6   :  { %v4866_v47 = vmul.f32 %v4219_v38, %v375_v46 }
 0x2b8   :  { %v379_v48 = vpack.c.bf16 %v4866_v47, %v4866_v47 }
 0x2ba   :  { %381 = vrot.lane.b32.xlu0 %v379_v48, %s4680_s18 }
 0x32c   :  { %v382_v49 = vpop.permute.xlu0 %381 }
 0x32d   :  { %4081 = vmatmul.mubr.msk.bf16.vlgmr.msra.gmra.mxu1 %vm200_vm0, %v382_v49 }
 0x32e   :  { %4093 = vmatpush3.bf16.msra.mxu1 %v4816_v4  ;;  %4096 = vmatprep.mubr.msk.bf16.mxu1 %vm4679_vm1, %v4678_v3 }
 0x32f   :  { %4094 = vmatprep.subr.bf16.mxu1 %v4678_v3 }
 0x332   :  { %4095 = vmatpush3.bf16.msra.mxu1 %v4827_v7 }
 0x333   :  { %4108 = vmatprep.subr.bf16.mxu1 %v4678_v3 }
 0x3ed   :  { %v420_v50 = vpop.f32.mrf.mxu1 }
 0x3ee   :  { %v426_v51 = vadd.f32 %v420_v50, %v251_v18 }
 0x3ef   :  { %v4082_v52 = vpop.f32.mrf.mxu1 }
 0x3f0   :  { %4222 = vtanh.f32 %v426_v51  ;;  %v3968_v56 = vmul.f32 -1.442695, %v426_v51 }
 0x3f1   :  { %v423_v53 = vpop.f32.mrf.mxu1 }
 0x3f2   :  { %4224 = vpow2.f32 %v3968_v56 }
 0x3f3   :  { %v4083_v54 = vpop.f32.mrf.mxu1 }
 0x3fd   :  { %v4223_v55 = vpop.eup %4222 }
 0x3fe   :  { %436 = vrot.lane.b32.xlu1 %v4223_v55, %s4671_s0 }
 0x3ff   :  { %v4225_v57 = vpop.eup %4224 }
 0x400   :  { %v430_v58 = vadd.f32 1.0, %v4225_v57 }
 0x402   :  { %4226 = vrcp.f32 %v430_v58 }
 0x40f   :  { %v4227_v59 = vpop.eup %4226 }
 0x410   :  { %v434_v62 = vmul.f32 %v4227_v59, %v371_v44 }
 0x470   :  { %v437_v60 = vpop.permute.xlu1 %436 }
 0x471   :  { %v439_v61 = vmul.f32 %v4227_v59, %v437_v60 }
 0x473   :  { %441 = vrot.lane.b32.xlu0 %v439_v61, %s4680_s18 }
 0x4e5   :  { %v442_v63 = vpop.permute.xlu0 %441 }
 0x4e6   :  { %v444_v0 = vadd.f32 %v442_v63, %v434_v62 }
 0x4e8   :  { %4228 = vtanh.f32 %v444_v0 }
 0x4f5   :  { %v4229_v1 = vpop.eup %4228 }
 0x4f6   :  { %447 = vrot.lane.b32.xlu1 %v4229_v1, %s4671_s0 }
 0x568   :  { %v448_v2 = vpop.permute.xlu1 %447 }
 0x569   :  { %v4881_v5 = vmul.f32 %v4227_v59, %v448_v2 }
 0x56b   :  { %v452_v6 = vpack.c.bf16 %v4881_v5, %v4881_v5 }
 0x56d   :  { %454 = vrot.lane.b32.xlu0 %v452_v6, %s4680_s18 }
 0x5df   :  { %v455_v8 = vpop.permute.xlu0 %454 }
 0x5e0   :  { %4089 = vmatmul.mubr.msk.bf16.vlgmr.msra.gmra.mxu0 %vm200_vm0, %v455_v8 }
 0x5e1   :  { %4101 = vmatpush3.bf16.msra.mxu0 %v4816_v4  ;;  %4104 = vmatprep.mubr.msk.bf16.mxu0 %vm4679_vm1, %v4678_v3 }
 0x5e2   :  { %4102 = vmatprep.subr.bf16.mxu0 %v4678_v3 }
 0x5e5   :  { %4103 = vmatpush3.bf16.msra.mxu0 %v4827_v7 }
 0x5e6   :  { %4116 = vmatprep.subr.bf16.mxu0 %v4678_v3 }
 0x6a0   :  { %v493_v9 = vpop.f32.mrf.mxu0 }
 0x6a1   :  { %v499_v10 = vadd.f32 %v493_v9, %v4850_v13 }
 0x6a2   :  { %v4090_v11 = vpop.f32.mrf.mxu0 }
 0x6a3   :  { %4230 = vtanh.f32 %v499_v10  ;;  %v3970_v17 = vmul.f32 -1.442695, %v499_v10 }
 0x6a4   :  { %v496_v12 = vpop.f32.mrf.mxu0 }
 0x6a5   :  { %4232 = vpow2.f32 %v3970_v17 }
 0x6a6   :  { %v4091_v14 = vpop.f32.mrf.mxu0 }
 0x6b0   :  { %v4231_v15 = vpop.eup %4230 }
 0x6b1   :  { %509 = vrot.lane.b32.xlu1 %v4231_v15, %s4671_s0 }
 0x6b2   :  { %v4233_v18 = vpop.eup %4232 }
 0x6b3   :  { %v503_v19 = vadd.f32 1.0, %v4233_v18 }
 0x6b5   :  { %4234 = vrcp.f32 %v503_v19 }
 0x6c2   :  { %v4235_v21 = vpop.eup %4234 }
 0x6c3   :  { %v507_v26 = vmul.f32 %v4235_v21, %v444_v0 }
 0x723   :  { %v510_v23 = vpop.permute.xlu1 %509 }
 0x724   :  { %v512_v25 = vmul.f32 %v4235_v21, %v510_v23 }
 0x726   :  { %514 = vrot.lane.b32.xlu0 %v512_v25, %s4680_s18 }
 0x798   :  { %v515_v28 = vpop.permute.xlu0 %514 }
 0x799   :  { %v517_v13 = vadd.f32 %v515_v28, %v507_v26 }
 0x79b   :  { %4236 = vtanh.f32 %v517_v13 }
 0x7a8   :  { %v4237_v29 = vpop.eup %4236 }
 0x7a9   :  { %520 = vrot.lane.b32.xlu1 %v4237_v29, %s4671_s0 }
 0x81b   :  { %v521_v30 = vpop.permute.xlu1 %520 }
 0x81c   :  { %v4897_v31 = vmul.f32 %v4235_v21, %v521_v30 }
 0x81e   :  { %v525_v32 = vpack.c.bf16 %v4897_v31, %v4897_v31 }
 0x820   :  { %527 = vrot.lane.b32.xlu0 %v525_v32, %s4680_s18 }
 0x892   :  { %v528_v33 = vpop.permute.xlu0 %527 }
 0x893   :  { %4097 = vmatmul.mubr.msk.bf16.vlgmr.msra.gmra.mxu1 %vm200_vm0, %v528_v33 }
 0x894   :  { %4109 = vmatpush3.bf16.msra.mxu1 %v4816_v4  ;;  %4112 = vmatprep.mubr.msk.bf16.mxu1 %vm4679_vm1, %v4678_v3 }
 0x895   :  { %4110 = vmatprep.subr.bf16.mxu1 %v4678_v3 }
 0x898   :  { %4111 = vmatpush3.bf16.msra.mxu1 %v4827_v7 }
 0x899   :  { %4124 = vmatprep.subr.bf16.mxu1 %v4678_v3 }
 0x953   :  { %v566_v34 = vpop.f32.mrf.mxu1 }
 0x954   :  { %v572_v35 = vadd.f32 %v566_v34, %v4852_v16 }
 0x955   :  { %v4098_v36 = vpop.f32.mrf.mxu1 }
 0x956   :  { %4238 = vtanh.f32 %v572_v35  ;;  %v3972_v40 = vmul.f32 -1.442695, %v572_v35 }
 0x957   :  { %v569_v37 = vpop.f32.mrf.mxu1 }
 0x958   :  { %4240 = vpow2.f32 %v3972_v40 }
 0x959   :  { %v4099_v38 = vpop.f32.mrf.mxu1 }
 0x963   :  { %v4239_v39 = vpop.eup %4238 }
 0x964   :  { %582 = vrot.lane.b32.xlu1 %v4239_v39, %s4671_s0 }
 0x965   :  { %v4241_v41 = vpop.eup %4240 }
 0x966   :  { %v576_v42 = vadd.f32 1.0, %v4241_v41 }
 0x968   :  { %4242 = vrcp.f32 %v576_v42 }
 0x975   :  { %v4243_v43 = vpop.eup %4242 }
 0x976   :  { %v580_v46 = vmul.f32 %v4243_v43, %v517_v13 }
 0x9d6   :  { %v583_v44 = vpop.permute.xlu1 %582 }
 0x9d7   :  { %v585_v45 = vmul.f32 %v4243_v43, %v583_v44 }
 0x9d9   :  { %587 = vrot.lane.b32.xlu0 %v585_v45, %s4680_s18 }
 0xa4b   :  { %v588_v48 = vpop.permute.xlu0 %587 }
 0xa4c   :  { %v590_v16 = vadd.f32 %v588_v48, %v580_v46 }
 0xa4e   :  { %4244 = vtanh.f32 %v590_v16 }
 0xa5b   :  { %v4245_v49 = vpop.eup %4244 }
 0xa5c   :  { %593 = vrot.lane.b32.xlu1 %v4245_v49, %s4671_s0 }
 0xace   :  { %v594_v50 = vpop.permute.xlu1 %593 }
 0xacf   :  { %v4913_v51 = vmul.f32 %v4243_v43, %v594_v50 }
 0xad1   :  { %v598_v52 = vpack.c.bf16 %v4913_v51, %v4913_v51 }
 0xad3   :  { %600 = vrot.lane.b32.xlu0 %v598_v52, %s4680_s18 }
 0xb45   :  { %v601_v53 = vpop.permute.xlu0 %600 }
 0xb46   :  { %4105 = vmatmul.mubr.msk.bf16.vlgmr.msra.gmra.mxu0 %vm200_vm0, %v601_v53 }
 0xb47   :  { %4117 = vmatpush3.bf16.msra.mxu0 %v4816_v4  ;;  %4120 = vmatprep.mubr.msk.bf16.mxu0 %vm4679_vm1, %v4678_v3 }
 0xb48   :  { %4118 = vmatprep.subr.bf16.mxu0 %v4678_v3 }
 0xb4b   :  { %4119 = vmatpush3.bf16.msra.mxu0 %v4827_v7 }
 0xc06   :  { %v639_v54 = vpop.f32.mrf.mxu0 }
 0xc07   :  { %v645_v55 = vadd.f32 %v639_v54, %v4856_v22 }
 0xc08   :  { %v4106_v56 = vpop.f32.mrf.mxu0 }
 0xc09   :  { %4246 = vtanh.f32 %v645_v55  ;;  %v3974_v60 = vmul.f32 -1.442695, %v645_v55 }
 0xc0a   :  { %v642_v57 = vpop.f32.mrf.mxu0 }
 0xc0b   :  { %4248 = vpow2.f32 %v3974_v60 }
 0xc0c   :  { %v4107_v58 = vpop.f32.mrf.mxu0 }
 0xc16   :  { %v4247_v59 = vpop.eup %4246 }
 0xc17   :  { %655 = vrot.lane.b32.xlu1 %v4247_v59, %s4671_s0 }
 0xc18   :  { %v4249_v61 = vpop.eup %4248 }
 0xc19   :  { %v649_v62 = vadd.f32 1.0, %v4249_v61 }
 0xc1b   :  { %4250 = vrcp.f32 %v649_v62 }
 0xc28   :  { %v4251_v63 = vpop.eup %4250 }
 0xc29   :  { %v653_v2 = vmul.f32 %v4251_v63, %v590_v16 }
 0xc89   :  { %v656_v0 = vpop.permute.xlu1 %655 }
 0xc8a   :  { %v658_v1 = vmul.f32 %v4251_v63, %v656_v0 }
 0xc8c   :  { %660 = vrot.lane.b32.xlu0 %v658_v1, %s4680_s18 }
 0xcfe   :  { %v661_v6 = vpop.permute.xlu0 %660 }
 0xcff   :  { %v663_v22 = vadd.f32 %v661_v6, %v653_v2 }
 0xd01   :  { %4252 = vtanh.f32 %v663_v22 }
 0xd0e   :  { %v4253_v8 = vpop.eup %4252 }
 0xd0f   :  { %666 = vrot.lane.b32.xlu1 %v4253_v8, %s4671_s0  ;;  %v4197_v8 = vld [vmem:[%s6268_s9 + $0x30] sm:$0xff]  }
 0xd81   :  { %v667_v9 = vpop.permute.xlu1 %666 }
 0xd82   :  { %v4928_v10 = vmul.f32 %v4251_v63, %v667_v9  ;;  %v4204_v9 = vld [vmem:[#allocation16 + $0x8] sm:$0xff]  }
 0xd84   :  { %v671_v11 = vpack.c.bf16 %v4928_v10, %v4928_v10 }
 0xd86   :  { %673 = vrot.lane.b32.xlu0 %v671_v11, %s4680_s18  ;;  %v935_v11 = vld [vmem:[#allocation13] sm:$0xff]  }
 0xdf8   :  { %v674_v12 = vpop.permute.xlu0 %673 }
 0xdf9   :  { %4113 = vmatmul.mubr.msk.bf16.vlgmr.msra.gmra.mxu1 %vm200_vm0, %v674_v12  ;;  %v4198_v12 = vld [vmem:[%s6268_s9 + $0x28] sm:$0xff]  }
 0xdfa   :  { %4125 = vmatpush3.bf16.msra.mxu1 %v4816_v4  ;;  %4128 = vmatprep.mubr.msk.bf16.mxu1 %vm4679_vm1, %v4678_v3 }
 0xdfb   :  { %4126 = vmatprep.subr.bf16.mxu1 %v4678_v3 }
 0xdfe   :  { %4127 = vmatpush3.bf16.msra.mxu1 %v4827_v7 }
 0xdff   :  { %4156 = vmatprep.subr.bf16.mxu1 %v4204_v9 }
 0xeb9   :  { %v712_v14 = vpop.f32.mrf.mxu1 }
 0xeba   :  { %v718_v15 = vadd.f32 %v712_v14, %v4860_v27  ;;  %v4199_v14 = vld [vmem:[%s6268_s9 + $0x20] sm:$0xff]  }
 0xebb   :  { %v4114_v17 = vpop.f32.mrf.mxu1 }
 0xebc   :  { %4254 = vtanh.f32 %v718_v15  ;;  %v3976_v23 = vmul.f32 -1.442695, %v718_v15  ;;  %v4200_v15 = vld [vmem:[%s6268_s9 + $0x18] sm:$0xff]   ;;  %v4201_v17 = vld [vmem:[%s6268_s9 + $0x10] sm:$0xff]  }
 0xebd   :  { %v715_v18 = vpop.f32.mrf.mxu1 }
 0xebe   :  { %4256 = vpow2.f32 %v3976_v23  ;;  %v4202_v18 = vld [vmem:[%s6268_s9 + $0x8] sm:$0xff]  }
 0xebf   :  { %v4115_v19 = vpop.f32.mrf.mxu1 }
 0xec0   :  { %v4203_v19 = vld [vmem:[%s6268_s9] sm:$0xff]  }
 0xec9   :  { %v4255_v21 = vpop.eup %4254 }
 0xeca   :  { %728 = vrot.lane.b32.xlu1 %v4255_v21, %s4671_s0 }
 0xecb   :  { %v4257_v4 = vpop.eup %4256 }
 0xecc   :  { %v722_v25 = vadd.f32 1.0, %v4257_v4 }
 0xece   :  { %4258 = vrcp.f32 %v722_v25  ;;  %v937_v25 = vld [vmem:[#allocation13 + $0x8] sm:$0xff]  }
 0xedb   :  { %v4259_v26 = vpop.eup %4258 }
 0xedc   :  { %v726_v7 = vmul.f32 %v4259_v26, %v663_v22  ;;  %v4196_v22 = vld [vmem:[%s6268_s9 + $0x38] sm:$0xff]  }
 0xedd   :  { %4132 = vmatprep.subr.bf16.mxu0 %v4196_v22 }
 0xf3c   :  { %v729_v28 = vpop.permute.xlu1 %728 }
 0xf3d   :  { %v731_v3 = vmul.f32 %v4259_v26, %v729_v28 }
 0xf3f   :  { %733 = vrot.lane.b32.xlu0 %v731_v3, %s4680_s18  ;;  %v939_v3 = vld [vmem:[#allocation13 + $0x10] sm:$0xff]  }
 0xfb1   :  { %v734_v13 = vpop.permute.xlu0 %733 }
 0xfb2   :  { %v736_v27 = vadd.f32 %v734_v13, %v726_v7  ;;  %v941_v7 = vld [vmem:[#allocation13 + $0x18] sm:$0xff]  }
 0xfb4   :  { %4260 = vtanh.f32 %v736_v27 }
 0xfc1   :  { %v4261_v29 = vpop.eup %4260 }
 0xfc2   :  { %739 = vrot.lane.b32.xlu1 %v4261_v29, %s4671_s0 }
0x1034   :  { %v740_v30 = vpop.permute.xlu1 %739 }
0x1035   :  { %v4943_v32 = vmul.f32 %v4259_v26, %v740_v30  ;;  %v4207_v26 = vld [vmem:[#allocation16] sm:$0xff]  }
0x1037   :  { %v744_v33 = vpack.c.bf16 %v4943_v32, %v4943_v32  ;;  %v1098_v6 = vpack.c.bf16 %v4943_v32, %v4928_v10 }
0x1039   :  { %746 = vrot.lane.b32.xlu0 %v744_v33, %s4680_s18 }
0x10ab   :  { %v747_v34 = vpop.permute.xlu0 %746 }
0x10ac   :  { %4121 = vmatmul.mubr.msk.bf16.vlgmr.msra.gmra.mxu0 %vm200_vm0, %v747_v34 }
0x10ad   :  { %4133 = vmatpush3.bf16.msra.mxu0 %v4196_v22  ;;  %4148 = vmatprep.mubr.bf16.mxu0 %v935_v11 }
0x10ae   :  { %4134 = vmatprep.subr.bf16.mxu0 %v4197_v8 }
0x10b1   :  { %4135 = vmatpush3.bf16.msra.mxu0 %v4197_v8 }
0x10b2   :  { %4136 = vmatprep.subr.bf16.mxu0 %v4198_v12 }
0x10b5   :  { %4137 = vmatpush3.bf16.msra.mxu0 %v4198_v12 }
0x10b6   :  { %4138 = vmatprep.subr.bf16.mxu0 %v4199_v14 }
0x10b9   :  { %4139 = vmatpush3.bf16.msra.mxu0 %v4199_v14 }
0x10ba   :  { %4140 = vmatprep.subr.bf16.mxu0 %v4200_v15 }
0x10bd   :  { %4141 = vmatpush3.bf16.msra.mxu0 %v4200_v15 }
0x10be   :  { %4142 = vmatprep.subr.bf16.mxu0 %v4201_v17 }
0x10c1   :  { %4143 = vmatpush3.bf16.msra.mxu0 %v4201_v17 }
0x10c2   :  { %4144 = vmatprep.subr.bf16.mxu0 %v4202_v18 }
0x10c5   :  { %4145 = vmatpush3.bf16.msra.mxu0 %v4202_v18 }
0x10c6   :  { %4146 = vmatprep.subr.bf16.mxu0 %v4203_v19 }
0x10c9   :  { %4147 = vmatpush3.bf16.msra.mxu0 %v4203_v19 }
0x10cc   :  { %4149 = vmatmul.mubr.bf16.vlgmr.msra.gmra.mxu0 %v937_v25 }
0x10cd   :  { %4152 = vmatprep.mubr.bf16.mxu0 %v939_v3 }
0x10d4   :  { %4153 = vmatmul.mubr.bf16.gmra.mxu0 %v941_v7 }
0x116c   :  { %v785_v35 = vpop.f32.mrf.mxu0 }
0x116d   :  { %v791_v36 = vadd.f32 %v785_v35, %v4854_v20 }
0x116e   :  { %v4122_v37 = vpop.f32.mrf.mxu0 }
0x116f   :  { %4262 = vtanh.f32 %v791_v36  ;;  %v3978_v41 = vmul.f32 -1.442695, %v791_v36  ;;  %v4681_v37 = vmov 1966171168  }
0x1170   :  { %v788_v38 = vpop.f32.mrf.mxu0 }
0x1171   :  { %4264 = vpow2.f32 %v3978_v41  ;;  %v1223_v38 = vunpack.c.l.s4 %v4681_v37 }
0x1172   :  { %v4123_v39 = vpop.f32.mrf.mxu0 }
0x1173   :  { %v1225_v39 = vlaneseq }
0x1175   :  { %v5009_v41 = vshrl.u32 %v1225_v39, 7 }
0x1177   :  { %vm2335_vm2 = vcmp.eq.s32.totalorder %v5009_v41, 0  ;;  %vm2339_vm3 = vcmp.eq.s32.totalorder %v5009_v41, 1  ;;  %vm2343_vm4 = vcmp.eq.s32.totalorder %v5009_v41, 2  ;;  %vm2347_vm5 = vcmp.eq.s32.totalorder %v5009_v41, 3 }
0x1178   :  { %vm2351_vm6 = vcmp.eq.s32.totalorder %v5009_v41, 4  ;;  %vm2355_vm7 = vcmp.eq.s32.totalorder %v5009_v41, 5  ;;  %vm2359_vm8 = vcmp.eq.s32.totalorder %v5009_v41, 6  ;;  %vm2363_vm10 = vcmp.eq.s32.totalorder %v5009_v41, 7 }
0x117c   :  { %v4263_v40 = vpop.eup %4262 }
0x117d   :  { %801 = vrot.lane.b32.xlu1 %v4263_v40, %s4671_s0  ;;  %v1224_v40 = vunpack.c.0.s8 %v1223_v38 }
0x117e   :  { %v4265_v42 = vpop.eup %4264 }
0x117f   :  { %v795_v43 = vadd.f32 1.0, %v4265_v42 }
0x1181   :  { %4266 = vrcp.f32 %v795_v43  ;;  %v5012_v43 = vsub.s32 %v1224_v40, %v5009_v41 }
0x118e   :  { %v4267_v44 = vpop.eup %4266 }
0x118f   :  { %v799_v48 = vmul.f32 %v4267_v44, %v736_v27  ;;  %v1097_v27 = vpack.c.bf16 %v4913_v51, %v4897_v31 }
0x11ef   :  { %v802_v45 = vpop.permute.xlu1 %801 }
0x11f0   :  { %v804_v46 = vmul.f32 %v4267_v44, %v802_v45  ;;  %v5014_v45 = vpop.f32.mrf.mxu0 }
0x11f2   :  { %806 = vrot.lane.b32.xlu0 %v804_v46, %s4680_s18 }
0x1264   :  { %v807_v16 = vpop.permute.xlu0 %806 }
0x1265   :  { %v809_v20 = vadd.f32 %v807_v16, %v799_v48 }
0x1267   :  { %4268 = vtanh.f32 %v809_v20 }
0x1274   :  { %v4269_v49 = vpop.eup %4268 }
0x1275   :  { %812 = vrot.lane.b32.xlu1 %v4269_v49, %s4671_s0 }
0x12e7   :  { %v813_v50 = vpop.permute.xlu1 %812 }
0x12e8   :  { %v4953_v52 = vmul.f32 %v4267_v44, %v813_v50  ;;  %v5022_v50 = vsub.s32 0, %v5009_v41 }
0x12ea   :  { %v817_v53 = vpack.c.bf16 %v4953_v52, %v4953_v52 }
0x12ec   :  { %819 = vrot.lane.b32.xlu0 %v817_v53, %s4680_s18 }
0x135e   :  { %v820_v54 = vpop.permute.xlu0 %819 }
0x135f   :  { %4129 = vmatmul.mubr.msk.bf16.vlgmr.msra.gmra.mxu1 %vm200_vm0, %v820_v54 }
0x1360   :  { %4157 = vmatpush3.bf16.msra.mxu1 %v4204_v9 }
0x1361   :  { %4158 = vmatprep.subr.bf16.mxu1 %v4207_v26 }
0x1364   :  { %4159 = vmatpush3.bf16.msra.mxu1 %v4207_v26 }
0x141f   :  { %v858_v55 = vpop.f32.mrf.mxu1 }
0x1420   :  { %v864_v56 = vadd.f32 %v858_v55, %v4858_v24  ;;  %v1096_v24 = vpack.c.bf16 %v4881_v5, %v4866_v47 }
0x1421   :  { %v4130_v57 = vpop.f32.mrf.mxu1 }
0x1422   :  { %4270 = vtanh.f32 %v864_v56  ;;  %v3980_v61 = vmul.f32 -1.442695, %v864_v56 }
0x1423   :  { %v861_v58 = vpop.f32.mrf.mxu1 }
0x1424   :  { %4272 = vpow2.f32 %v3980_v61 }
0x1425   :  { %v4131_v59 = vpop.f32.mrf.mxu1 }
0x142f   :  { %v4271_v60 = vpop.eup %4270 }
0x1430   :  { %874 = vrot.lane.b32.xlu1 %v4271_v60, %s4671_s0 }
0x1431   :  { %v4273_v62 = vpop.eup %4272 }
0x1432   :  { %v868_v63 = vadd.f32 1.0, %v4273_v62 }
0x1434   :  { %4274 = vrcp.f32 %v868_v63 }
0x1441   :  { %v4275_v0 = vpop.eup %4274 }
0x1442   :  { %v872_v21 = vmul.f32 %v4275_v0, %v809_v20  ;;  %v5018_v20 = vpop.f32.mrf.mxu0 }
0x1444   :  { %v5026_v55 = vpop.f32.mrf.mxu0 }
0x1446   :  { %v5033_v60 = vpop.f32.mrf.mxu0 }
0x14a2   :  { %v875_v1 = vpop.permute.xlu1 %874 }
0x14a3   :  { %v877_v2 = vmul.f32 %v4275_v0, %v875_v1  ;;  %v5043_v1 = vld [vmem:[%s6269_s10] ss:$0 sm:$0xff] }
0x14a5   :  { %879 = vrot.lane.b32.xlu0 %v877_v2, %s4680_s18 }
0x14a9   :  { %1108 = vrot.lane.b32.xlu0 %v1096_v24, %s4680_s18 }
0x14ad   :  { %1112 = vrot.lane.b32.xlu0 %v1098_v6, %s4680_s18 }
0x1517   :  { %v880_v23 = vpop.permute.xlu0 %879 }
0x1518   :  { %v4992_v4 = vadd.f32 %v880_v23, %v872_v21 }
0x151a   :  { %4276 = vtanh.f32 %v4992_v4 }
0x151b   :  { %v1109_v28 = vpop.permute.xlu0 %1108 }
0x151c   :  { %4160 = vmatprep.mubr.msk.bf16.mxu1 %vm200_vm0, %v1109_v28 }
0x151f   :  { %v1113_v35 = vpop.permute.xlu0 %1112 }
0x1527   :  { %v4277_v13 = vpop.eup %4276 }
0x1528   :  { %885 = vrot.lane.b32.xlu1 %v4277_v13, %s4671_s0 }
0x152c   :  { %1110 = vrot.lane.b32.xlu1 %v1097_v27, %s4680_s18 }
0x159a   :  { %v886_v29 = vpop.permute.xlu1 %885 }
0x159b   :  { %v5000_v30 = vmul.f32 %v4275_v0, %v886_v29 }
0x159d   :  { %v1099_v33 = vpack.c.bf16 %v5000_v30, %v4953_v52 }
0x159e   :  { %v1111_v34 = vpop.permute.xlu1 %1110 }
0x159f   :  { %1114 = vrot.lane.b32.xlu1 %v1099_v33, %s4680_s18  ;;  %4161 = vmatmul.mubr.msk.bf16.vlgmr.msra.gmra.mxu1 %vm200_vm0, %v1111_v34 }
0x15a0   :  { %4164 = vmatprep.mubr.msk.bf16.mxu1 %vm200_vm0, %v1113_v35 }
0x1611   :  { %v1115_v36 = vpop.permute.xlu1 %1114 }
0x1612   :  { %4165 = vmatmul.mubr.msk.bf16.gmra.mxu1 %vm200_vm0, %v1115_v36 }
0x165f   :  { %v4162_v42 = vpop.f32.mrf.mxu1 }
0x1660   :  { %v1326_v48 = vrot.slane %v4162_v42, %v5012_v43  ;;  %v1319_v3 = vcombine.high %v4162_v42, %v4162_v42 }
0x1661   :  { %v1174_v44 = vpop.f32.mrf.mxu1 }
0x1662   :  { %v1228_v46 = vrot.slane %v1174_v44, %v5012_v43  ;;  %v1342_v49 = vrot.slane %v1326_v48, %v5012_v43  ;;  %v1334_v11 = vcombine.high %v1326_v48, %v1326_v48  ;;  %v1221_v23 = vcombine.high %v1174_v44, %v1174_v44 }
0x1663   :  { %v5028_v56 = vpop.f32.mrf.mxu1  ;;  %v1333_v38 = vrot.slane %v1319_v3, %v5012_v43 }
0x1664   :  { %v1236_v16 = vcombine.high %v1228_v46, %v1228_v46  ;;  %v1244_v53 = vrot.slane %v1228_v46, %v5012_v43  ;;  %v1680_v57 = vrot.slane %v1342_v49, %v5022_v50  ;;  %v1375_v24 = vrot.slane %v5028_v56, %v5012_v43 }
0x1665   :  { %v5037_v63 = vpop.f32.mrf.mxu1  ;;  %v1364_v12 = vcombine.high %v1342_v49, %v1342_v49  ;;  %v1356_v19 = vrot.slane %v1334_v11, %v5012_v43  ;;  %v1235_v35 = vrot.slane %v1221_v23, %v5012_v43  ;;  %v5097_v11 = vpop.f32.mrf.mxu0 }
0x1666   :  { %v1258_v54 = vrot.slane %v1236_v16, %v5012_v43  ;;  %v1616_v58 = vrot.slane %v1244_v53, %v5022_v50  ;;  %v1949_v0 = vadd.f32 %v1680_v57, %v5018_v20  ;;  %v1266_v2 = vcombine.high %v1244_v53, %v1244_v53 }
0x1667   :  { %v5050_v8 = vrot.slane %v1375_v24, %v5012_v43  ;;  %v1277_v9 = vrot.slane %v5037_v63, %v5012_v43  ;;  %v1688_v21 = vrot.slane %v1364_v12, %v5022_v50  ;;  %v1383_v27 = vcombine.high %v1375_v24, %v1375_v24  ;;  %v5102_v12 = vld [vmem:[%s6270_s11] ss:$0 sm:$0xff] }
0x1668   :  { %v1620_v59 = vrot.slane %v1258_v54, %v5022_v50  ;;  %v1933_v61 = vadd.f32 %v1616_v58, %v5018_v20  ;;  %v2020_v14 = vadd.f32 %v5043_v1, %v1949_v0  ;;  %v1624_v15 = vrot.slane %v1266_v2, %v5022_v50 }
0x1669   :  { %v1712_v17 = vrot.slane %v5050_v8, %v5022_v50  ;;  %v1285_v18 = vcombine.high %v1277_v9, %v1277_v9  ;;  %v1268_v26 = vcombine.high %v1258_v54, %v1258_v54  ;;  %v1293_v13 = vrot.slane %v1277_v9, %v5012_v43 }
0x166a   :  { %v1934_v62 = vadd.f32 %v1620_v59, %v5033_v60  ;;  %v2004_v6 = vadd.f32 %v5043_v1, %v1933_v61  ;;  %v1935_v28 = vadd.f32 %v5014_v45, %v1624_v15  ;;  %v1366_v33 = vcombine.high %v1356_v19, %v1356_v19 }
0x166b   :  { %v1957_v25 = vadd.f32 %v1712_v17, %v5018_v20  ;;  %v5065_v29 = vrot.slane %v1285_v18, %v5012_v43  ;;  %v1951_v34 = vadd.f32 %v5014_v45, %v1688_v21  ;;  %v1628_v36 = vrot.slane %v1268_v26, %v5022_v50 }
0x166c   :  { %v2005_v22 = vadd.f32 %v5043_v1, %v1934_v62  ;;  %4278 = vtanh.f32 %v2004_v6  ;;  %v2006_v37 = vadd.f32 %v5043_v1, %v1935_v28  ;;  %v1648_v40 = vrot.slane %v1293_v13, %v5022_v50 }
0x166d   :  { %v2028_v7 = vadd.f32 %v5043_v1, %v1957_v25  ;;  %v5074_v42 = vrot.slane %v1383_v27, %v5012_v43  ;;  %v1652_v44 = vrot.slane %v5065_v29, %v5022_v50  ;;  %v1692_v46 = vrot.slane %v1366_v33, %v5022_v50 }
0x166e   :  { %4280 = vtanh.f32 %v2005_v22  ;;  %v2022_v48 = vadd.f32 %v5043_v1, %v1951_v34  ;;  %v5081_v16 = vrot.slane %v1235_v35, %v5012_v43  ;;  %v1936_v53 = vadd.f32 %v5026_v55, %v1628_v36 }
0x166f   :  { %4282 = vtanh.f32 %v2020_v14  ;;  %v1941_v54 = vadd.f32 %v1648_v40, %v5018_v20  ;;  %v1942_v57 = vadd.f32 %v1652_v44, %v5033_v60  ;;  %v5087_v59 = vrot.slane %v1333_v38, %v5012_v43 }
0x1670   :  { %4284 = vtanh.f32 %v2028_v7  ;;  %v1684_v61 = vrot.slane %v1356_v19, %v5022_v50  ;;  %v1716_v62 = vrot.slane %v5074_v42, %v5022_v50  ;;  %v1315_v0 = vcombine.high %v1293_v13, %v1293_v13  ;;  %v5115_v7 = vpop.f32.mrf.mxu0 }
0x1671   :  { %4286 = vtanh.f32 %v2006_v37  ;;  %v2012_v2 = vadd.f32 %v5043_v1, %v1941_v54  ;;  %v2013_v24 = vadd.f32 %v5043_v1, %v1942_v57  ;;  %v1952_v6 = vadd.f32 %v5026_v55, %v1692_v46 }
0x1672   :  { %4288 = vtanh.f32 %v2022_v48  ;;  %v1237_v22 = vcombine.high %v1235_v35, %v1235_v35  ;;  %v1632_v9 = vrot.slane %v5081_v16, %v5022_v50  ;;  %v2007_v14 = vadd.f32 %v5043_v1, %v1936_v53  ;;  %v5133_v46 = vpop.f32.mrf.mxu0 }
0x1673   :  { %4290 = vtanh.f32 %v2012_v2  ;;  %v1413_v19 = vcombine.high %v5050_v8, %v5050_v8  ;;  %v1950_v21 = vadd.f32 %v1684_v61, %v5033_v60  ;;  %v1958_v23 = vadd.f32 %v1716_v62, %v5033_v60 }
0x1674   :  { %v1656_v25 = vrot.slane %v1315_v0, %v5022_v50  ;;  %4292 = vtanh.f32 %v2013_v24  ;;  %v1335_v26 = vcombine.high %v1333_v38, %v1333_v38  ;;  %v1696_v28 = vrot.slane %v5087_v59, %v5022_v50 }
0x1675   :  { %v2023_v3 = vadd.f32 %v5043_v1, %v1952_v6  ;;  %v2021_v13 = vadd.f32 %v5043_v1, %v1950_v21  ;;  %v5119_v8 = vrot.slane %v1237_v22, %v5012_v43  ;;  %4294 = vtanh.f32 %v2007_v14 }
0x1676   :  { %v1937_v33 = vadd.f32 %v1632_v9, %v5115_v7  ;;  %v1720_v35 = vrot.slane %v1413_v19, %v5022_v50  ;;  %v1270_v36 = vcombine.high %v5037_v63, %v5037_v63  ;;  %v2029_v37 = vadd.f32 %v5043_v1, %v1958_v23 }
0x1677   :  { %v1317_v38 = vcombine.high %v5065_v29, %v5065_v29  ;;  %v1943_v40 = vadd.f32 %v5014_v45, %v1656_v25  ;;  %4296 = vtanh.f32 %v2021_v13  ;;  %v5131_v44 = vrot.slane %v1335_v26, %v5012_v43 }
0x1678   :  { %4298 = vtanh.f32 %v2023_v3  ;;  %v1636_v48 = vrot.slane %v5119_v8, %v5022_v50  ;;  %v1953_v53 = vadd.f32 %v1696_v28, %v5115_v7  ;;  %v1368_v54 = vcombine.high %v5028_v56, %v5028_v56  ;;  %v5152_v56 = vpop.f32.mrf.mxu0 }
0x1679   :  { %v4279_v49 = vpop.eup %4278  ;;  %v1415_v57 = vcombine.high %v5074_v42, %v5074_v42  ;;  %v1959_v61 = vadd.f32 %v5014_v45, %v1720_v35  ;;  %4300 = vtanh.f32 %v2029_v37  ;;  %v1660_v62 = vrot.slane %v1317_v38, %v5022_v50 }
0x167a   :  { %v2139_v15 = vmul.f32 %v4279_v49, %v5102_v12  ;;  %v2008_v49 = vadd.f32 %v5043_v1, %v1937_v33  ;;  %v2014_v0 = vadd.f32 %v5043_v1, %v1943_v40  ;;  %v1700_v2 = vrot.slane %v5131_v44, %v5022_v50 }
0x167b   :  { %v4281_v58 = vpop.eup %4280  ;;  %v1267_v24 = vcombine.high %v5081_v16, %v5081_v16  ;;  %v1938_v42 = vadd.f32 %v1636_v48, %v5152_v56  ;;  %v2024_v9 = vadd.f32 %v5043_v1, %v1953_v53  ;;  %v2030_v16 = vadd.f32 %v5043_v1, %v1959_v61 }
0x167c   :  { %v2140_v17 = vmul.f32 %v4281_v58, %v5102_v12  ;;  %v4283_v18 = vpop.eup %4282  ;;  %2203 = vadd.xlane.f32.xlu0 %v2139_v15  ;;  %v1284_v58 = vrot.slane %v1270_v36, %v5012_v43  ;;  %4302 = vtanh.f32 %v2008_v49  ;;  %v1382_v15 = vrot.slane %v1368_v54, %v5012_v43 }
0x167d   :  { %v2155_v27 = vmul.f32 %v4283_v18, %v5102_v12  ;;  %v4285_v34 = vpop.eup %4284  ;;  %v1944_v19 = vadd.f32 %v5026_v55, %v1660_v62  ;;  %4304 = vtanh.f32 %v2014_v0  ;;  %v1365_v25 = vcombine.high %v5087_v59, %v5087_v59 }
0x167e   :  { %2205 = vadd.xlane.f32.xlu1 %v2140_v17  ;;  %v2163_v63 = vmul.f32 %v4285_v34, %v5102_v12  ;;  %v4287_v29 = vpop.eup %4286  ;;  %v1724_v17 = vrot.slane %v1415_v57, %v5022_v50  ;;  %v5160_v18 = vrot.slane %v1284_v58, %v5012_v43  ;;  %v1640_v26 = vrot.slane %v1267_v24, %v5022_v50 }
0x167f   :  { %v4289_v6 = vpop.eup %4288  ;;  %v2141_v22 = vmul.f32 %v4287_v29, %v5102_v12  ;;  %v1954_v28 = vadd.f32 %v1700_v2, %v5152_v56  ;;  %4306 = vtanh.f32 %v2024_v9  ;;  %v2009_v13 = vadd.f32 %v5043_v1, %v1938_v42 }
0x1680   :  { %v4291_v14 = vpop.eup %4290  ;;  %v2157_v3 = vmul.f32 %v4289_v6, %v5102_v12  ;;  %v5172_v33 = vrot.slane %v1382_v15, %v5012_v43  ;;  %v1960_v34 = vadd.f32 %v5026_v55, %v1724_v17  ;;  %v1286_v35 = vcombine.high %v1284_v58, %v1284_v58 }
0x1681   :  { %v2147_v21 = vmul.f32 %v4291_v14, %v5102_v12  ;;  %v4293_v23 = vpop.eup %4292  ;;  %4308 = vtanh.f32 %v2030_v16  ;;  %v1664_v59 = vrot.slane %v5160_v18, %v5022_v50  ;;  %v2015_v36 = vadd.f32 %v5043_v1, %v1944_v19 }
0x1682   :  { %2235 = vadd.xlane.f32.xlu1 %v2155_v27  ;;  %v4295_v27 = vpop.eup %4294  ;;  %v2148_v37 = vmul.f32 %v4293_v23, %v5102_v12  ;;  %v1704_v40 = vrot.slane %v1365_v25, %v5022_v50  ;;  %v1269_v48 = vcombine.high %v5119_v8, %v5119_v8  ;;  %4310 = vtanh.f32 %v2009_v13 }
0x1683   :  { %2219 = vadd.xlane.f32.xlu0 %v2147_v21  ;;  %v2142_v49 = vmul.f32 %v4295_v27, %v5102_v12  ;;  %v2025_v53 = vadd.f32 %v5043_v1, %v1954_v28  ;;  %v1939_v29 = vadd.f32 %v5097_v11, %v1640_v26  ;;  %v1384_v54 = vcombine.high %v1382_v15, %v1382_v15 }
0x1684   :  { %v4297_v38 = vpop.eup %4296  ;;  %v1728_v57 = vrot.slane %v5172_v33, %v5022_v50  ;;  %v2031_v58 = vadd.f32 %v5043_v1, %v1960_v34  ;;  %v5189_v61 = vrot.slane %v1286_v35, %v5012_v43  ;;  %v1945_v8 = vadd.f32 %v1664_v59, %v5115_v7 }
0x1685   :  { %4312 = vtanh.f32 %v2015_v36  ;;  %v2156_v62 = vmul.f32 %v4297_v38, %v5102_v12  ;;  %v1367_v2 = vcombine.high %v5131_v44, %v5131_v44  ;;  %v1644_v24 = vrot.slane %v1269_v48, %v5022_v50 }
0x1686   :  { %2251 = vadd.xlane.f32.xlu1 %v2163_v63  ;;  %v4299_v63 = vpop.eup %4298  ;;  %4314 = vtanh.f32 %v2025_v53  ;;  %v2010_v42 = vadd.f32 %v5043_v1, %v1939_v29  ;;  %v5200_v14 = vrot.slane %v1384_v54, %v5012_v43  ;;  %v1668_v15 = vrot.slane %v5189_v61, %v5022_v50 }
0x1687   :  { %2221 = vadd.xlane.f32.xlu0 %v2148_v37  ;;  %v4301_v0 = vpop.eup %4300  ;;  %v2158_v6 = vmul.f32 %v4299_v63, %v5102_v12  ;;  %4316 = vtanh.f32 %v2031_v58  ;;  %v2016_v44 = vadd.f32 %v5043_v1, %v1945_v8  ;;  %v1961_v16 = vadd.f32 %v1728_v57, %v5115_v7 }
0x1688   :  { %v2164_v17 = vmul.f32 %v4301_v0, %v5102_v12  ;;  %v1708_v21 = vrot.slane %v1367_v2, %v5022_v50  ;;  %4318 = vtanh.f32 %v2010_v42  ;;  %v1940_v26 = vadd.f32 %v5133_v46, %v1644_v24 }
0x1689   :  { %v4303_v9 = vpop.eup %4302  ;;  %v1316_v13 = vcombine.high %v5160_v18, %v5160_v18  ;;  %4320 = vtanh.f32 %v2016_v44  ;;  %v1946_v27 = vadd.f32 %v1668_v15, %v5152_v56  ;;  %v2032_v35 = vadd.f32 %v5043_v1, %v1961_v16 }
0x168a   :  { %2207 = vadd.xlane.f32.xlu1 %v2141_v22  ;;  %v1955_v22 = vadd.f32 %v5097_v11, %v1704_v40  ;;  %v4305_v19 = vpop.eup %4304  ;;  %v2143_v23 = vmul.f32 %v4303_v9, %v5102_v12  ;;  %v2011_v37 = vadd.f32 %v5043_v1, %v1940_v26  ;;  %v1956_v38 = vadd.f32 %v5133_v46, %v1708_v21 }
0x168b   :  { %2237 = vadd.xlane.f32.xlu0 %v2156_v62  ;;  %v2149_v34 = vmul.f32 %v4305_v19, %v5102_v12  ;;  %v1414_v18 = vcombine.high %v5172_v33, %v5172_v33  ;;  %v1672_v48 = vrot.slane %v1316_v13, %v5022_v50  ;;  %v2017_v53 = vadd.f32 %v5043_v1, %v1946_v27 }
0x168c   :  { %v2026_v25 = vadd.f32 %v5043_v1, %v1955_v22  ;;  %v4307_v28 = vpop.eup %4306  ;;  %v2027_v57 = vadd.f32 %v5043_v1, %v1956_v38  ;;  %v1318_v8 = vcombine.high %v5189_v61, %v5189_v61  ;;  %v1416_v22 = vcombine.high %v5200_v14, %v5200_v14 }
0x168d   :  { %v2159_v36 = vmul.f32 %v4307_v28, %v5102_v12  ;;  %v1736_v33 = vrot.slane %v1414_v18, %v5022_v50  ;;  %v1947_v0 = vadd.f32 %v5097_v11, %v1672_v48 }
0x168e   :  { %2239 = vadd.xlane.f32.xlu1 %v2157_v3  ;;  %v1732_v3 = vrot.slane %v5200_v14, %v5022_v50  ;;  %v4309_v59 = vpop.eup %4308  ;;  %4322 = vtanh.f32 %v2026_v25  ;;  %v1676_v61 = vrot.slane %v1318_v8, %v5022_v50  ;;  %v1740_v21 = vrot.slane %v1416_v22, %v5022_v50 }
0x168f   :  { %2253 = vadd.xlane.f32.xlu0 %v2164_v17  ;;  %v4311_v40 = vpop.eup %4310  ;;  %4324 = vtanh.f32 %v2032_v35  ;;  %v1963_v9 = vadd.f32 %v5097_v11, %v1736_v33  ;;  %v2018_v15 = vadd.f32 %v5043_v1, %v1947_v0 }
0x1690   :  { %v1962_v63 = vadd.f32 %v1732_v3, %v5152_v56  ;;  %v2144_v54 = vmul.f32 %v4311_v40, %v5102_v12  ;;  %4326 = vtanh.f32 %v2011_v37  ;;  %v1948_v25 = vadd.f32 %v5133_v46, %v1676_v61 }
0x1691   :  { %4328 = vtanh.f32 %v2017_v53 }
0x1692   :  { %2209 = vadd.xlane.f32.xlu1 %v2142_v49  ;;  %v2165_v49 = vmul.f32 %v4309_v59, %v5102_v12  ;;  %v4313_v29 = vpop.eup %4312  ;;  %v2033_v24 = vadd.f32 %v5043_v1, %v1962_v63  ;;  %4330 = vtanh.f32 %v2027_v57  ;;  %v2019_v27 = vadd.f32 %v5043_v1, %v1948_v25 }
0x1693   :  { %2223 = vadd.xlane.f32.xlu0 %v2149_v34  ;;  %v4315_v58 = vpop.eup %4314  ;;  %v2150_v2 = vmul.f32 %v4313_v29, %v5102_v12  ;;  %v1964_v34 = vadd.f32 %v5133_v46, %v1740_v21 }
0x1694   :  { %v4317_v62 = vpop.eup %4316  ;;  %4332 = vtanh.f32 %v2033_v24 }
0x1695   :  { %v4319_v42 = vpop.eup %4318  ;;  %v2166_v44 = vmul.f32 %v4317_v62, %v5102_v12  ;;  %4334 = vtanh.f32 %v2018_v15  ;;  %v2035_v38 = vadd.f32 %v5043_v1, %v1964_v34  ;;  %v2337_v15 = vstv %s2336_s6 }
0x1696   :  { %2241 = vadd.xlane.f32.xlu1 %v2158_v6  ;;  %v2160_v6 = vmul.f32 %v4315_v58, %v5102_v12  ;;  %v4321_v17 = vpop.eup %4320  ;;  %v2145_v16 = vmul.f32 %v4319_v42, %v5102_v12  ;;  %v2353_v34 = vstv %s4004_s1 }
0x1697   :  { %2255 = vadd.xlane.f32.xlu0 %v2165_v49  ;;  %v2151_v14 = vmul.f32 %v4321_v17, %v5102_v12 }
0x169a   :  { %2211 = vadd.xlane.f32.xlu1 %v2143_v23  ;;  %v2034_v23 = vadd.f32 %v5043_v1, %v1963_v9 }
0x169b   :  { %2225 = vadd.xlane.f32.xlu0 %v2150_v2  ;;  %v4323_v19 = vpop.eup %4322 }
0x169c   :  { %v4325_v26 = vpop.eup %4324  ;;  %v2161_v28 = vmul.f32 %v4323_v19, %v5102_v12  ;;  %4336 = vtanh.f32 %v2034_v23  ;;  %v2341_v19 = vstv %s4001_s29 }
0x169d   :  { %v4327_v3 = vpop.eup %4326  ;;  %v2167_v13 = vmul.f32 %v4325_v26, %v5102_v12  ;;  %4338 = vtanh.f32 %v2019_v27 }
0x169e   :  { %2243 = vadd.xlane.f32.xlu1 %v2159_v36  ;;  %v4329_v35 = vpop.eup %4328  ;;  %v2146_v59 = vmul.f32 %v4327_v3, %v5102_v12  ;;  %4340 = vtanh.f32 %v2035_v38  ;;  %v2349_v3 = vstv %s4003_s19  ;;  %v2357_v38 = vstv %s4005_s2 }
0x169f   :  { %2257 = vadd.xlane.f32.xlu0 %v2166_v44  ;;  %v4331_v36 = vpop.eup %4330  ;;  %v2152_v37 = vmul.f32 %v4329_v35, %v5102_v12 }
0x16a0   :  { %v2162_v18 = vmul.f32 %v4331_v36, %v5102_v12 }
0x16a1   :  { %v4333_v40 = vpop.eup %4332 }
0x16a2   :  { %2213 = vadd.xlane.f32.xlu1 %v2144_v54  ;;  %v2168_v48 = vmul.f32 %v4333_v40, %v5102_v12  ;;  %v4335_v63 = vpop.eup %4334 }
0x16a3   :  { %2227 = vadd.xlane.f32.xlu0 %v2151_v14  ;;  %v2153_v49 = vmul.f32 %v4335_v63, %v5102_v12  ;;  %v2345_v14 = vstv %s4002_s30  ;;  %v2361_v63 = vstv %s4006_s20 }
0x16a6   :  { %2245 = vadd.xlane.f32.xlu1 %v2160_v6 }
0x16a7   :  { %2259 = vadd.xlane.f32.xlu0 %v2167_v13 }
0x16a9   :  { %v4337_v53 = vpop.eup %4336 }
0x16aa   :  { %2215 = vadd.xlane.f32.xlu1 %v2145_v16  ;;  %v2169_v29 = vmul.f32 %v4337_v53, %v5102_v12  ;;  %v4339_v54 = vpop.eup %4338  ;;  %v2338_v16 = vsel %vm2335_vm2, %v2337_v15, 0  ;;  %vm2700_vm2 = vcmask 1047559  }
0x16ab   :  { %2229 = vadd.xlane.f32.xlu0 %v2152_v37  ;;  %v2154_v57 = vmul.f32 %v4339_v54, %v5102_v12  ;;  %v4341_v58 = vpop.eup %4340  ;;  %v2342_v23 = vsel %vm2339_vm3, %v2341_v19, %v2338_v16  ;;  %vm2767_vm3 = vcmask 64512  }
0x16ac   :  { %v2170_v33 = vmul.f32 %v4341_v58, %v5102_v12 }
0x16ae   :  { %2247 = vadd.xlane.f32.xlu1 %v2161_v28  ;;  %v2346_v28 = vsel %vm2343_vm4, %v2345_v14, %v2342_v23 }
0x16af   :  { %2261 = vadd.xlane.f32.xlu0 %v2168_v48  ;;  %v2350_v27 = vsel %vm2347_vm5, %v2349_v3, %v2346_v28 }
0x16b0   :  { %v2354_v37 = vsel %vm2351_vm6, %v2353_v34, %v2350_v27 }
0x16b1   :  { %v2358_v48 = vsel %vm2355_vm7, %v2357_v38, %v2354_v37 }
0x16b2   :  { %2217 = vadd.xlane.f32.xlu1 %v2146_v59  ;;  %v2332_v59 = vand.u32 127, %v1225_v39  ;;  %v2362_v54 = vsel %vm2359_vm8, %v2361_v63, %v2358_v48 }
0x16b3   :  { %2231 = vadd.xlane.f32.xlu0 %v2153_v49 }
0x16b6   :  { %2249 = vadd.xlane.f32.xlu1 %v2162_v18  ;;  %v5302_v18 = vsub.s32 %v2332_v59, %v5009_v41 }
0x16b7   :  { %2263 = vadd.xlane.f32.xlu0 %v2169_v29 }
0x16bb   :  { %2233 = vadd.xlane.f32.xlu0 %v2154_v57  ;;  %v2365_v57 = vstv %s4007_s21 }
0x16bc   :  { %v2366_v23 = vsel %vm2363_vm10, %v2365_v57, %v2362_v54 }
0x16bd   :  { %vm5335_vm1 = vcmp.ge.s32.totalorder %v2332_v59, %v2366_v23 }
0x16bf   :  { %2265 = vadd.xlane.f32.xlu0 %v2170_v33 }
0x1705   :  { %v5264_v0 = vpop.xlane.xlu0 %2203 }
0x1706   :  { %v2435_v58 = vrot.slane %v5264_v0, %v5302_v18 }
0x1707   :  { %v5260_v8 = vpop.xlane.xlu1 %2205 }
0x1708   :  { %v2439_v53 = vrot.slane %v5260_v8, %v5302_v18 }
0x170b   :  { %v5262_v62 = vpop.xlane.xlu1 %2235 }
0x170c   :  { %v5270_v6 = vpop.xlane.xlu0 %2219 }
0x170f   :  { %v5266_v2 = vpop.xlane.xlu1 %2251 }
0x1710   :  { %v5274_v22 = vpop.xlane.xlu0 %2221 }
0x1713   :  { %v5268_v24 = vpop.xlane.xlu1 %2207 }
0x1714   :  { %v5278_v12 = vpop.xlane.xlu0 %2237  ;;  %v2443_v39 = vrot.slane %v5268_v24, %v5302_v18  ;;  %v2689_v24 = vsel %vm2688_vm9, %v2439_v53, %v2435_v58 }
0x1715   :  { %v2503_v16 = vrot.slane %v5278_v12, %v5302_v18 }
0x1716   :  { %v2691_v14 = vsel %vm2690_vm11, %v2443_v39, %v2689_v24 }
0x1717   :  { %v5272_v42 = vpop.xlane.xlu1 %2239 }
0x1718   :  { %v5283_v44 = vpop.xlane.xlu0 %2253  ;;  %v2507_v0 = vrot.slane %v5272_v42, %v5302_v18 }
0x171b   :  { %v5276_v9 = vpop.xlane.xlu1 %2209 }
0x171c   :  { %v5286_v21 = vpop.xlane.xlu0 %2223  ;;  %v2447_v33 = vrot.slane %v5276_v9, %v5302_v18 }
0x171e   :  { %v2693_v3 = vsel %vm2692_vm12, %v2447_v33, %v2691_v14  ;;  %v2471_v14 = vrot.slane %v5274_v22, %v5302_v18 }
0x171f   :  { %v5280_v61 = vpop.xlane.xlu1 %2241 }
0x1720   :  { %v5291_v26 = vpop.xlane.xlu0 %2255  ;;  %v2511_v12 = vrot.slane %v5280_v61, %v5302_v18 }
0x1723   :  { %v2212_v17 = vpop.xlane.xlu1 %2211 }
0x1724   :  { %v5295_v35 = vpop.xlane.xlu0 %2225  ;;  %v2451_v8 = vrot.slane %v2212_v17, %v5302_v18  ;;  %v2499_v17 = vrot.slane %v5262_v62, %v5302_v18 }
0x1726   :  { %v2709_v37 = vsel %vm2688_vm9, %v2503_v16, %v2499_v17  ;;  %v2479_v17 = vrot.slane %v5295_v35, %v5302_v18  ;;  %v2531_v35 = vrot.slane %v5266_v2, %v5302_v18 }
0x1727   :  { %v5289_v25 = vpop.xlane.xlu1 %2243  ;;  %v2710_v48 = vsel %vm2690_vm11, %v2507_v0, %v2709_v37  ;;  %v2475_v0 = vrot.slane %v5286_v21, %v5302_v18  ;;  %v2539_v21 = vrot.slane %v5291_v26, %v5302_v18 }
0x1728   :  { %v5299_v40 = vpop.xlane.xlu0 %2257  ;;  %v2515_v27 = vrot.slane %v5289_v25, %v5302_v18  ;;  %v2711_v59 = vsel %vm2692_vm12, %v2511_v12, %v2710_v48 }
0x1729   :  { %v2543_v37 = vrot.slane %v5299_v40, %v5302_v18 }
0x172a   :  { %v2712_v39 = vsel %vm2694_vm13, %v2515_v27, %v2711_v59  ;;  %v2535_v27 = vrot.slane %v5283_v44, %v5302_v18 }
0x172b   :  { %v2214_v13 = vpop.xlane.xlu1 %2213 }
0x172c   :  { %v5309_v29 = vpop.xlane.xlu0 %2227  ;;  %v2455_v19 = vrot.slane %v2214_v13, %v5302_v18  ;;  %v2695_v13 = vsel %vm2694_vm13, %v2451_v8, %v2693_v3 }
0x172d   :  { %v2483_v3 = vrot.slane %v5309_v29, %v5302_v18 }
0x172e   :  { %v2697_v62 = vsel %vm2696_vm14, %v2455_v19, %v2695_v13 }
0x172f   :  { %v2246_v36 = vpop.xlane.xlu1 %2245 }
0x1730   :  { %v5324_v9 = vpop.xlane.xlu0 %2259  ;;  %v2519_v38 = vrot.slane %v2246_v36, %v5302_v18 }
0x1731   :  { %v2547_v44 = vrot.slane %v5324_v9, %v5302_v18 }
0x1732   :  { %v2713_v57 = vsel %vm2696_vm14, %v2519_v38, %v2712_v39 }
0x1733   :  { %v2216_v49 = vpop.xlane.xlu1 %2215 }
0x1734   :  { %v2459_v28 = vrot.slane %v2216_v49, %v5302_v18  ;;  %v2230_v63 = vpop.xlane.xlu0 %2229 }
0x1735   :  { %v2487_v22 = vrot.slane %v2230_v63, %v5302_v18 }
0x1736   :  { %v2699_v25 = vsel %vm2698_vm15, %v2459_v28, %v2697_v62  ;;  %v2467_v28 = vrot.slane %v5270_v6, %v5302_v18 }
0x1737   :  { %v2248_v15 = vpop.xlane.xlu1 %2247 }
0x1738   :  { %v2523_v49 = vrot.slane %v2248_v15, %v5302_v18  ;;  %v2262_v8 = vpop.xlane.xlu0 %2261  ;;  %v2702_v13 = vsel %vm2688_vm9, %v2471_v14, %v2467_v28 }
0x1739   :  { %v2551_v48 = vrot.slane %v2262_v8, %v5302_v18 }
0x173a   :  { %v2714_v15 = vsel %vm2698_vm15, %v2523_v49, %v2713_v57 }
0x173b   :  { %v2218_v42 = vpop.xlane.xlu1 %2217 }
0x173c   :  { %v2463_v61 = vrot.slane %v2218_v42, %v5302_v18  ;;  %v2232_v23 = vpop.xlane.xlu0 %2231  ;;  %v2703_v42 = vsel %vm2690_vm11, %v2475_v0, %v2702_v13 }
0x173d   :  { %v2491_v6 = vrot.slane %v2232_v23, %v5302_v18  ;;  %v2704_v29 = vsel %vm2692_vm12, %v2479_v17, %v2703_v42 }
0x173e   :  { %v2701_v53 = vsel %vm2700_vm2, %v2463_v61, %v2699_v25  ;;  %v2705_v62 = vsel %vm2694_vm13, %v2483_v3, %v2704_v29  ;;  %v2716_v61 = vsel %vm2688_vm9, %v2535_v27, %v2531_v35 }
0x173f   :  { %v2250_v54 = vpop.xlane.xlu1 %2249  ;;  %v2759_v36 = vsel %vm5335_vm1, -65504.0, %v2701_v53  ;;  %v2706_v26 = vsel %vm2696_vm14, %v2487_v22, %v2705_v62  ;;  %v2717_v2 = vsel %vm2690_vm11, %v2539_v21, %v2716_v61 }
0x1740   :  { %v2527_v58 = vrot.slane %v2250_v54, %v5302_v18  ;;  %v2768_v33 = vsel %vm2767_vm3, %v2759_v36, -inf  ;;  %v2264_v12 = vpop.xlane.xlu0 %2263  ;;  %v2707_v40 = vsel %vm2698_vm15, %v2491_v6, %v2706_v26  ;;  %v2718_v25 = vsel %vm2692_vm12, %v2543_v37, %v2717_v2 }
0x1741   :  { %2769 = vmax.xlane.f32.xlu1 %v2768_v33  ;;  %v2555_v49 = vrot.slane %v2264_v12, %v5302_v18  ;;  %v2719_v9 = vsel %vm2694_vm13, %v2547_v44, %v2718_v25 }
0x1742   :  { %v2715_v24 = vsel %vm2700_vm2, %v2527_v58, %v2714_v15  ;;  %v2720_v54 = vsel %vm2696_vm14, %v2551_v48, %v2719_v9 }
0x1743   :  { %v5358_v16 = vsel %vm5335_vm1, -65504.0, %v2715_v24  ;;  %v2721_v33 = vsel %vm2698_vm15, %v2555_v49, %v2720_v54 }
0x1744   :  { %v2774_v19 = vsel %vm2767_vm3, %v5358_v16, -inf  ;;  %v2234_v38 = vpop.xlane.xlu0 %2233 }
0x1745   :  { %2775 = vmax.xlane.f32.xlu1 %v2774_v19  ;;  %v2495_v63 = vrot.slane %v2234_v38, %v5302_v18  ;;  %v4166_v38 = vpop.f32.mrf.mxu1 }
0x1746   :  { %v1515_v54 = vcombine.high %v4166_v38, %v4166_v38 }
0x1747   :  { %v2708_v59 = vsel %vm2700_vm2, %v2495_v63, %v2707_v40  ;;  %v5449_v61 = vpop.f32.mrf.mxu1 }
0x1748   :  { %v2266_v53 = vpop.xlane.xlu0 %2265  ;;  %v2760_v39 = vsel %vm5335_vm1, -65504.0, %v2708_v59 }
0x1749   :  { %v2559_v57 = vrot.slane %v2266_v53, %v5302_v18  ;;  %v2771_v58 = vsel %vm2767_vm3, %v2760_v39, -inf  ;;  %v4167_v26 = vpop.f32.mrf.mxu1 }
0x174a   :  { %2772 = vmax.xlane.f32.xlu0 %v2771_v58  ;;  %v1571_v2 = vrot.slane %v4167_v26, %v5012_v43 }
0x174b   :  { %v2722_v8 = vsel %vm2700_vm2, %v2559_v57, %v2721_v33  ;;  %v1564_v33 = vcombine.high %v4167_v26, %v4167_v26 }
0x174c   :  { %v2762_v15 = vsel %vm5335_vm1, -65504.0, %v2722_v8  ;;  %v1579_v53 = vcombine.high %v1571_v2, %v1571_v2 }
0x174d   :  { %v2777_v24 = vsel %vm2767_vm3, %v2762_v15, -inf }
0x174e   :  { %2778 = vmax.xlane.f32.xlu0 %v2777_v24  ;;  %v5484_v24 = vrot.slane %v1579_v53, %v5012_v43 }
0x1756   :  { %897 = vrot.lane.b32.xlu1 %v4866_v47, %s4680_s18 }
0x175a   :  { %903 = vrot.lane.b32.xlu1 %v4913_v51, %s4680_s18 }
0x175e   :  { %931 = vrot.lane.b32.xlu1 %v4992_v4, %s4682_s22 }
0x17ca   :  { %v2770_v19 = vpop.xlane.xlu1 %2769 }
0x17cb   :  { %v2792_v23 = vsub.f32 %v2759_v36, %v2770_v19 }
0x17cd   :  { %v2800_v14 = vmul.f32 1.442695, %v2792_v23 }
0x17ce   :  { %v2776_v0 = vpop.xlane.xlu1 %2775 }
0x17cf   :  { %4342 = vpow2.f32 %v2800_v14  ;;  %v2794_v51 = vsub.f32 %v5358_v16, %v2776_v0  ;;  %v5490_v14 = vpop.f32.mrf.mxu1  ;;  %v5493_v0 = vrot.slane %v1515_v54, %v5012_v43 }
0x17d1   :  { %v2804_v13 = vmul.f32 1.442695, %v2794_v51  ;;  %v5497_v51 = vrot.slane %v1564_v33, %v5012_v43 }
0x17d2   :  { %v898_v28 = vpop.permute.xlu1 %897 }
0x17d3   :  { %921 = vst.msk [vmem:[%s6271_s12] sm:$0xff] %vm200_vm0, %v898_v28  ;;  %v2773_v36 = vpop.xlane.xlu0 %2772 }
0x17d4   :  { %v2793_v3 = vsub.f32 %v2760_v39, %v2773_v36 }
0x17d6   :  { %v904_v17 = vpop.permute.xlu1 %903  ;;  %v2802_v27 = vmul.f32 1.442695, %v2793_v3  ;;  %v1844_v3 = vrot.slane %v5484_v24, %v5022_v50 }
0x17d7   :  { %924 = vst.msk [vmem:[%s6271_s12 + $0x18] sm:$0xff] %vm200_vm0, %v904_v17  ;;  %v2779_v22 = vpop.xlane.xlu0 %2778 }
0x17d8   :  { %4344 = vpow2.f32 %v2802_v27  ;;  %v2795_v42 = vsub.f32 %v2762_v15, %v2779_v22  ;;  %v5481_v15 = vrot.slane %v1571_v2, %v5012_v43 }
0x17d9   :  { %4346 = vpow2.f32 %v2804_v13 }
0x17da   :  { %v932_v47 = vpop.permute.xlu1 %931  ;;  %v2806_v21 = vmul.f32 1.442695, %v2795_v42  ;;  %v1609_v36 = vcombine.high %v5481_v15, %v5481_v15  ;;  %v5511_v42 = vrot.slane %v5493_v0, %v5012_v43 }
0x17db   :  { %934 = vst.msk [vmem:[#allocation18] sm:$0xff] %vm200_vm0, %v932_v47 }
0x17dc   :  { %v4343_v4 = vpop.eup %4342  ;;  %4348 = vpow2.f32 %v2806_v21  ;;  %v5517_v21 = vld [vmem:[%s6269_s10] ss:$0 sm:$0xff]  ;;  %s4684_s10 = smov [#allocation17]  }
0x17dd   :  { %v2816_v12 = vsel %vm2767_vm3, %v4343_v4, 0.0  ;;  %s3904_s17 = sshll.u32 %s4684_s10, 4  ;;  %s3905_s17 = int_to_ptr.vmem [resolvable:$true] %s3904_s17 }
0x17de   :  { %2817 = vadd.xlane.f32.xlu0 %v2816_v12  ;;  %v1473_v12 = vrot.slane %v5490_v14, %v5012_v43 }
0x17e5   :  { %v5424_v6 = vpop.eup %4344 }
0x17e6   :  { %v2819_v16 = vsel %vm2767_vm3, %v5424_v6, 0.0  ;;  %v5428_v35 = vpop.eup %4346 }
0x17e7   :  { %2820 = vadd.xlane.f32.xlu0 %v2819_v16  ;;  %v2822_v29 = vsel %vm2767_vm3, %v5428_v35, 0.0 }
0x17e9   :  { %v5432_v37 = vpop.eup %4348 }
0x17ea   :  { %v2825_v62 = vsel %vm2767_vm3, %v5432_v37, 0.0 }
0x17eb   :  { %2823 = vadd.xlane.f32.xlu0 %v2822_v29  ;;  %v5522_v29 = vrot.slane %v5497_v51, %v5012_v43 }
0x17ef   :  { %2826 = vadd.xlane.f32.xlu0 %v2825_v62 }
0x1805   :  { %899 = vrot.lane.b32.xlu0 %v4881_v5, %s4680_s18  ;;  %v1522_v5 = vrot.slane %v4166_v38, %v5012_v43  ;;  %v1990_v38 = vadd.f32 %v1844_v3, %v5033_v60 }
0x1807   :  { %v1538_v39 = vrot.slane %v1522_v5, %v5012_v43 }
0x1809   :  { %901 = vrot.lane.b32.xlu0 %v4897_v31, %s4680_s18  ;;  %v1424_v31 = vrot.slane %v5449_v61, %v5012_v43  ;;  %v1808_v19 = vrot.slane %v1538_v39, %v5022_v50  ;;  %v1560_v17 = vcombine.high %v1538_v39, %v1538_v39 }
0x180b   :  { %v5488_v23 = vrot.slane %v1424_v31, %v5012_v43  ;;  %v1981_v13 = vadd.f32 %v1808_v19, %v5018_v20 }
0x180d   :  { %905 = vrot.lane.b32.xlu0 %v4928_v10, %s4680_s18  ;;  %v1530_v10 = vcombine.high %v1522_v5, %v1522_v5  ;;  %v1744_v27 = vrot.slane %v5488_v23, %v5022_v50  ;;  %v1481_v5 = vcombine.high %v1473_v12, %v1473_v12 }
0x180f   :  { %v5555_v53 = vrot.slane %v1481_v5, %v5012_v43  ;;  %v1580_v5 = vcombine.high %v5497_v51, %v5497_v51  ;;  %v5633_v51 = vld [vmem:[%s6270_s11] ss:$0 sm:$0xff] }
0x1811   :  { %907 = vrot.lane.b32.xlu0 %v4943_v32, %s4680_s18  ;;  %v5454_v32 = vsub.s32 1, %v5009_v41 }
0x1815   :  { %909 = vrot.lane.b32.xlu0 %v4953_v52, %s4680_s18  ;;  %v1432_v52 = vcombine.high %v1424_v31, %v1424_v31  ;;  %v2052_v31 = vadd.f32 %v5517_v21, %v1981_v13 }
0x1817   :  { %v5472_v59 = vrot.slane %v1432_v52, %v5012_v43  ;;  %v1824_v52 = vrot.slane %v5511_v42, %v5022_v50 }
0x1819   :  { %911 = vrot.lane.b32.xlu0 %v5000_v30, %s4680_s18  ;;  %v5459_v30 = vrot.slane %v1530_v10, %v5012_v43  ;;  %v1748_v58 = vrot.slane %v5472_v59, %v5022_v50  ;;  %v1965_v10 = vadd.f32 %v1744_v27, %v5018_v20  ;;  %v1985_v33 = vadd.f32 %v1824_v52, %v5115_v7 }
0x181a   :  { %v1611_v27 = vcombine.high %v5484_v24, %v5484_v24 }
0x181b   :  { %v1812_v9 = vrot.slane %v5459_v30, %v5022_v50  ;;  %v1966_v47 = vadd.f32 %v1748_v58, %v5033_v60  ;;  %v2036_v39 = vadd.f32 %v5517_v21, %v1965_v10 }
0x181d   :  { %v1982_v8 = vadd.f32 %v1812_v9, %v5033_v60  ;;  %v2037_v16 = vadd.f32 %v5517_v21, %v1966_v47  ;;  %v5552_v9 = vrot.slane %v1473_v12, %v5012_v43  ;;  %v1462_v47 = vcombine.high %v5488_v23, %v5488_v23 }
0x181e   :  { %v1562_v12 = vcombine.high %v5459_v30, %v5459_v30  ;;  %v2056_v23 = vadd.f32 %v5517_v21, %v1985_v33 }
0x1867   :  { %v2818_v44 = vpop.xlane.xlu0 %2817 }
0x1868   :  { %4350 = vrcp.f32 %v2818_v44  ;;  %v1848_v44 = vrot.slane %v1609_v36, %v5022_v50 }
0x1870   :  { %v2821_v25 = vpop.xlane.xlu0 %2820 }
0x1871   :  { %4352 = vrcp.f32 %v2821_v25  ;;  %v2061_v25 = vadd.f32 %v5517_v21, %v1990_v38  ;;  %v1820_v38 = vrot.slane %v1562_v12, %v5022_v50 }
0x1874   :  { %v2824_v57 = vpop.xlane.xlu0 %2823 }
0x1875   :  { %v4351_v48 = vpop.eup %4350  ;;  %4354 = vrcp.f32 %v2824_v57  ;;  %v1417_v57 = vcombine.high %v5449_v61, %v5449_v61 }
0x1876   :  { %v5456_v63 = vmul.f32 %v4351_v48, %v4343_v4  ;;  %v2053_v4 = vadd.f32 %v5043_v1, %v1982_v8  ;;  %v1816_v1 = vrot.slane %v1560_v17, %v5022_v50  ;;  %v1511_v17 = vcombine.high %v5552_v9, %v5552_v9 }
0x1877   :  { %v5592_v13 = vrot.slane %v1417_v57, %v5012_v43  ;;  %v1984_v57 = vadd.f32 %v5026_v55, %v1820_v38 }
0x1878   :  { %2856 = vst.msk [vmem:[%s6275_s16] sm:$0xff] %vm2767_vm3, %v5456_v63  ;;  %v2874_v49 = vrot.slane %v5456_v63, %v5454_v32  ;;  %v2867_v40 = vrot.slane %v5456_v63, %v5022_v50  ;;  %v2827_v28 = vpop.xlane.xlu0 %2826  ;;  %v1983_v2 = vadd.f32 %v5014_v45, %v1816_v1  ;;  %v1784_v30 = vrot.slane %v1511_v17, %v5022_v50 }
0x1879   :  { %4356 = vrcp.f32 %v2827_v28  ;;  %v1466_v28 = vcombine.high %v5490_v14, %v5490_v14  ;;  %v1780_v14 = vrot.slane %v5555_v53, %v5022_v50  ;;  %v1752_v1 = vrot.slane %v1462_v47, %v5022_v50 }
0x187a   :  { %2876 = vbcast.lane.b32.xlu1 %v2874_v49, 256  ;;  %2869 = vbcast.lane.b32.xlu0 %v2867_v40, 256  ;;  %4358 = vtanh.f32 %v2053_v4  ;;  %v1856_v49 = vrot.slane %v5522_v29, %v5022_v50  ;;  %v1991_v40 = vadd.f32 %v5014_v45, %v1848_v44  ;;  %v2054_v8 = vadd.f32 %v5517_v21, %v1983_v2 }
0x187b   :  { %4360 = vtanh.f32 %v2037_v16  ;;  %v1840_v4 = vrot.slane %v5481_v15, %v5022_v50  ;;  %v1974_v15 = vadd.f32 %v1780_v14, %v5033_v60  ;;  %v5638_v2 = vrot.slane %v5592_v13, %v5012_v43 }
0x187c   :  { %v900_v22 = vpop.permute.xlu0 %899  ;;  %4362 = vtanh.f32 %v2052_v31  ;;  %v1993_v19 = vadd.f32 %v1856_v49, %v5115_v7  ;;  %v2062_v61 = vadd.f32 %v5517_v21, %v1991_v40  ;;  %v1852_v31 = vrot.slane %v1611_v27, %v5022_v50 }
0x187d   :  { %922 = vst.msk [vmem:[%s6271_s12 + $0x8] sm:$0xff] %vm200_vm0, %v900_v22  ;;  %4364 = vtanh.f32 %v2061_v25  ;;  %v5597_v22 = vrot.slane %v1466_v28, %v5012_v43  ;;  %v1989_v16 = vadd.f32 %v1840_v4, %v5018_v20  ;;  %v1967_v49 = vadd.f32 %v5014_v45, %v1752_v1 }
0x187e   :  { %v4353_v62 = vpop.eup %4352  ;;  %4366 = vtanh.f32 %v2036_v39  ;;  %v1992_v33 = vadd.f32 %v5026_v55, %v1852_v31  ;;  %v1561_v47 = vcombine.high %v5511_v42, %v5511_v42  ;;  %v2055_v42 = vadd.f32 %v5517_v21, %v1984_v57 }
0x187f   :  { %v5533_v26 = vmul.f32 %v4353_v62, %v5424_v6  ;;  %4368 = vtanh.f32 %v2062_v61  ;;  %v1531_v62 = vcombine.high %v5493_v0, %v5493_v0  ;;  %v5622_v60 = vrot.slane %v5597_v22, %v5012_v43 }
0x1880   :  { %v902_v48 = vpop.permute.xlu0 %901  ;;  %4370 = vtanh.f32 %v2054_v8  ;;  %v1975_v0 = vadd.f32 %v5014_v45, %v1784_v30  ;;  %v2038_v61 = vadd.f32 %v5517_v21, %v1967_v49  ;;  %v2063_v27 = vadd.f32 %v5517_v21, %v1992_v33 }
0x1881   :  { %2857 = vst.msk [vmem:[%s6275_s16 + $0x8] sm:$0xff] %vm2767_vm3, %v5533_v26  ;;  %v5643_v39 = vrot.slane %v1531_v62, %v5012_v43  ;;  %v1792_v45 = vrot.slane %v5622_v60, %v5022_v50  ;;  %v1832_v1 = vrot.slane %v1561_v47, %v5022_v50  ;;  %v1482_v38 = vcombine.high %v5597_v22, %v5597_v22 }
0x1882   :  { %923 = vst.msk [vmem:[%s6271_s12 + $0x10] sm:$0xff] %vm200_vm0, %v902_v48  ;;  %v4355_v6 = vpop.eup %4354  ;;  %v2045_v48 = vadd.f32 %v5517_v21, %v1974_v15  ;;  %v2046_v8 = vadd.f32 %v5517_v21, %v1975_v0  ;;  %v1433_v49 = vcombine.high %v5592_v13, %v5592_v13  ;;  %v1464_v13 = vcombine.high %v5472_v59, %v5472_v59 }
0x1883   :  { %v5559_v54 = vmul.f32 %v4355_v6, %v5428_v35  ;;  %v2060_v6 = vadd.f32 %v5517_v21, %v1989_v16  ;;  %v1828_v4 = vrot.slane %v5643_v39, %v5022_v50  ;;  %v1987_v22 = vadd.f32 %v5097_v11, %v1832_v1 }
0x1884   :  { %v906_v58 = vpop.permute.xlu0 %905 }
0x1885   :  { %2858 = vst.msk [vmem:[%s6275_s16 + $0x10] sm:$0xff] %vm2767_vm3, %v5559_v54  ;;  %v1986_v16 = vadd.f32 %v1828_v4, %v5152_v56 }
0x1886   :  { %925 = vst.msk [vmem:[%s6271_s12 + $0x20] sm:$0xff] %vm200_vm0, %v906_v58  ;;  %v4357_v35 = vpop.eup %4356  ;;  %v5647_v58 = vrot.slane %v1580_v5, %v5012_v43 }
0x1887   :  { %v5587_v36 = vmul.f32 %v4357_v35, %v5432_v37  ;;  %v2064_v37 = vadd.f32 %v5517_v21, %v1993_v19  ;;  %v4359_v24 = vpop.eup %4358  ;;  %v1760_v35 = vrot.slane %v5638_v2, %v5022_v50 }
0x1888   :  { %v908_v3 = vpop.permute.xlu0 %907  ;;  %v4361_v10 = vpop.eup %4360  ;;  %v2188_v52 = vmul.f32 %v5633_v51, %v4359_v24  ;;  %v1860_v12 = vrot.slane %v5647_v58, %v5022_v50 }
0x1889   :  { %2859 = vst.msk [vmem:[%s6275_s16 + $0x18] sm:$0xff] %vm2767_vm3, %v5587_v36  ;;  %4372 = vtanh.f32 %v2064_v37  ;;  %v4363_v40 = vpop.eup %4362  ;;  %v2172_v19 = vmul.f32 %v5633_v51, %v4361_v10  ;;  %v1977_v37 = vadd.f32 %v1792_v45, %v5115_v7  ;;  %v1969_v24 = vadd.f32 %v1760_v35, %v5115_v7 }
0x188a   :  { %926 = vst.msk [vmem:[%s6271_s12 + $0x28] sm:$0xff] %vm200_vm0, %v908_v3  ;;  %4374 = vtanh.f32 %v2056_v23  ;;  %v4365_v28 = vpop.eup %4364  ;;  %v2187_v17 = vmul.f32 %v5633_v51, %v4363_v40  ;;  %v1610_v3 = vcombine.high %v5522_v29, %v5522_v29  ;;  %v1513_v7 = vcombine.high %v5555_v53, %v5555_v53 }
0x188b   :  { %4376 = vtanh.f32 %v2045_v48  ;;  %v4367_v14 = vpop.eup %4366  ;;  %v2196_v30 = vmul.f32 %v5633_v51, %v4365_v28  ;;  %v2048_v5 = vadd.f32 %v5517_v21, %v1977_v37  ;;  %v2040_v0 = vadd.f32 %v5517_v21, %v1969_v24 }
0x188c   :  { %v910_v44 = vpop.permute.xlu0 %909  ;;  %4378 = vtanh.f32 %v2060_v6  ;;  %v4369_v15 = vpop.eup %4368  ;;  %v2171_v23 = vmul.f32 %v5633_v51, %v4367_v14  ;;  %v1864_v62 = vrot.slane %v1610_v3, %v5022_v50  ;;  %v2057_v6 = vadd.f32 %v5517_v21, %v1986_v16 }
0x188d   :  { %927 = vst.msk [vmem:[%s6271_s12 + $0x30] sm:$0xff] %vm200_vm0, %v910_v44  ;;  %4380 = vtanh.f32 %v2046_v8  ;;  %v4371_v29 = vpop.eup %4370  ;;  %v1994_v44 = vadd.f32 %v1860_v12, %v5152_v56  ;;  %v2197_v31 = vmul.f32 %v5633_v51, %v4369_v15  ;;  %v1788_v57 = vrot.slane %v1513_v7, %v5022_v50 }
0x188e   :  { %4382 = vtanh.f32 %v2038_v61  ;;  %v2189_v48 = vmul.f32 %v5633_v51, %v4371_v29  ;;  %v1995_v53 = vadd.f32 %v5097_v11, %v1864_v62  ;;  %v1776_v8 = vrot.slane %v5552_v9, %v5022_v50 }
0x188f   :  { %4384 = vtanh.f32 %v2063_v27  ;;  %v2065_v40 = vadd.f32 %v5517_v21, %v1994_v44  ;;  %v2058_v35 = vadd.f32 %v5517_v21, %v1987_v22  ;;  %v5707_v61 = vrot.slane %v1433_v49, %v5012_v43 }
0x1890   :  { %v912_v25 = vpop.permute.xlu0 %911  ;;  %4386 = vtanh.f32 %v2055_v42  ;;  %v1512_v14 = vcombine.high %v5622_v60, %v5622_v60  ;;  %v1976_v9 = vadd.f32 %v5026_v55, %v1788_v57  ;;  %v1756_v3 = vrot.slane %v1464_v13, %v5022_v50 }
0x1891   :  { %928 = vst.msk [vmem:[%s6271_s12 + $0x38] sm:$0xff] %vm200_vm0, %v912_v25  ;;  %929 = vst.msk [vmem:[#allocation17] sm:$0xff] %vm200_vm0, %v912_v25  ;;  %v5696_v25 = vrot.slane %v1482_v38, %v5012_v43  ;;  %4388 = vtanh.f32 %v2048_v5  ;;  %v1973_v43 = vadd.f32 %v1776_v8, %v5018_v20  ;;  %v1463_v60 = vcombine.high %v5638_v2, %v5638_v2 }
0x1892   :  { %4390 = vtanh.f32 %v2040_v0  ;;  %v1764_v37 = vrot.slane %v5707_v61, %v5022_v50  ;;  %v1800_v15 = vrot.slane %v1512_v14, %v5022_v50  ;;  %v2047_v20 = vadd.f32 %v5517_v21, %v1976_v9 }
0x1893   :  { %4392 = vtanh.f32 %v2065_v40  ;;  %v1796_v59 = vrot.slane %v5696_v25, %v5022_v50  ;;  %v1968_v2 = vadd.f32 %v5026_v55, %v1756_v3  ;;  %v2044_v29 = vadd.f32 %v5517_v21, %v1973_v43 }
0x1894   :  { %4394 = vtanh.f32 %v2057_v6  ;;  %v1768_v62 = vrot.slane %v1463_v60, %v5022_v50  ;;  %v1514_v38 = vcombine.high %v5696_v25, %v5696_v25  ;;  %v1979_v7 = vadd.f32 %v5097_v11, %v1800_v15 }
0x1895   :  { %v1978_v42 = vadd.f32 %v1796_v59, %v5152_v56  ;;  %v1465_v49 = vcombine.high %v5707_v61, %v5707_v61 }
0x1896   :  { %v4373_v10 = vpop.eup %4372  ;;  %v1804_v6 = vrot.slane %v1514_v38, %v5022_v50  ;;  %v1971_v25 = vadd.f32 %v5097_v11, %v1768_v62 }
0x1897   :  { %v2199_v33 = vmul.f32 %v5633_v51, %v4373_v10  ;;  %v2049_v55 = vadd.f32 %v5517_v21, %v1978_v42  ;;  %v1970_v10 = vadd.f32 %v1764_v37, %v5152_v56  ;;  %v1772_v11 = vrot.slane %v1465_v49, %v5022_v50 }
0x1898   :  { %v2042_v61 = vadd.f32 %v5517_v21, %v1971_v25  ;;  %v5799_v49 = vsub.s32 7, %v5009_v41 }
0x1899   :  { %2301 = vadd.xlane.f32.xlu0 %v2188_v52  ;;  %v4375_v52 = vpop.eup %4374  ;;  %v2041_v57 = vadd.f32 %v5517_v21, %v1970_v10  ;;  %v1972_v3 = vadd.f32 %v5133_v46, %v1772_v11 }
0x189a   :  { %v4377_v45 = vpop.eup %4376 }
0x189b   :  { %v4379_v28 = vpop.eup %4378  ;;  %v2180_v47 = vmul.f32 %v5633_v51, %v4377_v45  ;;  %v2043_v37 = vadd.f32 %v5517_v21, %v1972_v3 }
0x189c   :  { %v4381_v4 = vpop.eup %4380  ;;  %v2195_v12 = vmul.f32 %v5633_v51, %v4379_v28 }
0x189d   :  { %2269 = vadd.xlane.f32.xlu0 %v2172_v19  ;;  %v2191_v19 = vmul.f32 %v5633_v51, %v4375_v52  ;;  %v4383_v27 = vpop.eup %4382  ;;  %v2181_v24 = vmul.f32 %v5633_v51, %v4381_v4 }
0x189e   :  { %2299 = vadd.xlane.f32.xlu1 %v2187_v17  ;;  %v2066_v17 = vadd.f32 %v5517_v21, %v1995_v53  ;;  %v2173_v1 = vmul.f32 %v5633_v51, %v4383_v27  ;;  %v2050_v53 = vadd.f32 %v5517_v21, %v1979_v7 }
0x18a0   :  { %4396 = vtanh.f32 %v2066_v17 }
0x18a1   :  { %2317 = vadd.xlane.f32.xlu0 %v2196_v30  ;;  %v1612_v30 = vcombine.high %v5647_v58, %v5647_v58  ;;  %4398 = vtanh.f32 %v2058_v35  ;;  %v1563_v58 = vcombine.high %v5643_v39, %v5643_v39  ;;  %v2039_v39 = vadd.f32 %v5517_v21, %v1968_v2 }
0x18a2   :  { %2267 = vadd.xlane.f32.xlu1 %v2171_v23  ;;  %v4385_v23 = vpop.eup %4384  ;;  %4400 = vtanh.f32 %v2047_v20 }
0x18a3   :  { %v4387_v16 = vpop.eup %4386  ;;  %v1868_v44 = vrot.slane %v1612_v30, %v5022_v50  ;;  %v2198_v5 = vmul.f32 %v5633_v51, %v4385_v23  ;;  %4402 = vtanh.f32 %v2044_v29  ;;  %v1836_v52 = vrot.slane %v1563_v58, %v5022_v50 }
0x18a4   :  { %v2190_v0 = vmul.f32 %v5633_v51, %v4387_v16  ;;  %4404 = vtanh.f32 %v2049_v55 }
0x18a5   :  { %2319 = vadd.xlane.f32.xlu0 %v2197_v31  ;;  %v4389_v31 = vpop.eup %4388  ;;  %v1996_v22 = vadd.f32 %v5133_v46, %v1868_v44  ;;  %4406 = vtanh.f32 %v2039_v39  ;;  %v1988_v13 = vadd.f32 %v5133_v46, %v1836_v52 }
0x18a6   :  { %2303 = vadd.xlane.f32.xlu1 %v2189_v48  ;;  %v4391_v48 = vpop.eup %4390  ;;  %v2183_v56 = vmul.f32 %v5633_v51, %v4389_v31  ;;  %4408 = vtanh.f32 %v2050_v53  ;;  %v5782_v31 = vsub.s32 2, %v5009_v41 }
0x18a7   :  { %v4393_v40 = vpop.eup %4392  ;;  %v2067_v8 = vadd.f32 %v5517_v21, %v1996_v22  ;;  %4410 = vtanh.f32 %v2041_v57  ;;  %v2059_v4 = vadd.f32 %v5517_v21, %v1988_v13  ;;  %v5802_v22 = vsub.s32 6, %v5009_v41 }
0x18a8   :  { %v4395_v45 = vpop.eup %4394  ;;  %v2200_v28 = vmul.f32 %v5633_v51, %v4393_v40  ;;  %v2881_v39 = vrot.slane %v5456_v63, %v5782_v31  ;;  %v2923_v40 = vrot.slane %v5533_v26, %v5022_v50  ;;  %v2937_v25 = vrot.slane %v5533_v26, %v5782_v31 }
0x18a9   :  { %2323 = vadd.xlane.f32.xlu0 %v2199_v33  ;;  %v2175_v33 = vmul.f32 %v5633_v51, %v4391_v48  ;;  %v2192_v17 = vmul.f32 %v5633_v51, %v4395_v45  ;;  %4412 = vtanh.f32 %v2067_v8  ;;  %v5792_v48 = vsub.s32 4, %v5009_v41 }
0x18aa   :  { %2307 = vadd.xlane.f32.xlu1 %v2191_v19  ;;  %v1980_v19 = vadd.f32 %v5133_v46, %v1804_v6  ;;  %4414 = vtanh.f32 %v2042_v61  ;;  %v2916_v6 = vrot.slane %v5456_v63, %v5799_v49  ;;  %v2909_v53 = vrot.slane %v5456_v63, %v5802_v22 }
0x18ab   :  { %v2895_v52 = vrot.slane %v5456_v63, %v5792_v48 }
0x18ac   :  { %v2051_v59 = vadd.f32 %v5517_v21, %v1980_v19 }
0x18ad   :  { %2285 = vadd.xlane.f32.xlu0 %v2180_v47  ;;  %v4397_v35 = vpop.eup %4396 }
0x18ae   :  { %2315 = vadd.xlane.f32.xlu1 %v2195_v12  ;;  %v4399_v14 = vpop.eup %4398  ;;  %v2201_v9 = vmul.f32 %v5633_v51, %v4397_v35  ;;  %4416 = vtanh.f32 %v2051_v59 }
0x18af   :  { %v4401_v47 = vpop.eup %4400  ;;  %v2193_v43 = vmul.f32 %v5633_v51, %v4399_v14  ;;  %4418 = vtanh.f32 %v2059_v4 }
0x18b0   :  { %v4403_v12 = vpop.eup %4402  ;;  %v2182_v27 = vmul.f32 %v5633_v51, %v4401_v47  ;;  %4420 = vtanh.f32 %v2043_v37 }
0x18b1   :  { %2287 = vadd.xlane.f32.xlu0 %v2181_v24  ;;  %v4405_v60 = vpop.eup %4404  ;;  %v2179_v30 = vmul.f32 %v5633_v51, %v4403_v12 }
0x18b2   :  { %2271 = vadd.xlane.f32.xlu1 %v2173_v1  ;;  %v4407_v15 = vpop.eup %4406  ;;  %v2184_v46 = vmul.f32 %v5633_v51, %v4405_v60 }
0x18b3   :  { %v4409_v42 = vpop.eup %4408  ;;  %v2174_v20 = vmul.f32 %v5633_v51, %v4407_v15  ;;  %v4440_v15 = vld [vmem:[#allocation13] sm:$0xff]  }
0x18b4   :  { %v4411_v24 = vpop.eup %4410  ;;  %v2185_v23 = vmul.f32 %v5633_v51, %v4409_v42 }
0x18b5   :  { %2321 = vadd.xlane.f32.xlu0 %v2198_v5  ;;  %v2176_v29 = vmul.f32 %v5633_v51, %v4411_v24  ;;  %v5779_v5 = vsub.s32 3, %v5009_v41 }
0x18b6   :  { %2305 = vadd.xlane.f32.xlu1 %v2190_v0  ;;  %v4413_v2 = vpop.eup %4412  ;;  %v5789_v0 = vsub.s32 5, %v5009_v41 }
0x18b7   :  { %v4415_v21 = vpop.eup %4414  ;;  %v2202_v1 = vmul.f32 %v5633_v51, %v4413_v2  ;;  %v2888_v10 = vrot.slane %v5456_v63, %v5779_v5  ;;  %v2944_v41 = vrot.slane %v5533_v26, %v5779_v5 }
0x18b8   :  { %v2177_v58 = vmul.f32 %v5633_v51, %v4415_v21 }
0x18b9   :  { %2291 = vadd.xlane.f32.xlu0 %v2183_v56  ;;  %v2930_v56 = vrot.slane %v5533_v26, %v5454_v32 }
0x18ba   :  { %2275 = vadd.xlane.f32.xlu1 %v2175_v33 }
0x18bb   :  { %v4417_v16 = vpop.eup %4416 }
0x18bc   :  { %v4419_v62 = vpop.eup %4418  ;;  %v2186_v44 = vmul.f32 %v5633_v51, %v4417_v16 }
0x18bd   :  { %2325 = vadd.xlane.f32.xlu0 %v2200_v28  ;;  %v2194_v38 = vmul.f32 %v5633_v51, %v4419_v62  ;;  %v4421_v7 = vpop.eup %4420 }
0x18be   :  { %2309 = vadd.xlane.f32.xlu1 %v2192_v17  ;;  %v2178_v55 = vmul.f32 %v5633_v51, %v4421_v7  ;;  %v2902_v51 = vrot.slane %v5456_v63, %v5789_v0  ;;  %v2951_v63 = vrot.slane %v5533_v26, %v5792_v48 }
0x18c1   :  { %2327 = vadd.xlane.f32.xlu0 %v2201_v9 }
0x18c2   :  { %2311 = vadd.xlane.f32.xlu1 %v2193_v43 }
0x18c5   :  { %2289 = vadd.xlane.f32.xlu0 %v2182_v27 }
0x18c6   :  { %2283 = vadd.xlane.f32.xlu1 %v2179_v30 }
0x18c9   :  { %2293 = vadd.xlane.f32.xlu0 %v2184_v46  ;;  %v5832_v46 = vunpack.c.h.bf16 %v4440_v15 }
0x18ca   :  { %2273 = vadd.xlane.f32.xlu1 %v2174_v20  ;;  %v5834_v20 = vunpack.c.l.bf16 %v4440_v15 }
0x18cd   :  { %2295 = vadd.xlane.f32.xlu0 %v2185_v23 }
0x18ce   :  { %2277 = vadd.xlane.f32.xlu1 %v2176_v29 }
0x18d1   :  { %2329 = vadd.xlane.f32.xlu0 %v2202_v1 }
0x18d2   :  { %2279 = vadd.xlane.f32.xlu1 %v2177_v58 }
0x18d5   :  { %2297 = vadd.xlane.f32.xlu0 %v2186_v44 }
0x18d6   :  { %2313 = vadd.xlane.f32.xlu1 %v2194_v38 }
0x18da   :  { %2281 = vadd.xlane.f32.xlu1 %v2178_v55 }
0x18eb   :  { %2890 = vbcast.lane.b32.xlu1 %v2888_v10, 256  ;;  %2883 = vbcast.lane.b32.xlu0 %v2881_v39, 256 }
0x18ec   :  { %v2870_v57 = vpop.permute.xlu0 %2869  ;;  %v2877_v45 = vpop.permute.xlu1 %2876 }
0x18ed   :  { %v3313_v29 = vmul.f32 %v2877_v45, %v5832_v46  ;;  %v3312_v58 = vmul.f32 %v2870_v57, %v5834_v20 }
0x18ef   :  { %2904 = vbcast.lane.b32.xlu1 %v2902_v51, 256  ;;  %2897 = vbcast.lane.b32.xlu0 %v2895_v52, 256  ;;  %v4441_v51 = vld [vmem:[#allocation13 + $0x8] sm:$0xff]   ;;  %v3376_v45 = vrot.slane %v3312_v58, 4 }
0x18f0   :  { %v5848_v52 = vunpack.c.l.bf16 %v4441_v51 }
0x18f3   :  { %2918 = vbcast.lane.b32.xlu1 %v2916_v6, 256  ;;  %2911 = vbcast.lane.b32.xlu0 %v2909_v53, 256  ;;  %v5850_v6 = vunpack.c.h.bf16 %v4441_v51  ;;  %v3382_v53 = vrot.slane %v3313_v29, 4 }
0x18f7   :  { %2932 = vbcast.lane.b32.xlu1 %v2930_v56, 256  ;;  %2925 = vbcast.lane.b32.xlu0 %v2923_v40, 256 }
0x18fb   :  { %2946 = vbcast.lane.b32.xlu1 %v2944_v41, 256  ;;  %2939 = vbcast.lane.b32.xlu0 %v2937_v25, 256 }
0x18ff   :  { %2953 = vbcast.lane.b32.xlu0 %v2951_v63, 256 }
0x1922   :  { %v2302_v33 = vpop.xlane.xlu0 %2301 }
0x1923   :  { %v2631_v40 = vrot.slane %v2302_v33, %v5302_v18 }
0x1926   :  { %v5818_v13 = vpop.xlane.xlu0 %2269 }
0x1927   :  { %v2300_v8 = vpop.xlane.xlu1 %2299 }
0x1928   :  { %v2627_v55 = vrot.slane %v2300_v8, %v5302_v18 }
0x192a   :  { %v2318_v19 = vpop.xlane.xlu0 %2317  ;;  %v2737_v33 = vsel %vm2688_vm9, %v2631_v40, %v2627_v55 }
0x192b   :  { %v5820_v28 = vpop.xlane.xlu1 %2267  ;;  %v2663_v21 = vrot.slane %v2318_v19, %v5302_v18 }
0x192e   :  { %v2320_v35 = vpop.xlane.xlu0 %2319 }
0x192f   :  { %v2304_v11 = vpop.xlane.xlu1 %2303  ;;  %v2667_v10 = vrot.slane %v2320_v35, %v5302_v18 }
0x1930   :  { %v2635_v56 = vrot.slane %v2304_v11, %v5302_v18  ;;  %v2567_v11 = vrot.slane %v5818_v13, %v5302_v18 }
0x1932   :  { %v2324_v61 = vpop.xlane.xlu0 %2323 }
0x1933   :  { %v5822_v17 = vpop.xlane.xlu1 %2307 }
0x1936   :  { %v2286_v14 = vpop.xlane.xlu0 %2285 }
0x1937   :  { %v2316_v59 = vpop.xlane.xlu1 %2315  ;;  %v2599_v1 = vrot.slane %v2286_v14, %v5302_v18 }
0x1938   :  { %v2659_v24 = vrot.slane %v2316_v59, %v5302_v18  ;;  %v2675_v59 = vrot.slane %v2324_v61, %v5302_v18 }
0x193a   :  { %v2288_v9 = vpop.xlane.xlu0 %2287  ;;  %v2744_v62 = vsel %vm2688_vm9, %v2663_v21, %v2659_v24 }
0x193b   :  { %v5824_v47 = vpop.xlane.xlu1 %2271  ;;  %v2603_v39 = vrot.slane %v2288_v9, %v5302_v18  ;;  %v2745_v41 = vsel %vm2690_vm11, %v2667_v10, %v2744_v62 }
0x193e   :  { %v2322_v4 = vpop.xlane.xlu0 %2321 }
0x193f   :  { %v2306_v3 = vpop.xlane.xlu1 %2305  ;;  %v2671_v44 = vrot.slane %v2322_v4, %v5302_v18  ;;  %v2563_v4 = vrot.slane %v5820_v28, %v5302_v18 }
0x1940   :  { %v2639_v25 = vrot.slane %v2306_v3, %v5302_v18  ;;  %v2738_v3 = vsel %vm2690_vm11, %v2635_v56, %v2737_v33 }
0x1941   :  { %v2746_v8 = vsel %vm2692_vm12, %v2671_v44, %v2745_v41  ;;  %v3383_v44 = vadd.f32 %v3382_v53, %v3313_v29 }
0x1942   :  { %v2292_v43 = vpop.xlane.xlu0 %2291  ;;  %v2739_v13 = vsel %vm2692_vm12, %v2639_v25, %v2738_v3  ;;  %v2747_v61 = vsel %vm2694_vm13, %v2675_v59, %v2746_v8 }
0x1943   :  { %v5826_v12 = vpop.xlane.xlu1 %2275  ;;  %v2611_v24 = vrot.slane %v2292_v43, %v5302_v18  ;;  %v3384_v33 = vrot.slane %v3383_v44, 2 }
0x1946   :  { %v2326_v27 = vpop.xlane.xlu0 %2325 }
0x1947   :  { %v5828_v60 = vpop.xlane.xlu1 %2309  ;;  %v2679_v19 = vrot.slane %v2326_v27, %v5302_v18  ;;  %v2643_v27 = vrot.slane %v5822_v17, %v5302_v18 }
0x1948   :  { %v2647_v28 = vrot.slane %v5828_v60, %v5302_v18 }
0x194a   :  { %v2328_v37 = vpop.xlane.xlu0 %2327 }
0x194b   :  { %v5830_v30 = vpop.xlane.xlu1 %2311  ;;  %v2683_v9 = vrot.slane %v2328_v37, %v5302_v18 }
0x194c   :  { %v2651_v55 = vrot.slane %v5830_v30, %v5302_v18 }
0x194e   :  { %v2290_v42 = vpop.xlane.xlu0 %2289 }
0x194f   :  { %v2284_v23 = vpop.xlane.xlu1 %2283  ;;  %v2607_v35 = vrot.slane %v2290_v42, %v5302_v18  ;;  %v2571_v42 = vrot.slane %v5824_v47, %v5302_v18 }
0x1950   :  { %v2595_v2 = vrot.slane %v2284_v23, %v5302_v18  ;;  %v2748_v23 = vsel %vm2696_vm14, %v2679_v19, %v2747_v61 }
0x1952   :  { %v2294_v16 = vpop.xlane.xlu0 %2293  ;;  %v2730_v38 = vsel %vm2688_vm9, %v2599_v1, %v2595_v2  ;;  %v2749_v1 = vsel %vm2698_vm15, %v2683_v9, %v2748_v23 }
0x1953   :  { %v2274_v7 = vpop.xlane.xlu1 %2273  ;;  %v2731_v63 = vsel %vm2690_vm11, %v2603_v39, %v2730_v38  ;;  %v2615_v2 = vrot.slane %v2294_v16, %v5302_v18  ;;  %v2723_v38 = vsel %vm2688_vm9, %v2567_v11, %v2563_v4  ;;  %v3377_v16 = vadd.f32 %v3376_v45, %v3312_v58 }
0x1954   :  { %v2732_v15 = vsel %vm2692_vm12, %v2607_v35, %v2731_v63  ;;  %v2575_v62 = vrot.slane %v2274_v7, %v5302_v18  ;;  %v2724_v10 = vsel %vm2690_vm11, %v2571_v42, %v2723_v38  ;;  %v2740_v39 = vsel %vm2694_vm13, %v2643_v27, %v2739_v13  ;;  %v4442_v35 = vld [vmem:[#allocation13 + $0x10] sm:$0xff]  }
0x1955   :  { %v2733_v47 = vsel %vm2694_vm13, %v2611_v24, %v2732_v15  ;;  %v2741_v7 = vsel %vm2696_vm14, %v2647_v28, %v2740_v39  ;;  %v5909_v11 = vunpack.c.l.bf16 %v4442_v35  ;;  %v3378_v42 = vrot.slane %v3377_v16, 2  ;;  %v4443_v28 = vld [vmem:[#allocation13 + $0x18] sm:$0xff]  }
0x1956   :  { %v2296_v57 = vpop.xlane.xlu0 %2295  ;;  %v2734_v29 = vsel %vm2696_vm14, %v2615_v2, %v2733_v47  ;;  %v2725_v58 = vsel %vm2692_vm12, %v2575_v62, %v2724_v10  ;;  %v2742_v45 = vsel %vm2698_vm15, %v2651_v55, %v2741_v7  ;;  %v5929_v2 = vunpack.c.l.bf16 %v4443_v28 }
0x1957   :  { %v2278_v14 = vpop.xlane.xlu1 %2277  ;;  %v2619_v43 = vrot.slane %v2296_v57, %v5302_v18  ;;  %v2579_v57 = vrot.slane %v5826_v12, %v5302_v18  ;;  %v5937_v38 = vunpack.c.h.bf16 %v4442_v35  ;;  %v3379_v55 = vadd.f32 %v3378_v42, %v3377_v16 }
0x1958   :  { %v2583_v25 = vrot.slane %v2278_v14, %v5302_v18 }
0x1959   :  { %v2735_v41 = vsel %vm2698_vm15, %v2619_v43, %v2734_v29  ;;  %v2726_v4 = vsel %vm2694_vm13, %v2579_v57, %v2725_v58  ;;  %v5943_v58 = vunpack.c.h.bf16 %v4443_v28 }
0x195a   :  { %v2330_v37 = vpop.xlane.xlu0 %2329  ;;  %v2727_v13 = vsel %vm2696_vm14, %v2583_v25, %v2726_v4 }
0x195b   :  { %v2687_v17 = vrot.slane %v2330_v37, %v5302_v18  ;;  %v2280_v21 = vpop.xlane.xlu1 %2279 }
0x195c   :  { %v2587_v8 = vrot.slane %v2280_v21, %v5302_v18 }
0x195d   :  { %v2750_v60 = vsel %vm2700_vm2, %v2687_v17, %v2749_v1  ;;  %v3385_v1 = vadd.f32 %v3384_v33, %v3383_v44 }
0x195e   :  { %v2298_v51 = vpop.xlane.xlu0 %2297  ;;  %v5893_v56 = vsel %vm5335_vm1, -65504.0, %v2750_v60  ;;  %v2728_v37 = vsel %vm2698_vm15, %v2587_v8, %v2727_v13 }
0x195f   :  { %v2623_v53 = vrot.slane %v2298_v51, %v5302_v18  ;;  %v2314_v40 = vpop.xlane.xlu1 %2313  ;;  %v2789_v30 = vsel %vm2767_vm3, %v5893_v56, -inf  ;;  %v3386_v29 = vrot.slane %v3385_v1, 1 }
0x1960   :  { %v2655_v63 = vrot.slane %v2314_v40, %v5302_v18  ;;  %2790 = vmax.xlane.f32.xlu0 %v2789_v30 }
0x1961   :  { %v2736_v19 = vsel %vm2700_vm2, %v2623_v53, %v2735_v41  ;;  %v3380_v41 = vrot.slane %v3379_v55, 1  ;;  %v3387_v35 = vadd.f32 %v3386_v29, %v3385_v1  ;;  %v2986_v29 = vrot.slane %v5559_v54, %v5454_v32 }
0x1962   :  { %v2884_v59 = vpop.permute.xlu0 %2883  ;;  %v5913_v14 = vsel %vm5335_vm1, -65504.0, %v2736_v19  ;;  %v2743_v9 = vsel %vm2700_vm2, %v2655_v63, %v2742_v45 }
0x1963   :  { %v3314_v12 = vmul.f32 %v2884_v59, %v5848_v52  ;;  %v2282_v3 = vpop.xlane.xlu1 %2281  ;;  %v2783_v27 = vsel %vm2767_vm3, %v5913_v14, -inf  ;;  %v5922_v15 = vsel %vm5335_vm1, -65504.0, %v2743_v9  ;;  %v3381_v4 = vadd.f32 %v3380_v41, %v3379_v55 }
0x1964   :  { %v2591_v24 = vrot.slane %v2282_v3, %v5302_v18  ;;  %2784 = vmax.xlane.f32.xlu0 %v2783_v27  ;;  %v2786_v61 = vsel %vm2767_vm3, %v5922_v15, -inf }
0x1965   :  { %v3388_v23 = vrot.slane %v3314_v12, 4  ;;  %2787 = vmax.xlane.f32.xlu1 %v2786_v61 }
0x1966   :  { %v2898_v17 = vpop.permute.xlu0 %2897  ;;  %v2729_v21 = vsel %vm2700_vm2, %v2591_v24, %v2728_v37 }
0x1967   :  { %v3389_v47 = vadd.f32 %v3388_v23, %v3314_v12  ;;  %v3316_v62 = vmul.f32 %v2898_v17, %v5909_v11  ;;  %v2891_v43 = vpop.permute.xlu1 %2890  ;;  %v5935_v18 = vsel %vm5335_vm1, -65504.0, %v2729_v21  ;;  %v3824_v17 = vsel %vm2688_vm9, %v3387_v35, %v3381_v4 }
0x1968   :  { %v3315_v60 = vmul.f32 %v2891_v43, %v5850_v6  ;;  %v2780_v10 = vsel %vm2767_vm3, %v5935_v18, -inf  ;;  %v3056_v35 = vrot.slane %v5587_v36, %v5779_v5  ;;  %v3014_v4 = vrot.slane %v5559_v54, %v5789_v0 }
0x1969   :  { %v3390_v39 = vrot.slane %v3389_v47, 2  ;;  %v3400_v51 = vrot.slane %v3316_v62, 4  ;;  %2781 = vmax.xlane.f32.xlu1 %v2780_v10 }
0x196a   :  { %v3394_v44 = vrot.slane %v3315_v60, 4  ;;  %v2912_v7 = vpop.permute.xlu0 %2911 }
0x196b   :  { %v3391_v53 = vadd.f32 %v3390_v39, %v3389_v47  ;;  %v3401_v40 = vadd.f32 %v3400_v51, %v3316_v62  ;;  %v3318_v34 = vmul.f32 %v2912_v7, %v5929_v2  ;;  %v2905_v30 = vpop.permute.xlu1 %2904  ;;  %v2979_v7 = vrot.slane %v5559_v54, %v5022_v50 }
0x196c   :  { %v3395_v16 = vadd.f32 %v3394_v44, %v3315_v60  ;;  %v3317_v25 = vmul.f32 %v2905_v30, %v5937_v38 }
0x196d   :  { %v3392_v63 = vrot.slane %v3391_v53, 1  ;;  %v3402_v57 = vrot.slane %v3401_v40, 2  ;;  %v3412_v45 = vrot.slane %v3318_v34, 4 }
0x196e   :  { %v3396_v8 = vrot.slane %v3395_v16, 2  ;;  %v3406_v19 = vrot.slane %v3317_v25, 4 }
0x196f   :  { %v3403_v33 = vadd.f32 %v3402_v57, %v3401_v40  ;;  %v3413_v59 = vadd.f32 %v3412_v45, %v3318_v34  ;;  %v2919_v9 = vpop.permute.xlu1 %2918  ;;  %v3393_v42 = vadd.f32 %v3392_v63, %v3391_v53  ;;  %v2993_v45 = vrot.slane %v5559_v54, %v5782_v31 }
0x1970   :  { %v3397_v12 = vadd.f32 %v3396_v8, %v3395_v16  ;;  %v3407_v3 = vadd.f32 %v3406_v19, %v3317_v25  ;;  %v3319_v27 = vmul.f32 %v2919_v9, %v5943_v58  ;;  %v3035_v16 = vrot.slane %v5587_v36, %v5022_v50 }
0x1971   :  { %v3414_v13 = vrot.slane %v3413_v59, 2  ;;  %v3404_v23 = vrot.slane %v3403_v33, 1  ;;  %v3825_v62 = vsel %vm2690_vm11, %v3393_v42, %v3824_v17  ;;  %v3042_v25 = vrot.slane %v5587_v36, %v5454_v32 }
0x1972   :  { %v3398_v24 = vrot.slane %v3397_v12, 1  ;;  %v3408_v61 = vrot.slane %v3407_v3, 2  ;;  %v3418_v37 = vrot.slane %v3319_v27, 4  ;;  %v3049_v8 = vrot.slane %v5587_v36, %v5782_v31 }
0x1973   :  { %v3415_v28 = vadd.f32 %v3414_v13, %v3413_v59  ;;  %v3405_v10 = vadd.f32 %v3404_v23, %v3403_v33  ;;  %v3000_v19 = vrot.slane %v5559_v54, %v5779_v5  ;;  %v3007_v33 = vrot.slane %v5559_v54, %v5792_v48 }
0x1974   :  { %v3399_v21 = vadd.f32 %v3398_v24, %v3397_v12  ;;  %v3409_v47 = vadd.f32 %v3408_v61, %v3407_v3  ;;  %v3419_v1 = vadd.f32 %v3418_v37, %v3319_v27  ;;  %v3063_v59 = vrot.slane %v5587_v36, %v5792_v48  ;;  %v2926_v24 = vpop.permute.xlu0 %2925  ;;  %v2933_v37 = vpop.permute.xlu1 %2932 }
0x1975   :  { %v3416_v39 = vrot.slane %v3415_v28, 1  ;;  %v2958_v9 = vrot.slane %v5533_v26, %v5789_v0  ;;  %v3070_v12 = vrot.slane %v5587_v36, %v5789_v0  ;;  %v2965_v3 = vrot.slane %v5533_v26, %v5802_v22 }
0x1976   :  { %v3826_v43 = vsel %vm2692_vm12, %v3399_v21, %v3825_v62  ;;  %v3410_v55 = vrot.slane %v3409_v47, 1  ;;  %v3420_v60 = vrot.slane %v3419_v1, 2  ;;  %v3021_v27 = vrot.slane %v5559_v54, %v5802_v22 }
0x1977   :  { %v3827_v53 = vsel %vm2694_vm13, %v3405_v10, %v3826_v43  ;;  %v3417_v30 = vadd.f32 %v3416_v39, %v3415_v28  ;;  %v3077_v42 = vrot.slane %v5587_v36, %v5802_v22  ;;  %v2972_v13 = vrot.slane %v5533_v26, %v5799_v49 }
0x1978   :  { %v3411_v51 = vadd.f32 %v3410_v55, %v3409_v47  ;;  %v3421_v44 = vadd.f32 %v3420_v60, %v3419_v1  ;;  %v2940_v61 = vpop.permute.xlu0 %2939  ;;  %v2947_v17 = vpop.permute.xlu1 %2946  ;;  %v3321_v1 = vmul.f32 %v2933_v37, %v5832_v46  ;;  %v3320_v60 = vmul.f32 %v2926_v24, %v5834_v20 }
0x1979   :  { %v3322_v26 = vmul.f32 %v2940_v61, %v5848_v52 }
0x197a   :  { %v3828_v40 = vsel %vm2696_vm14, %v3411_v51, %v3827_v53  ;;  %v3422_v34 = vrot.slane %v3421_v44, 1  ;;  %2981 = vbcast.lane.b32.xlu1 %v2979_v7, 256  ;;  %2988 = vbcast.lane.b32.xlu0 %v2986_v29, 256  ;;  %v3430_v10 = vrot.slane %v3321_v1, 4  ;;  %v3424_v53 = vrot.slane %v3320_v60, 4 }
0x197b   :  { %v3829_v63 = vsel %vm2698_vm15, %v3417_v30, %v3828_v40  ;;  %v3436_v40 = vrot.slane %v3322_v26, 4 }
0x197c   :  { %v3423_v41 = vadd.f32 %v3422_v34, %v3421_v44  ;;  %v2954_v23 = vpop.permute.xlu0 %2953 }
0x197e   :  { %v3830_v57 = vsel %vm2700_vm2, %v3423_v41, %v3829_v63  ;;  %3037 = vbcast.lane.b32.xlu1 %v3035_v16, 256  ;;  %3044 = vbcast.lane.b32.xlu0 %v3042_v25, 256 }
0x197f   :  { %3888 = vst [vmem:[#allocation20] sm:$0xff] %v3830_v57 }
0x1982   :  { %2995 = vbcast.lane.b32.xlu1 %v2993_v45, 256  ;;  %3051 = vbcast.lane.b32.xlu0 %v3049_v8, 256  ;;  %v5999_v8 = vadd.f32 %v3424_v53, %v3320_v60 }
0x1984   :  { %v3426_v37 = vrot.slane %v5999_v8, 2 }
0x1986   :  { %3002 = vbcast.lane.b32.xlu1 %v3000_v19, 256  ;;  %3058 = vbcast.lane.b32.xlu0 %v3056_v35, 256  ;;  %v6001_v19 = vadd.f32 %v3436_v40, %v3322_v26 }
0x198a   :  { %3009 = vbcast.lane.b32.xlu1 %v3007_v33, 256  ;;  %3065 = vbcast.lane.b32.xlu0 %v3063_v59, 256  ;;  %v6004_v59 = vmul.f32 %v2954_v23, %v5909_v11 }
0x198e   :  { %2960 = vbcast.lane.b32.xlu1 %v2958_v9, 256  ;;  %3016 = vbcast.lane.b32.xlu0 %v3014_v4, 256 }
0x1992   :  { %3072 = vbcast.lane.b32.xlu1 %v3070_v12, 256  ;;  %2967 = vbcast.lane.b32.xlu0 %v2965_v3, 256 }
0x1996   :  { %3023 = vbcast.lane.b32.xlu1 %v3021_v27, 256  ;;  %3079 = vbcast.lane.b32.xlu0 %v3077_v42, 256 }
0x199a   :  { %2974 = vbcast.lane.b32.xlu1 %v2972_v13, 256 }
0x19e9   :  { %v2791_v28 = vpop.xlane.xlu0 %2790 }
0x19ea   :  { %v2799_v21 = vsub.f32 %v5893_v56, %v2791_v28  ;;  %v3438_v28 = vrot.slane %v6001_v19, 2 }
0x19ec   :  { %v2814_v47 = vmul.f32 1.442695, %v2799_v21 }
0x19ed   :  { %v2785_v62 = vpop.xlane.xlu0 %2784 }
0x19ee   :  { %v2788_v43 = vpop.xlane.xlu1 %2787  ;;  %4422 = vpow2.f32 %v2814_v47  ;;  %v2797_v39 = vsub.f32 %v5913_v14, %v2785_v62  ;;  %v3323_v14 = vmul.f32 %v2947_v17, %v5850_v6 }
0x19ef   :  { %v2798_v55 = vsub.f32 %v5922_v15, %v2788_v43  ;;  %v3431_v15 = vadd.f32 %v3430_v10, %v3321_v1  ;;  %v3448_v1 = vrot.slane %v6004_v59, 4 }
0x19f0   :  { %v2810_v30 = vmul.f32 1.442695, %v2797_v39  ;;  %v3442_v13 = vrot.slane %v3323_v14, 4 }
0x19f1   :  { %v2812_v51 = vmul.f32 1.442695, %v2798_v55  ;;  %v2989_v44 = vpop.permute.xlu0 %2988  ;;  %v3432_v33 = vrot.slane %v3431_v15, 2 }
0x19f2   :  { %v3329_v7 = vmul.f32 %v2989_v44, %v5832_v46  ;;  %v2782_v56 = vpop.xlane.xlu1 %2781  ;;  %v6016_v44 = vadd.f32 %v3442_v13, %v3323_v14 }
0x19f3   :  { %4424 = vpow2.f32 %v2812_v51  ;;  %v2796_v29 = vsub.f32 %v5935_v18, %v2782_v56  ;;  %v6012_v47 = vadd.f32 %v3432_v33, %v3431_v15 }
0x19f4   :  { %v3478_v34 = vrot.slane %v3329_v7, 4 }
0x19f5   :  { %v2808_v41 = vmul.f32 1.442695, %v2796_v29  ;;  %v3045_v16 = vpop.permute.xlu0 %3044 }
0x19f6   :  { %v3479_v25 = vadd.f32 %v3478_v34, %v3329_v7  ;;  %v3337_v63 = vmul.f32 %v3045_v16, %v5832_v46  ;;  %v2982_v57 = vpop.permute.xlu1 %2981 }
0x19f7   :  { %4426 = vpow2.f32 %v2808_v41  ;;  %v3328_v45 = vmul.f32 %v2982_v57, %v5834_v20 }
0x19f8   :  { %v3480_v18 = vrot.slane %v3479_v25, 2  ;;  %v3526_v35 = vrot.slane %v3337_v63, 4  ;;  %4428 = vpow2.f32 %v2810_v30 }
0x19f9   :  { %v3472_v9 = vrot.slane %v3328_v45, 4  ;;  %v3052_v4 = vpop.permute.xlu0 %3051 }
0x19fa   :  { %v3481_v12 = vadd.f32 %v3480_v18, %v3479_v25  ;;  %v3527_v3 = vadd.f32 %v3526_v35, %v3337_v63  ;;  %v3338_v27 = vmul.f32 %v3052_v4, %v5848_v52  ;;  %v3038_v42 = vpop.permute.xlu1 %3037 }
0x19fb   :  { %v3473_v24 = vadd.f32 %v3472_v9, %v3328_v45  ;;  %v3336_v61 = vmul.f32 %v3038_v42, %v5834_v20  ;;  %v6010_v23 = vpop.eup %4422 }
0x19fc   :  { %v3528_v17 = vrot.slane %v3527_v3, 2  ;;  %v3532_v21 = vrot.slane %v3338_v27, 4  ;;  %v3482_v60 = vrot.slane %v3481_v12, 1  ;;  %v2837_v30 = vsel %vm2767_vm3, %v6010_v23, 0.0 }
0x19fd   :  { %v3474_v62 = vrot.slane %v3473_v24, 2  ;;  %v3520_v43 = vrot.slane %v3336_v61, 4  ;;  %v3059_v55 = vpop.permute.xlu0 %3058 }
0x19fe   :  { %v3529_v26 = vadd.f32 %v3528_v17, %v3527_v3  ;;  %v3533_v10 = vadd.f32 %v3532_v21, %v3338_v27  ;;  %v3339_v39 = vmul.f32 %v3059_v55, %v5850_v6  ;;  %v2996_v51 = vpop.permute.xlu1 %2995  ;;  %v3483_v14 = vadd.f32 %v3482_v60, %v3481_v12 }
0x19ff   :  { %v3475_v7 = vadd.f32 %v3474_v62, %v3473_v24  ;;  %v3521_v56 = vadd.f32 %v3520_v43, %v3336_v61  ;;  %v3330_v29 = vmul.f32 %v2996_v51, %v5848_v52 }
0x1a00   :  { %v6019_v53 = vpop.eup %4424  ;;  %v3530_v40 = vrot.slane %v3529_v26, 1  ;;  %v3534_v34 = vrot.slane %v3533_v10, 2  ;;  %v3538_v15 = vrot.slane %v3339_v39, 4 }
0x1a01   :  { %v3476_v41 = vrot.slane %v3475_v7, 1  ;;  %v3522_v16 = vrot.slane %v3521_v56, 2  ;;  %v3484_v25 = vrot.slane %v3330_v29, 4  ;;  %v3066_v63 = vpop.permute.xlu0 %3065  ;;  %v2834_v57 = vsel %vm2767_vm3, %v6019_v53, 0.0 }
0x1a02   :  { %v3535_v45 = vadd.f32 %v3534_v34, %v3533_v10  ;;  %v3539_v18 = vadd.f32 %v3538_v15, %v3339_v39  ;;  %v3340_v35 = vmul.f32 %v3066_v63, %v5909_v11  ;;  %v3003_v33 = vpop.permute.xlu1 %3002  ;;  %2835 = vadd.xlane.f32.xlu0 %v2834_v57  ;;  %v3531_v13 = vadd.f32 %v3530_v40, %v3529_v26 }
0x1a03   :  { %v3477_v9 = vadd.f32 %v3476_v41, %v3475_v7  ;;  %v3523_v4 = vadd.f32 %v3522_v16, %v3521_v56  ;;  %v3485_v3 = vadd.f32 %v3484_v25, %v3330_v29  ;;  %v3331_v27 = vmul.f32 %v3003_v33, %v5850_v6 }
0x1a04   :  { %v6027_v42 = vpop.eup %4426  ;;  %v3536_v24 = vrot.slane %v3535_v45, 1  ;;  %v3540_v61 = vrot.slane %v3539_v18, 2  ;;  %v3544_v17 = vrot.slane %v3340_v35, 4 }
0x1a05   :  { %v3838_v21 = vsel %vm2688_vm9, %v3483_v14, %v3477_v9  ;;  %v3524_v12 = vrot.slane %v3523_v4, 1  ;;  %v3486_v62 = vrot.slane %v3485_v3, 2  ;;  %v3490_v43 = vrot.slane %v3331_v27, 4  ;;  %v3017_v55 = vpop.permute.xlu0 %3016  ;;  %v6030_v60 = vpop.eup %4428 }
0x1a06   :  { %v3537_v10 = vadd.f32 %v3536_v24, %v3535_v45  ;;  %v3541_v39 = vadd.f32 %v3540_v61, %v3539_v18  ;;  %v3545_v51 = vadd.f32 %v3544_v17, %v3340_v35  ;;  %v3333_v7 = vmul.f32 %v3017_v55, %v5937_v38  ;;  %v3010_v56 = vpop.permute.xlu1 %3009  ;;  %2838 = vadd.xlane.f32.xlu0 %v2837_v30 }
0x1a07   :  { %v3525_v29 = vadd.f32 %v3524_v12, %v3523_v4  ;;  %v3487_v26 = vadd.f32 %v3486_v62, %v3485_v3  ;;  %v3491_v40 = vadd.f32 %v3490_v43, %v3331_v27  ;;  %v2828_v34 = vsel %vm2767_vm3, %v6027_v42, 0.0 }
0x1a08   :  { %v3542_v15 = vrot.slane %v3541_v39, 1  ;;  %v3546_v41 = vrot.slane %v3545_v51, 2  ;;  %v3502_v16 = vrot.slane %v3333_v7, 4  ;;  %2829 = vadd.xlane.f32.xlu1 %v2828_v34  ;;  %v3332_v25 = vmul.f32 %v3010_v56, %v5909_v11 }
0x1a09   :  { %v3845_v63 = vsel %vm2688_vm9, %v3531_v13, %v3525_v29  ;;  %v3488_v57 = vrot.slane %v3487_v26, 1  ;;  %v3492_v14 = vrot.slane %v3491_v40, 2  ;;  %v2968_v45 = vpop.permute.xlu0 %2967  ;;  %v2831_v30 = vsel %vm2767_vm3, %v6030_v60, 0.0 }
0x1a0a   :  { %v3846_v18 = vsel %vm2690_vm11, %v3537_v10, %v3845_v63  ;;  %v3543_v35 = vadd.f32 %v3542_v15, %v3541_v39  ;;  %v3547_v33 = vadd.f32 %v3546_v41, %v3545_v51  ;;  %v3503_v9 = vadd.f32 %v3502_v16, %v3333_v7  ;;  %v2961_v4 = vpop.permute.xlu1 %2960  ;;  %2832 = vadd.xlane.f32.xlu0 %v2831_v30 }
0x1a0b   :  { %v3489_v3 = vadd.f32 %v3488_v57, %v3487_v26  ;;  %v3493_v27 = vadd.f32 %v3492_v14, %v3491_v40  ;;  %v3496_v24 = vrot.slane %v3332_v25, 4  ;;  %v3326_v61 = vmul.f32 %v2968_v45, %v5929_v2 }
0x1a0c   :  { %v3847_v13 = vsel %vm2692_vm12, %v3543_v35, %v3846_v18  ;;  %v3548_v17 = vrot.slane %v3547_v33, 1  ;;  %v3504_v12 = vrot.slane %v3503_v9, 2  ;;  %v3325_v62 = vmul.f32 %v2961_v4, %v5937_v38 }
0x1a0d   :  { %v3449_v43 = vadd.f32 %v3448_v1, %v6004_v59  ;;  %v3839_v55 = vsel %vm2690_vm11, %v3489_v3, %v3838_v21  ;;  %v3494_v10 = vrot.slane %v3493_v27, 1  ;;  %v3497_v39 = vadd.f32 %v3496_v24, %v3332_v25 }
0x1a0e   :  { %v3444_v51 = vrot.slane %v6016_v44, 2  ;;  %v3549_v7 = vadd.f32 %v3548_v17, %v3547_v33  ;;  %v3505_v56 = vadd.f32 %v3504_v12, %v3503_v9  ;;  %v3454_v29 = vrot.slane %v3325_v62, 4  ;;  %v3073_v26 = vpop.permute.xlu1 %3072 }
0x1a0f   :  { %v3495_v40 = vadd.f32 %v3494_v10, %v3493_v27  ;;  %v3498_v34 = vrot.slane %v3497_v39, 2  ;;  %v3460_v15 = vrot.slane %v3326_v61, 4  ;;  %v3341_v41 = vmul.f32 %v3073_v26, %v5937_v38 }
0x1a10   :  { %v3427_v16 = vadd.f32 %v3426_v37, %v5999_v8  ;;  %v3439_v59 = vadd.f32 %v3438_v28, %v6001_v19  ;;  %v3848_v1 = vsel %vm2694_vm13, %v3549_v7, %v3847_v13  ;;  %v3455_v21 = vadd.f32 %v3454_v29, %v3325_v62 }
0x1a11   :  { %v3434_v25 = vrot.slane %v6012_v47, 1  ;;  %v3840_v63 = vsel %vm2692_vm12, %v3495_v40, %v3839_v55  ;;  %v3499_v57 = vadd.f32 %v3498_v34, %v3497_v39  ;;  %v3550_v14 = vrot.slane %v3341_v41, 4 }
0x1a12   :  { %v3450_v45 = vrot.slane %v3449_v43, 2  ;;  %v3445_v30 = vadd.f32 %v3444_v51, %v6016_v44  ;;  %v3506_v18 = vrot.slane %v3505_v56, 1  ;;  %v3456_v35 = vrot.slane %v3455_v21, 2  ;;  %v3024_v33 = vpop.permute.xlu1 %3023 }
0x1a13   :  { %v3500_v8 = vrot.slane %v3499_v57, 1  ;;  %v3461_v37 = vadd.f32 %v3460_v15, %v3326_v61  ;;  %v3551_v9 = vadd.f32 %v3550_v14, %v3341_v41  ;;  %v3334_v19 = vmul.f32 %v3024_v33, %v5929_v2 }
0x1a14   :  { %v3428_v28 = vrot.slane %v3427_v16, 1  ;;  %v3440_v4 = vrot.slane %v3439_v59, 1  ;;  %v3084_v3 = vrot.slane %v5587_v36, %v5799_v49  ;;  %v3435_v27 = vadd.f32 %v3434_v25, %v6012_v47 }
0x1a15   :  { %v3501_v24 = vadd.f32 %v3500_v8, %v3499_v57  ;;  %v3552_v13 = vrot.slane %v3551_v9, 2  ;;  %v3508_v17 = vrot.slane %v3334_v19, 4  ;;  %v3451_v12 = vadd.f32 %v3450_v45, %v3449_v43 }
0x1a16   :  { %v3446_v44 = vrot.slane %v3445_v30, 1  ;;  %v3507_v62 = vadd.f32 %v3506_v18, %v3505_v56  ;;  %v3457_v55 = vadd.f32 %v3456_v35, %v3455_v21  ;;  %v2975_v10 = vpop.permute.xlu1 %2974  ;;  %v3462_v39 = vrot.slane %v3461_v37, 2 }
0x1a17   :  { %v3841_v61 = vsel %vm2694_vm13, %v3501_v24, %v3840_v63  ;;  %v3553_v51 = vadd.f32 %v3552_v13, %v3551_v9  ;;  %v3509_v7 = vadd.f32 %v3508_v17, %v3334_v19  ;;  %v3429_v29 = vadd.f32 %v3428_v28, %v3427_v16 }
0x1a18   :  { %v3842_v26 = vsel %vm2696_vm14, %v3507_v62, %v3841_v61  ;;  %v3327_v36 = vmul.f32 %v2975_v10, %v5943_v58  ;;  %v3441_v40 = vadd.f32 %v3440_v4, %v3439_v59  ;;  %v3447_v15 = vadd.f32 %v3446_v44, %v3445_v30 }
0x1a19   :  { %v3554_v47 = vrot.slane %v3553_v51, 1  ;;  %v3510_v34 = vrot.slane %v3509_v7, 2  ;;  %3086 = vbcast.lane.b32.xlu1 %v3084_v3, 256  ;;  %v3831_v43 = vsel %vm2688_vm9, %v3435_v27, %v3429_v29  ;;  %v3458_v56 = vrot.slane %v3457_v55, 1 }
0x1a1a   :  { %v3466_v41 = vrot.slane %v3327_v36, 4  ;;  %v3452_v21 = vrot.slane %v3451_v12, 1  ;;  %v3463_v25 = vadd.f32 %v3462_v39, %v3461_v37  ;;  %v3832_v16 = vsel %vm2690_vm11, %v3441_v40, %v3831_v43 }
0x1a1b   :  { %v3555_v63 = vadd.f32 %v3554_v47, %v3553_v51  ;;  %v3511_v57 = vadd.f32 %v3510_v34, %v3509_v7  ;;  %v3833_v59 = vsel %vm2692_vm12, %v3447_v15, %v3832_v16  ;;  %v3459_v35 = vadd.f32 %v3458_v56, %v3457_v55 }
0x1a1c   :  { %v3467_v14 = vadd.f32 %v3466_v41, %v3327_v36  ;;  %v3028_v30 = vrot.slane %v5559_v54, %v5799_v49  ;;  %v3453_v8 = vadd.f32 %v3452_v21, %v3451_v12  ;;  %v3464_v9 = vrot.slane %v3463_v25, 1  ;;  %v3080_v54 = vpop.permute.xlu0 %3079 }
0x1a1d   :  { %v6069_v45 = vsel %vm2696_vm14, %v3555_v63, %v3848_v1  ;;  %v3512_v18 = vrot.slane %v3511_v57, 1  ;;  %v3342_v12 = vmul.f32 %v3080_v54, %v5929_v2 }
0x1a1e   :  { %v3468_v33 = vrot.slane %v3467_v14, 2  ;;  %v3834_v28 = vsel %vm2694_vm13, %v3453_v8, %v3833_v59  ;;  %v3465_v27 = vadd.f32 %v3464_v9, %v3463_v25 }
0x1a1f   :  { %v3513_v19 = vadd.f32 %v3512_v18, %v3511_v57  ;;  %v3835_v1 = vsel %vm2696_vm14, %v3459_v35, %v3834_v28  ;;  %v3556_v62 = vrot.slane %v3342_v12, 4 }
0x1a20   :  { %v3469_v37 = vadd.f32 %v3468_v33, %v3467_v14  ;;  %3030 = vbcast.lane.b32.xlu0 %v3028_v30, 256  ;;  %v3836_v13 = vsel %vm2698_vm15, %v3465_v27, %v3835_v1 }
0x1a21   :  { %v6076_v4 = vsel %vm2698_vm15, %v3513_v19, %v3842_v26  ;;  %v3557_v10 = vadd.f32 %v3556_v62, %v3342_v12 }
0x1a22   :  { %v3470_v3 = vrot.slane %v3469_v37, 1 }
0x1a23   :  { %v3558_v51 = vrot.slane %v3557_v10, 2 }
0x1a24   :  { %v3471_v24 = vadd.f32 %v3470_v3, %v3469_v37 }
0x1a25   :  { %v3559_v34 = vadd.f32 %v3558_v51, %v3557_v10 }
0x1a26   :  { %v3837_v17 = vsel %vm2700_vm2, %v3471_v24, %v3836_v13 }
0x1a27   :  { %3889 = vst [vmem:[#allocation20 + $0x8] sm:$0xff] %v3837_v17  ;;  %v3560_v14 = vrot.slane %v3559_v34, 1 }
0x1a29   :  { %v3561_v19 = vadd.f32 %v3560_v14, %v3559_v34 }
0x1a2b   :  { %v3850_v1 = vsel %vm2698_vm15, %v3561_v19, %v6069_v45 }
0x1a8b   :  { %v2836_v44 = vpop.xlane.xlu0 %2835 }
0x1a8c   :  { %4430 = vrcp.f32 %v2836_v44 }
0x1a8f   :  { %v2839_v55 = vpop.xlane.xlu0 %2838 }
0x1a90   :  { %4432 = vrcp.f32 %v2839_v55 }
0x1a91   :  { %v2830_v61 = vpop.xlane.xlu1 %2829 }
0x1a92   :  { %4434 = vrcp.f32 %v2830_v61 }
0x1a93   :  { %v2833_v39 = vpop.xlane.xlu0 %2832 }
0x1a94   :  { %4436 = vrcp.f32 %v2833_v39 }
0x1a95   :  { %v3087_v7 = vpop.permute.xlu1 %3086 }
0x1a96   :  { %v3343_v29 = vmul.f32 %v3087_v7, %v5943_v58 }
0x1a97   :  { %v3031_v26 = vpop.permute.xlu0 %3030 }
0x1a98   :  { %v3562_v36 = vrot.slane %v3343_v29, 4  ;;  %v3335_v40 = vmul.f32 %v3031_v26, %v5943_v58 }
0x1a99   :  { %v4431_v47 = vpop.eup %4430 }
0x1a9a   :  { %v6085_v43 = vmul.f32 %v4431_v47, %v6019_v53  ;;  %v3563_v15 = vadd.f32 %v3562_v36, %v3343_v29  ;;  %v3514_v56 = vrot.slane %v3335_v40, 4 }
0x1a9c   :  { %2862 = vst.msk [vmem:[%s6275_s16 + $0x30] sm:$0xff] %vm2767_vm3, %v6085_v43  ;;  %v3564_v41 = vrot.slane %v3563_v15, 2  ;;  %v3515_v21 = vadd.f32 %v3514_v56, %v3335_v40  ;;  %v3210_v25 = vrot.slane %v6085_v43, %v5454_v32  ;;  %v3203_v63 = vrot.slane %v6085_v43, %v5022_v50 }
0x1a9d   :  { %v4433_v57 = vpop.eup %4432  ;;  %v3238_v35 = vrot.slane %v6085_v43, %v5789_v0  ;;  %v3224_v13 = vrot.slane %v6085_v43, %v5779_v5  ;;  %v3231_v17 = vrot.slane %v6085_v43, %v5792_v48  ;;  %v3245_v12 = vrot.slane %v6085_v43, %v5802_v22 }
0x1a9e   :  { %v6097_v53 = vmul.f32 %v4433_v57, %v6010_v23  ;;  %v3565_v16 = vadd.f32 %v3564_v41, %v3563_v15  ;;  %v3516_v18 = vrot.slane %v3515_v21, 2  ;;  %3212 = vbcast.lane.b32.xlu0 %v3210_v25, 256  ;;  %3205 = vbcast.lane.b32.xlu1 %v3203_v63, 256  ;;  %v3217_v23 = vrot.slane %v6085_v43, %v5782_v31 }
0x1a9f   :  { %v4435_v59 = vpop.eup %4434 }
0x1aa0   :  { %v2849_v33 = vmul.f32 %v4435_v59, %v6027_v42  ;;  %2863 = vst.msk [vmem:[%s6275_s16 + $0x38] sm:$0xff] %vm2767_vm3, %v6097_v53  ;;  %v3566_v30 = vrot.slane %v3565_v16, 1  ;;  %v3517_v8 = vadd.f32 %v3516_v18, %v3515_v21  ;;  %v3273_v55 = vrot.slane %v6097_v53, %v5782_v31 }
0x1aa1   :  { %v4437_v9 = vpop.eup %4436  ;;  %v3280_v61 = vrot.slane %v6097_v53, %v5779_v5  ;;  %v3287_v51 = vrot.slane %v6097_v53, %v5792_v48  ;;  %v3301_v29 = vrot.slane %v6097_v53, %v5802_v22  ;;  %v3259_v26 = vrot.slane %v6097_v53, %v5022_v50 }
0x1aa2   :  { %2860 = vst.msk [vmem:[%s6275_s16 + $0x20] sm:$0xff] %vm2767_vm3, %v2849_v33  ;;  %v3567_v37 = vadd.f32 %v3566_v30, %v3565_v16  ;;  %v2851_v42 = vmul.f32 %v4437_v9, %v6030_v60  ;;  %v3518_v28 = vrot.slane %v3517_v8, 1  ;;  %3240 = vbcast.lane.b32.xlu0 %v3238_v35, 256  ;;  %3219 = vbcast.lane.b32.xlu1 %v3217_v23, 256 }
0x1aa3   :  { %v3098_v24 = vrot.slane %v2849_v33, %v5454_v32  ;;  %v3126_v45 = vrot.slane %v2849_v33, %v5789_v0  ;;  %v3140_v54 = vrot.slane %v2849_v33, %v5799_v49  ;;  %v3091_v44 = vrot.slane %v2849_v33, %v5022_v50 }
0x1aa4   :  { %v3851_v3 = vsel %vm2700_vm2, %v3567_v37, %v3850_v1  ;;  %2861 = vst.msk [vmem:[%s6275_s16 + $0x28] sm:$0xff] %vm2767_vm3, %v2851_v42  ;;  %v3519_v27 = vadd.f32 %v3518_v28, %v3517_v8  ;;  %v3105_v62 = vrot.slane %v2849_v33, %v5782_v31  ;;  %v3112_v10 = vrot.slane %v2849_v33, %v5779_v5  ;;  %s4683_s16 = smov [#allocation18]  }
0x1aa5   :  { %3891 = vst [vmem:[#allocation20 + $0x18] sm:$0xff] %v3851_v3  ;;  %v3119_v39 = vrot.slane %v2849_v33, %v5792_v48  ;;  %v3133_v7 = vrot.slane %v2849_v33, %v5802_v22  ;;  %v3154_v36 = vrot.slane %v2851_v42, %v5454_v32  ;;  %v3294_v40 = vrot.slane %v6097_v53, %v5789_v0  ;;  %s3914_s8 = sshll.u32 %s4683_s16, 4  ;;  %s3915_s8 = int_to_ptr.vmem [resolvable:$true] %s3914_s8 }
0x1aa6   :  { %v3844_v60 = vsel %vm2700_vm2, %v3519_v27, %v6076_v4  ;;  %3100 = vbcast.lane.b32.xlu0 %v3098_v24, 256  ;;  %3226 = vbcast.lane.b32.xlu1 %v3224_v13, 256  ;;  %v3266_v4 = vrot.slane %v6097_v53, %v5454_v32  ;;  %v3161_v47 = vrot.slane %v2851_v42, %v5782_v31  ;;  %s4592_s9 = scalar_lea.vmem %s3915_s8, 128  ;;  %p4597_p8 = scmp.lt.s32.totalorder %s3915_s8, %s3915_s8 }
0x1aa7   :  { %3890 = vst [vmem:[#allocation20 + $0x10] sm:$0xff] %v3844_v60  ;;  %v3168_v34 = vrot.slane %v2851_v42, %v5779_v5  ;;  %v3147_v15 = vrot.slane %v2851_v42, %v5022_v50  ;;  %v3175_v56 = vrot.slane %v2851_v42, %v5792_v48  ;;  %v3182_v41 = vrot.slane %v2851_v42, %v5789_v0  ;;  %p4593_p7 = scmp.ne.s32.totalorder %s3915_s8, %s4592_s9  ;;  %p4598_p9 = scmp.lt.s32.totalorder %s4592_s9, %s4592_s9 }
0x1aa8   :  { %v3189_v32 = vrot.slane %v2851_v42, %v5802_v22  ;;  %v3196_v21 = vrot.slane %v2851_v42, %v5799_v49  ;;  %v3252_v31 = vrot.slane %v6085_v43, %v5799_v49  ;;  %v3308_v50 = vrot.slane %v6097_v53, %v5799_v49 }
0x1aa9   :  { %p4599_p10 = por %p4598_p9, %p4597_p8 }
0x1aaa   :  { %3128 = vbcast.lane.b32.xlu0 %v3126_v45, 256  ;;  %3233 = vbcast.lane.b32.xlu1 %v3231_v17, 256 }
0x1aab   :  { %p4600_p11 = pnand %p4599_p10, %p4593_p7 }
0x1aae   :  { %3142 = vbcast.lane.b32.xlu0 %v3140_v54, 256  ;;  %3247 = vbcast.lane.b32.xlu1 %v3245_v12, 256 }
0x1ab2   :  { %3093 = vbcast.lane.b32.xlu1 %v3091_v44, 256  ;;  %3268 = vbcast.lane.b32.xlu0 %v3266_v4, 256 }
0x1ab6   :  { %3107 = vbcast.lane.b32.xlu1 %v3105_v62, 256  ;;  %3275 = vbcast.lane.b32.xlu0 %v3273_v55, 256 }
0x1aba   :  { %3114 = vbcast.lane.b32.xlu1 %v3112_v10, 256  ;;  %3282 = vbcast.lane.b32.xlu0 %v3280_v61, 256 }
0x1abe   :  { %3121 = vbcast.lane.b32.xlu1 %v3119_v39, 256  ;;  %3289 = vbcast.lane.b32.xlu0 %v3287_v51, 256 }
0x1ac2   :  { %3135 = vbcast.lane.b32.xlu1 %v3133_v7, 256  ;;  %3303 = vbcast.lane.b32.xlu0 %v3301_v29, 256 }
0x1ac6   :  { %3261 = vbcast.lane.b32.xlu1 %v3259_v26, 256  ;;  %3156 = vbcast.lane.b32.xlu0 %v3154_v36, 256 }
0x1aca   :  { %3296 = vbcast.lane.b32.xlu1 %v3294_v40, 256  ;;  %3163 = vbcast.lane.b32.xlu0 %v3161_v47, 256 }
0x1ace   :  { %3170 = vbcast.lane.b32.xlu0 %v3168_v34, 256  ;;  %3149 = vbcast.lane.b32.xlu1 %v3147_v15, 256 }
0x1ad2   :  { %3177 = vbcast.lane.b32.xlu0 %v3175_v56, 256  ;;  %3184 = vbcast.lane.b32.xlu1 %v3182_v41, 256 }
0x1ad6   :  { %3191 = vbcast.lane.b32.xlu0 %v3189_v32, 256  ;;  %3198 = vbcast.lane.b32.xlu1 %v3196_v21, 256 }
0x1ada   :  { %3254 = vbcast.lane.b32.xlu0 %v3252_v31, 256  ;;  %3310 = vbcast.lane.b32.xlu1 %v3308_v50, 256 }
0x1adb   :  { %4603 = shalt.err (!%p4600_p11)
}
0x1adc   :  { %3917 = dma.vmem_to_hbm [thread:$0]  %s3915_s8, 128, %s6273_s14, [#allocation19]  }
0x1add   :  { %s4612_s28 = scalar_lea.vmem %s3905_s17, 128  ;;  %p4617_p13 = scmp.lt.s32.totalorder %s3905_s17, %s3905_s17 }
0x1ade   :  { %p4613_p12 = scmp.ne.s32.totalorder %s3905_s17, %s4612_s28  ;;  %p4618_p0 = scmp.lt.s32.totalorder %s4612_s28, %s4612_s28 }
0x1ae0   :  { %p4619_p1 = por %p4618_p0, %p4617_p13 }
0x1ae2   :  { %p4620_p2 = pnand %p4619_p1, %p4613_p12 }
0x1ae4   :  { %4623 = shalt.err (!%p4620_p2)
}
0x1ae5   :  { %3907 = dma.vmem_to_hbm [thread:$0]  %s3905_s17, 128, %s6272_s13, [#allocation5]  }
0x1ae6   :  { %s4685_s13 = smov [#allocation20]  }
0x1ae7   :  { %s3923_s14 = sshll.u32 %s4685_s13, 4  ;;  %s3924_s14 = int_to_ptr.vmem [resolvable:$true] %s3923_s14 }
0x1ae8   :  { %s4632_s30 = scalar_lea.vmem %s3924_s14, 1024  ;;  %p4637_p4 = scmp.lt.s32.totalorder %s3924_s14, %s3924_s14 }
0x1ae9   :  { %p4633_p3 = scmp.ne.s32.totalorder %s3924_s14, %s4632_s30  ;;  %p4638_p5 = scmp.lt.s32.totalorder %s4632_s30, %s4632_s30 }
0x1aeb   :  { %p4639_p6 = por %p4638_p5, %p4637_p4 }
0x1aed   :  { %p4640_p7 = pnand %p4639_p6, %p4633_p3 }
0x1b10   :  { %v3206_v5 = vpop.permute.xlu1 %3205  ;;  %v3213_v0 = vpop.permute.xlu0 %3212 }
0x1b11   :  { %v3360_v48 = vmul.f32 %v3206_v5, %v5834_v20  ;;  %v3361_v49 = vmul.f32 %v3213_v0, %v5832_v46 }
0x1b13   :  { %v3664_v22 = vrot.slane %v3360_v48, 4  ;;  %v3670_v43 = vrot.slane %v3361_v49, 4 }
0x1b14   :  { %v3220_v25 = vpop.permute.xlu1 %3219  ;;  %v3241_v63 = vpop.permute.xlu0 %3240 }
0x1b15   :  { %v3362_v57 = vmul.f32 %v3220_v25, %v5848_v52  ;;  %v3665_v14 = vadd.f32 %v3664_v22, %v3360_v48  ;;  %v3671_v53 = vadd.f32 %v3670_v43, %v3361_v49  ;;  %v3365_v35 = vmul.f32 %v3241_v63, %v5937_v38 }
0x1b17   :  { %v3676_v59 = vrot.slane %v3362_v57, 4  ;;  %v3666_v8 = vrot.slane %v3665_v14, 2  ;;  %v3672_v23 = vrot.slane %v3671_v53, 2  ;;  %v3694_v1 = vrot.slane %v3365_v35, 4 }
0x1b18   :  { %v3227_v16 = vpop.permute.xlu1 %3226  ;;  %v3101_v18 = vpop.permute.xlu0 %3100 }
0x1b19   :  { %v3363_v33 = vmul.f32 %v3227_v16, %v5850_v6  ;;  %v3345_v30 = vmul.f32 %v3101_v18, %v5832_v46  ;;  %v3677_v42 = vadd.f32 %v3676_v59, %v3362_v57  ;;  %v3667_v13 = vadd.f32 %v3666_v8, %v3665_v14 }
0x1b1a   :  { %v3673_v60 = vadd.f32 %v3672_v23, %v3671_v53  ;;  %v3695_v4 = vadd.f32 %v3694_v1, %v3365_v35 }
0x1b1b   :  { %v3682_v9 = vrot.slane %v3363_v33, 4  ;;  %v3574_v28 = vrot.slane %v3345_v30, 4  ;;  %v3678_v54 = vrot.slane %v3677_v42, 2  ;;  %v3668_v61 = vrot.slane %v3667_v13, 1 }
0x1b1c   :  { %v3234_v19 = vpop.permute.xlu1 %3233  ;;  %v3129_v37 = vpop.permute.xlu0 %3128  ;;  %v3674_v39 = vrot.slane %v3673_v60, 1  ;;  %v3696_v15 = vrot.slane %v3695_v4, 2 }
0x1b1d   :  { %v3364_v3 = vmul.f32 %v3234_v19, %v5909_v11  ;;  %v3683_v27 = vadd.f32 %v3682_v9, %v3363_v33  ;;  %v3349_v24 = vmul.f32 %v3129_v37, %v5937_v38  ;;  %v3575_v12 = vadd.f32 %v3574_v28, %v3345_v30 }
0x1b1e   :  { %v3679_v36 = vadd.f32 %v3678_v54, %v3677_v42  ;;  %v3669_v50 = vadd.f32 %v3668_v61, %v3667_v13  ;;  %v3675_v5 = vadd.f32 %v3674_v39, %v3673_v60  ;;  %v6183_v33 = vadd.f32 %v3696_v15, %v3695_v4 }
0x1b1f   :  { %v3688_v62 = vrot.slane %v3364_v3, 4  ;;  %v3684_v55 = vrot.slane %v3683_v27, 2  ;;  %v3598_v10 = vrot.slane %v3349_v24, 4  ;;  %v3576_v40 = vrot.slane %v3575_v12, 2 }
0x1b20   :  { %v3248_v45 = vpop.permute.xlu1 %3247  ;;  %v3143_v17 = vpop.permute.xlu0 %3142  ;;  %v3680_v43 = vrot.slane %v3679_v36, 1  ;;  %v6186_v37 = vsel %vm2688_vm9, %v3675_v5, %v3669_v50 }
0x1b21   :  { %v3351_v44 = vmul.f32 %v3143_v17, %v5943_v58  ;;  %v3366_v51 = vmul.f32 %v3248_v45, %v5929_v2  ;;  %v3689_v56 = vadd.f32 %v3688_v62, %v3364_v3  ;;  %v3685_v41 = vadd.f32 %v3684_v55, %v3683_v27 }
0x1b22   :  { %v3599_v32 = vadd.f32 %v3598_v10, %v3349_v24  ;;  %v3577_v25 = vadd.f32 %v3576_v40, %v3575_v12  ;;  %v6188_v42 = vadd.f32 %v3680_v43, %v3679_v36 }
0x1b23   :  { %v3610_v7 = vrot.slane %v3351_v44, 4  ;;  %v3700_v0 = vrot.slane %v3366_v51, 4  ;;  %v3690_v14 = vrot.slane %v3689_v56, 2  ;;  %v3686_v18 = vrot.slane %v3685_v41, 1 }
0x1b24   :  { %v3094_v29 = vpop.permute.xlu1 %3093  ;;  %v3269_v26 = vpop.permute.xlu0 %3268  ;;  %v3600_v59 = vrot.slane %v3599_v32, 2  ;;  %v3578_v28 = vrot.slane %v3577_v25, 1 }
0x1b25   :  { %v3344_v47 = vmul.f32 %v3094_v29, %v5834_v20  ;;  %v3369_v34 = vmul.f32 %v3269_v26, %v5832_v46  ;;  %v3611_v48 = vadd.f32 %v3610_v7, %v3351_v44  ;;  %v3701_v30 = vadd.f32 %v3700_v0, %v3366_v51 }
0x1b26   :  { %v3691_v3 = vadd.f32 %v3690_v14, %v3689_v56  ;;  %v6191_v60 = vadd.f32 %v3686_v18, %v3685_v41  ;;  %v3601_v45 = vadd.f32 %v3600_v59, %v3599_v32 }
0x1b27   :  { %v3568_v21 = vrot.slane %v3344_v47, 4  ;;  %v3718_v31 = vrot.slane %v3369_v34, 4  ;;  %v3612_v8 = vrot.slane %v3611_v48, 2  ;;  %v3702_v12 = vrot.slane %v3701_v30, 2 }
0x1b28   :  { %v3108_v49 = vpop.permute.xlu1 %3107  ;;  %v3276_v22 = vpop.permute.xlu0 %3275  ;;  %v3692_v29 = vrot.slane %v3691_v3, 1 }
0x1b29   :  { %v3569_v63 = vadd.f32 %v3568_v21, %v3344_v47  ;;  %v3719_v57 = vadd.f32 %v3718_v31, %v3369_v34  ;;  %v3346_v53 = vmul.f32 %v3108_v49, %v5848_v52  ;;  %v3370_v16 = vmul.f32 %v3276_v22, %v5848_v52 }
0x1b2a   :  { %v3613_v44 = vadd.f32 %v3612_v8, %v3611_v48  ;;  %v3579_v47 = vadd.f32 %v3578_v28, %v3577_v25  ;;  %v3602_v34 = vrot.slane %v3601_v45, 1  ;;  %v6197_v43 = vadd.f32 %v3692_v29, %v3691_v3 }
0x1b2b   :  { %v3570_v35 = vrot.slane %v3569_v63, 2  ;;  %v3580_v23 = vrot.slane %v3346_v53, 4  ;;  %v3720_v1 = vrot.slane %v3719_v57, 2  ;;  %v3724_v24 = vrot.slane %v3370_v16, 4 }
0x1b2c   :  { %v3115_v9 = vpop.permute.xlu1 %3114  ;;  %v3283_v19 = vpop.permute.xlu0 %3282  ;;  %v3614_v41 = vrot.slane %v3613_v44, 1  ;;  %v3603_v14 = vadd.f32 %v3602_v34, %v3601_v45 }
0x1b2d   :  { %v3581_v27 = vadd.f32 %v3580_v23, %v3346_v53  ;;  %v3347_v13 = vmul.f32 %v3115_v9, %v5850_v6  ;;  %v3571_v17 = vadd.f32 %v3570_v35, %v3569_v63  ;;  %v3371_v54 = vmul.f32 %v3283_v19, %v5850_v6 }
0x1b2e   :  { %v3721_v61 = vadd.f32 %v3720_v1, %v3719_v57  ;;  %v3725_v36 = vadd.f32 %v3724_v24, %v3370_v16  ;;  %v6199_v63 = vadd.f32 %v3702_v12, %v3701_v30  ;;  %v3615_v59 = vadd.f32 %v3614_v41, %v3613_v44 }
0x1b2f   :  { %v3582_v4 = vrot.slane %v3581_v27, 2  ;;  %v3586_v62 = vrot.slane %v3347_v13, 4  ;;  %v3730_v39 = vrot.slane %v3371_v54, 4  ;;  %v3572_v15 = vrot.slane %v3571_v17, 1 }
0x1b30   :  { %v3122_v55 = vpop.permute.xlu1 %3121  ;;  %v3290_v10 = vpop.permute.xlu0 %3289  ;;  %v3722_v0 = vrot.slane %v3721_v61, 1  ;;  %v3726_v57 = vrot.slane %v3725_v36, 2 }
0x1b31   :  { %v3348_v51 = vmul.f32 %v3122_v55, %v5909_v11  ;;  %v3372_v7 = vmul.f32 %v3290_v10, %v5909_v11  ;;  %v3583_v26 = vadd.f32 %v3582_v4, %v3581_v27  ;;  %v3587_v40 = vadd.f32 %v3586_v62, %v3347_v13 }
0x1b32   :  { %v3731_v21 = vadd.f32 %v3730_v39, %v3371_v54  ;;  %v3573_v53 = vadd.f32 %v3572_v15, %v3571_v17  ;;  %v6201_v28 = vadd.f32 %v3722_v0, %v3721_v61  ;;  %v6203_v24 = vadd.f32 %v3726_v57, %v3725_v36 }
0x1b33   :  { %v3592_v56 = vrot.slane %v3348_v51, 4  ;;  %v3588_v32 = vrot.slane %v3587_v40, 2  ;;  %v3736_v31 = vrot.slane %v3372_v7, 4  ;;  %v3584_v48 = vrot.slane %v3583_v26, 1 }
0x1b34   :  { %v3136_v50 = vpop.permute.xlu1 %3135  ;;  %v3304_v5 = vpop.permute.xlu0 %3303  ;;  %v3732_v8 = vrot.slane %v3731_v21, 2  ;;  %v3852_v17 = vsel %vm2688_vm9, %v3579_v47, %v3573_v53  ;;  %v3728_v34 = vrot.slane %v6203_v24, 1 }
0x1b35   :  { %v3593_v49 = vadd.f32 %v3592_v56, %v3348_v51  ;;  %v3350_v22 = vmul.f32 %v3136_v50, %v5929_v2  ;;  %v3589_v25 = vadd.f32 %v3588_v32, %v3587_v40  ;;  %v3737_v23 = vadd.f32 %v3736_v31, %v3372_v7 }
0x1b36   :  { %v3585_v1 = vadd.f32 %v3584_v48, %v3583_v26  ;;  %v3374_v44 = vmul.f32 %v3304_v5, %v5929_v2  ;;  %v3733_v4 = vadd.f32 %v3732_v8, %v3731_v21 }
0x1b37   :  { %v3594_v16 = vrot.slane %v3593_v49, 2  ;;  %v3604_v18 = vrot.slane %v3350_v22, 4  ;;  %v3590_v35 = vrot.slane %v3589_v25, 1  ;;  %v3738_v62 = vrot.slane %v3737_v23, 2 }
0x1b38   :  { %v3262_v9 = vpop.permute.xlu1 %3261  ;;  %v3157_v19 = vpop.permute.xlu0 %3156  ;;  %v3853_v51 = vsel %vm2690_vm11, %v3585_v1, %v3852_v17  ;;  %v3734_v32 = vrot.slane %v3733_v4, 1  ;;  %v3748_v21 = vrot.slane %v3374_v44, 4 }
0x1b39   :  { %v3595_v27 = vadd.f32 %v3594_v16, %v3593_v49  ;;  %v3605_v3 = vadd.f32 %v3604_v18, %v3350_v22  ;;  %v3591_v30 = vadd.f32 %v3590_v35, %v3589_v25  ;;  %v3368_v13 = vmul.f32 %v3262_v9, %v5834_v20 }
0x1b3a   :  { %v3353_v45 = vmul.f32 %v3157_v19, %v5832_v46  ;;  %v3739_v25 = vadd.f32 %v3738_v62, %v3737_v23 }
0x1b3b   :  { %v3596_v54 = vrot.slane %v3595_v27, 1  ;;  %v3606_v12 = vrot.slane %v3605_v3, 2  ;;  %v3712_v55 = vrot.slane %v3368_v13, 4  ;;  %v3854_v46 = vsel %vm2692_vm12, %v3591_v30, %v3853_v51 }
0x1b3c   :  { %v3622_v10 = vrot.slane %v3353_v45, 4  ;;  %v3297_v61 = vpop.permute.xlu1 %3296  ;;  %v3164_v39 = vpop.permute.xlu0 %3163  ;;  %v3740_v17 = vrot.slane %v3739_v25, 1 }
0x1b3d   :  { %v3597_v7 = vadd.f32 %v3596_v54, %v3595_v27  ;;  %v3607_v29 = vadd.f32 %v3606_v12, %v3605_v3  ;;  %v3373_v26 = vmul.f32 %v3297_v61, %v5937_v38  ;;  %v3713_v36 = vadd.f32 %v3712_v55, %v3368_v13 }
0x1b3e   :  { %v3623_v40 = vadd.f32 %v3622_v10, %v3353_v45  ;;  %v3354_v47 = vmul.f32 %v3164_v39, %v5848_v52  ;;  %v3729_v61 = vadd.f32 %v3728_v34, %v6203_v24 }
0x1b3f   :  { %v3855_v15 = vsel %vm2694_vm13, %v3597_v7, %v3854_v46  ;;  %v3608_v56 = vrot.slane %v3607_v29, 1  ;;  %v3742_v41 = vrot.slane %v3373_v26, 4  ;;  %v3714_v31 = vrot.slane %v3713_v36, 2 }
0x1b40   :  { %v3624_v50 = vrot.slane %v3623_v40, 2  ;;  %v3150_v5 = vpop.permute.xlu1 %3149  ;;  %v3171_v0 = vpop.permute.xlu0 %3170  ;;  %v3628_v22 = vrot.slane %v3354_v47, 4  ;;  %v3856_v52 = vsel %vm2696_vm14, %v3603_v14, %v3855_v15 }
0x1b41   :  { %v3609_v48 = vadd.f32 %v3608_v56, %v3607_v29  ;;  %v3743_v49 = vadd.f32 %v3742_v41, %v3373_v26  ;;  %v3352_v57 = vmul.f32 %v3150_v5, %v5834_v20  ;;  %v3715_v53 = vadd.f32 %v3714_v31, %v3713_v36 }
0x1b42   :  { %v3355_v16 = vmul.f32 %v3171_v0, %v5850_v6  ;;  %v3625_v35 = vadd.f32 %v3624_v50, %v3623_v40  ;;  %v3629_v8 = vadd.f32 %v3628_v22, %v3354_v47  ;;  %v3749_v20 = vadd.f32 %v3748_v21, %v3374_v44 }
0x1b43   :  { %v3857_v18 = vsel %vm2698_vm15, %v3609_v48, %v3856_v52  ;;  %v3616_v9 = vrot.slane %v3352_v57, 4  ;;  %v3716_v1 = vrot.slane %v3715_v53, 1  ;;  %v3744_v27 = vrot.slane %v3743_v49, 2 }
0x1b44   :  { %v3858_v19 = vsel %vm2700_vm2, %v3615_v59, %v3857_v18  ;;  %v3634_v3 = vrot.slane %v3355_v16, 4  ;;  %v3185_v30 = vpop.permute.xlu1 %3184  ;;  %v3178_v13 = vpop.permute.xlu0 %3177  ;;  %v3630_v23 = vrot.slane %v3629_v8, 2  ;;  %v3626_v62 = vrot.slane %v3625_v35, 1 }
0x1b45   :  { %3892 = vst [vmem:[#allocation20 + $0x20] sm:$0xff] %v3858_v19  ;;  %v3617_v45 = vadd.f32 %v3616_v9, %v3352_v57  ;;  %v3357_v14 = vmul.f32 %v3185_v30, %v5937_v38  ;;  %v3717_v6 = vadd.f32 %v3716_v1, %v3715_v53  ;;  %v3356_v12 = vmul.f32 %v3178_v13, %v5909_v11 }
0x1b46   :  { %v3635_v54 = vadd.f32 %v3634_v3, %v3355_v16  ;;  %v3631_v55 = vadd.f32 %v3630_v23, %v3629_v8  ;;  %v3745_v39 = vadd.f32 %v3744_v27, %v3743_v49  ;;  %v3735_v26 = vadd.f32 %v3734_v32, %v3733_v4 }
0x1b47   :  { %v3618_v10 = vrot.slane %v3617_v45, 2  ;;  %v3646_v59 = vrot.slane %v3357_v14, 4  ;;  %v3640_v7 = vrot.slane %v3356_v12, 4  ;;  %v3750_v46 = vrot.slane %v3749_v20, 2 }
0x1b48   :  { %v3636_v51 = vrot.slane %v3635_v54, 2  ;;  %v3199_v29 = vpop.permute.xlu1 %3198  ;;  %v3192_v44 = vpop.permute.xlu0 %3191  ;;  %v3873_v38 = vsel %vm2688_vm9, %v6201_v28, %v3717_v6  ;;  %v3632_v40 = vrot.slane %v3631_v55, 1  ;;  %v3741_v56 = vadd.f32 %v3740_v17, %v3739_v25 }
0x1b49   :  { %v3619_v36 = vadd.f32 %v3618_v10, %v3617_v45  ;;  %v3647_v11 = vadd.f32 %v3646_v59, %v3357_v14  ;;  %v3641_v15 = vadd.f32 %v3640_v7, %v3356_v12  ;;  %v3627_v41 = vadd.f32 %v3626_v62, %v3625_v35 }
0x1b4a   :  { %v3637_v47 = vadd.f32 %v3636_v51, %v3635_v54  ;;  %v3359_v24 = vmul.f32 %v3199_v29, %v5943_v58  ;;  %v3874_v34 = vsel %vm2690_vm11, %v3729_v61, %v3873_v38  ;;  %v3746_v31 = vrot.slane %v3745_v39, 1 }
0x1b4b   :  { %v3620_v21 = vrot.slane %v3619_v36, 1  ;;  %v3648_v50 = vrot.slane %v3647_v11, 2  ;;  %v3642_v5 = vrot.slane %v3641_v15, 2  ;;  %v3358_v28 = vmul.f32 %v3192_v44, %v5929_v2 }
0x1b4c   :  { %v3311_v4 = vpop.permute.xlu1 %3310  ;;  %v3658_v0 = vrot.slane %v3359_v24, 4  ;;  %v3255_v49 = vpop.permute.xlu0 %3254  ;;  %v3633_v22 = vadd.f32 %v3632_v40, %v3631_v55  ;;  %v3638_v57 = vrot.slane %v3637_v47, 1  ;;  %v3751_v8 = vadd.f32 %v3750_v46, %v3749_v20 }
0x1b4d   :  { %v3621_v32 = vadd.f32 %v3620_v21, %v3619_v36  ;;  %v3375_v48 = vmul.f32 %v3311_v4, %v5943_v58  ;;  %v3649_v25 = vadd.f32 %v3648_v50, %v3647_v11  ;;  %v3643_v52 = vadd.f32 %v3642_v5, %v3641_v15 }
0x1b4e   :  { %v3659_v16 = vadd.f32 %v3658_v0, %v3359_v24  ;;  %v3652_v18 = vrot.slane %v3358_v28, 4  ;;  %v3875_v9 = vsel %vm2692_vm12, %v3735_v26, %v3874_v34  ;;  %v3367_v1 = vmul.f32 %v3255_v49, %v5943_v58 }
0x1b4f   :  { %v3859_v53 = vsel %vm2688_vm9, %v3627_v41, %v3621_v32  ;;  %v3754_v35 = vrot.slane %v3375_v48, 4  ;;  %v3644_v19 = vrot.slane %v3643_v52, 1  ;;  %v3747_v13 = vadd.f32 %v3746_v31, %v3745_v39 }
0x1b50   :  { %v3860_v2 = vsel %vm2690_vm11, %v3633_v22, %v3859_v53  ;;  %v3660_v27 = vrot.slane %v3659_v16, 2  ;;  %v3653_v3 = vadd.f32 %v3652_v18, %v3358_v28  ;;  %v3639_v23 = vadd.f32 %v3638_v57, %v3637_v47 }
0x1b51   :  { %v3755_v30 = vadd.f32 %v3754_v35, %v3375_v48  ;;  %v3650_v45 = vrot.slane %v3649_v25, 1  ;;  %v3706_v14 = vrot.slane %v3367_v1, 4  ;;  %v3645_v17 = vadd.f32 %v3644_v19, %v3643_v52 }
0x1b52   :  { %v3661_v6 = vadd.f32 %v3660_v27, %v3659_v16  ;;  %v3654_v54 = vrot.slane %v3653_v3, 2  ;;  %v3752_v62 = vrot.slane %v3751_v8, 1  ;;  %v3876_v20 = vsel %vm2694_vm13, %v3741_v56, %v3875_v9 }
0x1b53   :  { %v3756_v12 = vrot.slane %v3755_v30, 2  ;;  %v3861_v55 = vsel %vm2692_vm12, %v3639_v23, %v3860_v2  ;;  %v3707_v10 = vadd.f32 %v3706_v14, %v3367_v1  ;;  %v3704_v58 = vrot.slane %v6199_v63, 1 }
0x1b54   :  { %v3662_v59 = vrot.slane %v3661_v6, 1  ;;  %v3655_v61 = vadd.f32 %v3654_v54, %v3653_v3  ;;  %v3867_v39 = vsel %vm2690_vm11, %v6188_v42, %v6186_v37  ;;  %v3698_v7 = vrot.slane %v6183_v33, 1 }
0x1b55   :  { %v3757_v51 = vadd.f32 %v3756_v12, %v3755_v30  ;;  %v3651_v29 = vadd.f32 %v3650_v45, %v3649_v25  ;;  %v3708_v44 = vrot.slane %v3707_v10, 2  ;;  %v3877_v26 = vsel %vm2696_vm14, %v3747_v13, %v3876_v20 }
0x1b56   :  { %v3862_v46 = vsel %vm2694_vm13, %v3645_v17, %v3861_v55  ;;  %v3656_v38 = vrot.slane %v3655_v61, 1  ;;  %v3868_v40 = vsel %vm2692_vm12, %v6191_v60, %v3867_v39  ;;  %v3753_v47 = vadd.f32 %v3752_v62, %v3751_v8 }
0x1b57   :  { %v3758_v36 = vrot.slane %v3757_v51, 1  ;;  %v3663_v11 = vadd.f32 %v3662_v59, %v3661_v6  ;;  %v3709_v15 = vadd.f32 %v3708_v44, %v3707_v10  ;;  %v3869_v56 = vsel %vm2694_vm13, %v6197_v43, %v3868_v40 }
0x1b58   :  { %v3705_v37 = vadd.f32 %v3704_v58, %v6199_v63  ;;  %v3657_v42 = vadd.f32 %v3656_v38, %v3655_v61  ;;  %v3699_v21 = vadd.f32 %v3698_v7, %v6183_v33  ;;  %v3863_v24 = vsel %vm2696_vm14, %v3651_v29, %v3862_v46 }
0x1b59   :  { %v3759_v41 = vadd.f32 %v3758_v36, %v3757_v51  ;;  %v3878_v34 = vsel %vm2698_vm15, %v3753_v47, %v3877_v26  ;;  %v3710_v31 = vrot.slane %v3709_v15, 1 }
0x1b5a   :  { %v3864_v60 = vsel %vm2698_vm15, %v3657_v42, %v3863_v24  ;;  %v3870_v5 = vsel %vm2696_vm14, %v3699_v21, %v3869_v56 }
0x1b5b   :  { %v3879_v50 = vsel %vm2700_vm2, %v3759_v41, %v3878_v34  ;;  %v3865_v43 = vsel %vm2700_vm2, %v3663_v11, %v3864_v60  ;;  %v3711_v63 = vadd.f32 %v3710_v31, %v3709_v15  ;;  %v3871_v4 = vsel %vm2698_vm15, %v3705_v37, %v3870_v5 }
0x1b5c   :  { %3895 = vst [vmem:[#allocation20 + $0x38] sm:$0xff] %v3879_v50  ;;  %3893 = vst [vmem:[#allocation20 + $0x28] sm:$0xff] %v3865_v43 }
0x1b5d   :  { %v3872_v33 = vsel %vm2700_vm2, %v3711_v63, %v3871_v4 }
0x1b5e   :  { %3894 = vst [vmem:[#allocation20 + $0x30] sm:$0xff] %v3872_v33 }
0x1b5f   :  { %4643 = shalt.err (!%p4640_p7)
}
0x1b60   :  { %s4686_s19 = smov 128   ;;  %s4687_s1 = smov 8  }
0x1b61   :  { %3929 = dma.vmem_to_hbm [thread:$0]  %s3924_s14, 1024, %s6274_s15, [#allocation19], %s4686_s19, %s4686_s19, %s4687_s1  }
0x1b62   :  { %4664 = dma.done.wait [#allocation5], 128  }
0x1b63   :  { %4665 = vsyncadd [#allocation5], 4294967168 }
0x1b64   :  { %4666 = dma.done.wait [#allocation19], 1152  }
0x1b65   :  { %4667 = vsyncadd [#allocation19], 4294966144 }
0x1b66   :  { %3945 = vsyncpa [#allocation4], 1 }
0x1b67   :  { %3946 = vsyncpa [#allocation8], 1 }
0x1b68   :  { %3947 = vsyncpa [#allocation11], 1 }
0x1b69   :  { %3948 = vsyncpa [#allocation14], 1 }
0x1b6a   :  { %3949 = vsyncpa [#allocation5], 1 }
0x1b6b   :  { %3950 = vsyncpa [#allocation19], 1 }
0x1b6c   :  { %3951 = vsyncpa [#allocation6], 1 }

</bundles_post_ra>
